<compile_context>
chip_gen: v7x
topology: tpu7x:2x2x1
jax: 0.10.0
libtpu: 0.0.40
codegen_flags: <defaults>
</compile_context>

<pallas_src>
import functools

import jax
import jax.numpy as jnp
import numpy as np
from jax.experimental import pallas as pl
from jax.experimental.pallas import tpu as pltpu

_SMALL_K = 8   # fan_in  <= this -> VPU broadcast-FMA path (skip MXU)
_SMALL_M = 8   # fan_out <= this -> VPU multiply + sublane-reduce path


def _round_up(x, m):
    return ((x + m - 1) // m) * m


# ----------------------------------------------------------------------------
# Pallas kernel: fused SIREN forward for one tile of points.
#   x_ref    : (in_features, tile_n)     points on the lane axis
#   wt_ref   : (L, Fout_max, Fin_max)    pre-transposed weights, omega folded
#   wcol_ref : (L, Fin_max, Fout_max)    untransposed weights (tiny-M path)
#   b_ref    : (L, Fout_max, 1)          biases, omega folded
#   out_ref  : (out_features, tile_n)
# ----------------------------------------------------------------------------
def _siren_kernel(x_ref, wt_ref, wcol_ref, b_ref, out_ref, *,
                  layer_dims, sine_flags, chunk_n, mxu_dtype):
    tile_n = x_ref.shape[1]
    num_chunks = tile_n // chunk_n

    # --- per-layer prep, hoisted out of the chunk loop ------------------------
    prepped = []
    for l, (fan_in, fan_out) in enumerate(layer_dims):
        b = b_ref[l, 0:fan_out, 0:1].astype(jnp.float32)            # (fan_out, 1)
        bc = jnp.broadcast_to(b, (fan_out, chunk_n))                 # hoisted bcast
        if fan_in <= _SMALL_K:
            # Tiny-K (e.g. 2-D coords): fan_in broadcast FMAs on the VPU.
            wt = wt_ref[l, 0:fan_out, 0:fan_in].astype(jnp.float32)
            wk = [jnp.broadcast_to(wt[:, k:k + 1], (fan_out, chunk_n))
                  for k in range(fan_in)]
            prepped.append(("tiny_k", wk, bc))
        elif fan_out <= _SMALL_M:
            # Tiny-M (e.g. single-output head): VPU mul + sublane reduce
            # instead of an M<=8 MXU pass.
            wm = [jnp.broadcast_to(
                      wcol_ref[l, 0:fan_in, m:m + 1].astype(jnp.float32),
                      (fan_in, chunk_n))
                  for m in range(fan_out)]
            prepped.append(("tiny_m", wm, bc))
        else:
            wt = wt_ref[l, 0:fan_out, 0:fan_in].astype(mxu_dtype)
            prepped.append(("mxu", wt, bc))

    # --- walk the tile in lane chunks so activations stay small ---------------
    @pl.loop(0, num_chunks)
    def _(c):
        off = pl.multiple_of(c * chunk_n, chunk_n)
        h = x_ref[:, pl.ds(off, chunk_n)].astype(jnp.float32)
        for l, (mode, wp, bc) in enumerate(prepped):
            if mode == "tiny_k":
                z = bc
                for k, wk in enumerate(wp):
                    # (1, chunk) sublane-broadcast of input row k per chunk.
                    z = z + wk * h[k:k + 1, :]
            elif mode == "tiny_m":
                rows = [jnp.sum(wm * h, axis=0, keepdims=True) for wm in wp]
                z = (rows[0] if len(rows) == 1
                     else jnp.concatenate(rows, axis=0)) + bc
            else:
                z = jnp.dot(wp, h.astype(wp.dtype),
                            preferred_element_type=jnp.float32) + bc
            h = jnp.sin(z) if sine_flags[l] else z
        out_ref[:, pl.ds(off, chunk_n)] = h.astype(out_ref.dtype)


# ----------------------------------------------------------------------------
# Wrapper
# ----------------------------------------------------------------------------
def siren_forward(coords, weights, biases, *, first_omega_0=30.0,
                  hidden_omega_0=30.0, outermost_linear=False,
                  tile_n=8192, chunk_n=256, mxu_dtype=jnp.float32):
    """coords: (N, in_features); weights[i]: (fan_in_i, fan_out_i);
    biases[i]: (1, fan_out_i).  Returns (output, coords) like the PyTorch module.
    """
    n, in_features = coords.shape
    num_layers = len(weights)
    out_features = weights[-1].shape[1]

    assert chunk_n % 128 == 0, "chunk_n must be a multiple of 128"
    assert tile_n % chunk_n == 0, "tile_n must be a multiple of chunk_n"

    # Tile sizing: big tiles amortize per-grid-step overhead, but keep >= 2
    # grid steps when the batch allows (v7x megacore sharding of "parallel").
    tile_n_eff = min(tile_n, _round_up(n, chunk_n))
    if n > chunk_n:
        tile_n_eff = min(tile_n_eff, _round_up((n + 1) // 2, chunk_n))
    n_pad = _round_up(n, tile_n_eff)

    # Batch-on-lanes: coords as (in_features, n_pad); zero-pad the ragged tail
    # (padded columns are computed then sliced off).
    x_t = coords.T
    if n_pad != n:
        x_t = jnp.pad(x_t, ((0, 0), (0, n_pad - n)))

    # Fold omega into sine-layer params: sin(omega*(xW + b)) == sin(x(omega*W)
    # + omega*b); a final linear layer (outermost_linear=True) is NOT scaled.
    # Pack all layers into three padded arrays (3 DMAs instead of 2L).
    dims = [(w.shape[0], w.shape[1]) for w in weights]
    fin_max = max(fi for fi, _ in dims)
    fout_max = max(fo for _, fo in dims)
    wt_packed = jnp.zeros((num_layers, fout_max, fin_max), jnp.float32)
    wcol_packed = jnp.zeros((num_layers, fin_max, fout_max), jnp.float32)
    b_packed = jnp.zeros((num_layers, fout_max, 1), jnp.float32)
    sine_flags = []
    for l, (w, b) in enumerate(zip(weights, biases)):
        fi, fo = dims[l]
        is_last = l == num_layers - 1
        is_sine = not (is_last and outermost_linear)
        omega = float(first_omega_0 if l == 0 else hidden_omega_0)
        scale = omega if is_sine else 1.0
        ws = (w * scale).astype(jnp.float32)                 # (fan_in, fan_out)
        bs = (b * scale).astype(jnp.float32).reshape(fo, 1)  # (fan_out, 1)
        wt_packed = wt_packed.at[l, :fo, :fi].set(ws.T)
        wcol_packed = wcol_packed.at[l, :fi, :fo].set(ws)
        b_packed = b_packed.at[l, :fo, :].set(bs)
        sine_flags.append(is_sine)

    kernel = functools.partial(
        _siren_kernel, layer_dims=tuple(dims), sine_flags=tuple(sine_flags),
        chunk_n=chunk_n, mxu_dtype=mxu_dtype)

    flops = 2 * sum(fi * fo for fi, fo in dims) * n_pad
    transcendentals = sum(fo for (_, fo), s in zip(dims, sine_flags) if s) * n_pad
    bytes_accessed = 4 * (in_features * n_pad + out_features * n_pad
                          + wt_packed.size + wcol_packed.size + b_packed.size)

    out_t = pl.pallas_call(
        kernel,
        out_shape=jax.ShapeDtypeStruct((out_features, n_pad), coords.dtype),
        grid_spec=pltpu.PrefetchScalarGridSpec(
            num_scalar_prefetch=0,
            grid=(n_pad // tile_n_eff,),
            in_specs=[
                pl.BlockSpec((in_features, tile_n_eff), lambda i: (0, i)),
                pl.BlockSpec(wt_packed.shape, lambda i: (0, 0, 0)),
                pl.BlockSpec(wcol_packed.shape, lambda i: (0, 0, 0)),
                pl.BlockSpec(b_packed.shape, lambda i: (0, 0, 0)),
            ],
            out_specs=pl.BlockSpec((out_features, tile_n_eff),
                                   lambda i: (0, i)),
        ),
        compiler_params=pltpu.CompilerParams(
            dimension_semantics=("parallel",)),
        cost_estimate=pl.CostEstimate(
            flops=flops, transcendentals=transcendentals,
            bytes_accessed=bytes_accessed),
    )(x_t, wt_packed, wcol_packed, b_packed)

    out = out_t[:, :n].T
    # TODO(synk): PyTorch's coords.clone().detach().requires_grad_(True) is
    # autograd bookkeeping with no Pallas equivalent; the returned value is
    # identical to the input coords.
    return out, coords


# ----------------------------------------------------------------------------
# Deterministic parameter init mirroring SIREN's init scheme.
# ----------------------------------------------------------------------------
def init_siren_params(key, in_features, hidden_features, hidden_layers,
                      out_features, *, outermost_linear=False,
                      first_omega_0=30.0, hidden_omega_0=30.0):
    dims = [in_features] + [hidden_features] * (hidden_layers + 1) + [out_features]
    weights, biases = [], []
    for layer in range(len(dims) - 1):
        fan_in, fan_out = dims[layer], dims[layer + 1]
        key, kw, kb = jax.random.split(key, 3)
        if layer == 0:
            bound = 1.0 / fan_in
        else:
            bound = np.sqrt(6.0 / fan_in) / hidden_omega_0
        w = jax.random.uniform(kw, (fan_in, fan_out), jnp.float32,
                               minval=-bound, maxval=bound)
        # torch.nn.Linear default bias init: U(-1/sqrt(fan_in), 1/sqrt(fan_in))
        b_bound = 1.0 / np.sqrt(fan_in)
        b = jax.random.uniform(kb, (1, fan_out), jnp.float32,
                               minval=-b_bound, maxval=b_bound)
        weights.append(w)
        biases.append(b)
    return weights, biases


def siren_reference(coords, weights, biases, *, first_omega_0, hidden_omega_0,
                    outermost_linear):
    h = coords
    num_layers = len(weights)
    for layer, (w, b) in enumerate(zip(weights, biases)):
        z = h @ w + b
        if layer == num_layers - 1 and outermost_linear:
            h = z
        else:
            omega = first_omega_0 if layer == 0 else hidden_omega_0
            h = jnp.sin(omega * z)
    return h


def _run_case(key, *, n, in_features, hidden_features, hidden_layers,
              out_features, outermost_linear, first_omega_0, hidden_omega_0,
              tile_n=8192, chunk_n=256, mxu_dtype=jnp.float32,
              rtol=1e-4, atol=1e-4):
    key, kc = jax.random.split(key)
    coords = jax.random.uniform(kc, (n, in_features), jnp.float32,
                                minval=-1.0, maxval=1.0)
    weights, biases = init_siren_params(
        key, in_features, hidden_features, hidden_layers, out_features,
        outermost_linear=outermost_linear,
        first_omega_0=first_omega_0, hidden_omega_0=hidden_omega_0)

    out, coords_out = siren_forward(
        coords, weights, biases,
        first_omega_0=first_omega_0, hidden_omega_0=hidden_omega_0,
        outermost_linear=outermost_linear, tile_n=tile_n, chunk_n=chunk_n,
        mxu_dtype=mxu_dtype)
    out = jax.block_until_ready(out)

    ref = siren_reference(
        coords, weights, biases,
        first_omega_0=first_omega_0, hidden_omega_0=hidden_omega_0,
        outermost_linear=outermost_linear)
    np.testing.assert_allclose(np.asarray(out), np.asarray(ref),
                               rtol=rtol, atol=atol)
    assert out.shape == (n, out_features)
    assert coords_out.shape == coords.shape


if __name__ == "__main__":
    key = jax.random.PRNGKey(0)
    k1, k2, k3 = jax.random.split(key, 3)

    # Case 1: SIREN-typical 2 -> 32 -> 32 -> 32 -> 1, sine output,
    # default (large) tile; split into 2 grid steps for megacore.
    _run_case(k1, n=4096, in_features=2, hidden_features=32, hidden_layers=2,
              out_features=1, outermost_linear=False,
              first_omega_0=30.0, hidden_omega_0=30.0)

    # Case 2: ragged batch (exercises zero-padding) + linear final layer +
    # smaller explicit tile.
    _run_case(k2, n=1000, in_features=2, hidden_features=32, hidden_layers=2,
              out_features=1, outermost_linear=True,
              first_omega_0=30.0, hidden_omega_0=30.0, tile_n=1024)

    # Case 3: bf16 MXU operands (f32 accumulation) for a wider net; validated
    # against the f32 reference at a relaxed tolerance (bf16 weight rounding
    # is amplified by the folded omega).
    _run_case(k3, n=512, in_features=2, hidden_features=64, hidden_layers=2,
              out_features=1, outermost_linear=False,
              first_omega_0=30.0, hidden_omega_0=30.0,
              mxu_dtype=jnp.bfloat16, rtol=0.0, atol=1e-1)

    print("KERNEL_OK")
</pallas_src>

<mosaic_0001>
module attributes {stable_mosaic.version = 11 : i64} {
  func.func @_siren_kernel(%arg0: i32, %arg1: memref<2x2048xf32, #tpu.memory_space<vmem>>, %arg2: memref<4x32x32xf32, #tpu.memory_space<vmem>>, %arg3: memref<4x32x32xf32, #tpu.memory_space<vmem>>, %arg4: memref<4x32x1xf32, #tpu.memory_space<vmem>>, %arg5: memref<1x2048xf32, #tpu.memory_space<vmem>>) attributes {dimension_semantics = [#tpu.dimension_semantics<parallel>], iteration_bounds = array<i64: 2>, scalar_prefetch = 0 : i64, scratch_operands = 0 : i64, tpu.core_type = #tpu.core_type<tc>, window_params = [{transform_indices = @transform_0, window_bounds = array<i64: 2, 2048>}, {pipeline_mode = #tpu.pipeline_mode<synchronous>, transform_indices = @transform_1, window_bounds = array<i64: 4, 32, 32>}, {pipeline_mode = #tpu.pipeline_mode<synchronous>, transform_indices = @transform_2, window_bounds = array<i64: 4, 32, 32>}, {pipeline_mode = #tpu.pipeline_mode<synchronous>, transform_indices = @transform_3, window_bounds = array<i64: 4, 32, 1>}, {transform_indices = @transform_4, window_bounds = array<i64: 1, 2048>}]} {
    %c0 = arith.constant 0 : index
    %c0_0 = arith.constant 0 : index
    %c0_1 = arith.constant 0 : index
    %0 = vector.load %arg4[%c0, %c0_0, %c0_1] : memref<4x32x1xf32, #tpu.memory_space<vmem>>, vector<1x32x1xf32>
    %1 = vector.shape_cast %0 : vector<1x32x1xf32> to vector<32x1xf32>
    %2 = vector.shape_cast %1 : vector<32x1xf32> to vector<32x1xf32>
    %3 = vector.broadcast %2 : vector<32x1xf32> to vector<32x256xf32>
    %c0_2 = arith.constant 0 : index
    %c0_3 = arith.constant 0 : index
    %c0_4 = arith.constant 0 : index
    %4 = vector.load %arg2[%c0_2, %c0_3, %c0_4] : memref<4x32x32xf32, #tpu.memory_space<vmem>>, vector<1x32x2xf32>
    %5 = vector.shape_cast %4 : vector<1x32x2xf32> to vector<32x2xf32>
    %6 = vector.extract_strided_slice %5 {offsets = [0, 0], sizes = [32, 1], strides = [1, 1]} : vector<32x2xf32> to vector<32x1xf32>
    %7 = vector.shape_cast %6 : vector<32x1xf32> to vector<32x1xf32>
    %8 = vector.broadcast %7 : vector<32x1xf32> to vector<32x256xf32>
    %9 = vector.extract_strided_slice %5 {offsets = [0, 1], sizes = [32, 1], strides = [1, 1]} : vector<32x2xf32> to vector<32x1xf32>
    %10 = vector.shape_cast %9 : vector<32x1xf32> to vector<32x1xf32>
    %11 = vector.broadcast %10 : vector<32x1xf32> to vector<32x256xf32>
    %c1 = arith.constant 1 : index
    %c0_5 = arith.constant 0 : index
    %c0_6 = arith.constant 0 : index
    %12 = vector.load %arg4[%c1, %c0_5, %c0_6] : memref<4x32x1xf32, #tpu.memory_space<vmem>>, vector<1x32x1xf32>
    %13 = vector.shape_cast %12 : vector<1x32x1xf32> to vector<32x1xf32>
    %14 = vector.shape_cast %13 : vector<32x1xf32> to vector<32x1xf32>
    %15 = vector.broadcast %14 : vector<32x1xf32> to vector<32x256xf32>
    %c1_7 = arith.constant 1 : index
    %c0_8 = arith.constant 0 : index
    %c0_9 = arith.constant 0 : index
    %16 = vector.load %arg2[%c1_7, %c0_8, %c0_9] : memref<4x32x32xf32, #tpu.memory_space<vmem>>, vector<1x32x32xf32>
    %17 = vector.shape_cast %16 : vector<1x32x32xf32> to vector<32x32xf32>
    %c2 = arith.constant 2 : index
    %c0_10 = arith.constant 0 : index
    %c0_11 = arith.constant 0 : index
    %18 = vector.load %arg4[%c2, %c0_10, %c0_11] : memref<4x32x1xf32, #tpu.memory_space<vmem>>, vector<1x32x1xf32>
    %19 = vector.shape_cast %18 : vector<1x32x1xf32> to vector<32x1xf32>
    %20 = vector.shape_cast %19 : vector<32x1xf32> to vector<32x1xf32>
    %21 = vector.broadcast %20 : vector<32x1xf32> to vector<32x256xf32>
    %c2_12 = arith.constant 2 : index
    %c0_13 = arith.constant 0 : index
    %c0_14 = arith.constant 0 : index
    %22 = vector.load %arg2[%c2_12, %c0_13, %c0_14] : memref<4x32x32xf32, #tpu.memory_space<vmem>>, vector<1x32x32xf32>
    %23 = vector.shape_cast %22 : vector<1x32x32xf32> to vector<32x32xf32>
    %c3 = arith.constant 3 : index
    %c0_15 = arith.constant 0 : index
    %c0_16 = arith.constant 0 : index
    %24 = vector.load %arg4[%c3, %c0_15, %c0_16] : memref<4x32x1xf32, #tpu.memory_space<vmem>>, vector<1x1x1xf32>
    %25 = vector.shape_cast %24 : vector<1x1x1xf32> to vector<1x1xf32>
    %26 = vector.shape_cast %25 : vector<1x1xf32> to vector<1x1xf32>
    %27 = vector.broadcast %26 : vector<1x1xf32> to vector<1x256xf32>
    %c3_17 = arith.constant 3 : index
    %c0_18 = arith.constant 0 : index
    %c0_19 = arith.constant 0 : index
    %28 = vector.load %arg3[%c3_17, %c0_18, %c0_19] : memref<4x32x32xf32, #tpu.memory_space<vmem>>, vector<1x32x1xf32>
    %29 = vector.shape_cast %28 : vector<1x32x1xf32> to vector<32x1xf32>
    %30 = vector.shape_cast %29 : vector<32x1xf32> to vector<32x1xf32>
    %31 = vector.broadcast %30 : vector<32x1xf32> to vector<32x256xf32>
    %c0_i32 = arith.constant 0 : i32
    %c8_i32 = arith.constant 8 : i32
    %32 = arith.addi %c0_i32, %c8_i32 : i32
    %c1_i32 = arith.constant 1 : i32
    scf.for %arg6 = %c0_i32 to %32 step %c1_i32  : i32 {
      %c1_i32_21 = arith.constant 1 : i32
      %33 = arith.muli %arg6, %c1_i32_21 : i32
      %c0_i32_22 = arith.constant 0 : i32
      %34 = arith.addi %c0_i32_22, %33 : i32
      %c256_i32 = arith.constant 256 : i32
      %35 = arith.muli %34, %c256_i32 : i32
      %36 = tpu.assume_multiple %35, 256 : i32
      %c0_23 = arith.constant 0 : index
      %37 = arith.index_cast %36 : i32 to index
      %38 = vector.load %arg1[%c0_23, %37] : memref<2x2048xf32, #tpu.memory_space<vmem>>, vector<2x256xf32>
      %39 = vector.extract_strided_slice %38 {offsets = [0, 0], sizes = [1, 256], strides = [1, 1]} : vector<2x256xf32> to vector<1x256xf32>
      %40 = vector.broadcast %39 : vector<1x256xf32> to vector<32x256xf32>
      %41 = arith.mulf %8, %40 : vector<32x256xf32>
      %42 = arith.addf %3, %41 : vector<32x256xf32>
      %43 = vector.extract_strided_slice %38 {offsets = [1, 0], sizes = [1, 256], strides = [1, 1]} : vector<2x256xf32> to vector<1x256xf32>
      %44 = vector.broadcast %43 : vector<1x256xf32> to vector<32x256xf32>
      %45 = arith.mulf %11, %44 : vector<32x256xf32>
      %46 = arith.addf %42, %45 : vector<32x256xf32>
      %47 = math.sin %46 : vector<32x256xf32>
      %cst = arith.constant dense<0.000000e+00> : vector<32x256xf32>
      %48 = tpu.matmul %17, %47, %cst {dimension_numbers = #tpu.dot_dimension_numbers<[1], [0], [0], [1], [0, 0, 1, 1], [], []>} : vector<32x32xf32>, vector<32x256xf32>, vector<32x256xf32> -> vector<32x256xf32>
      %49 = arith.addf %48, %15 : vector<32x256xf32>
      %50 = math.sin %49 : vector<32x256xf32>
      %cst_24 = arith.constant dense<0.000000e+00> : vector<32x256xf32>
      %51 = tpu.matmul %23, %50, %cst_24 {dimension_numbers = #tpu.dot_dimension_numbers<[1], [0], [0], [1], [0, 0, 1, 1], [], []>} : vector<32x32xf32>, vector<32x256xf32>, vector<32x256xf32> -> vector<32x256xf32>
      %52 = arith.addf %51, %21 : vector<32x256xf32>
      %53 = math.sin %52 : vector<32x256xf32>
      %54 = arith.mulf %31, %53 : vector<32x256xf32>
      %cst_25 = arith.constant dense<0.000000e+00> : vector<256xf32>
      %55 = vector.multi_reduction <add>, %54, %cst_25 [0] : vector<32x256xf32> to vector<256xf32>
      %56 = vector.shape_cast %55 : vector<256xf32> to vector<1x256xf32>
      %57 = arith.addf %56, %27 : vector<1x256xf32>
      %58 = math.sin %57 : vector<1x256xf32>
      %c0_26 = arith.constant 0 : index
      %59 = arith.index_cast %36 : i32 to index
      %60 = vector.load %arg5[%c0_26, %59] : memref<1x2048xf32, #tpu.memory_space<vmem>>, vector<1x256xf32>
      tpu.vector_store %arg5[%c0_26, %59], %58 {strides = array<i32>} : memref<1x2048xf32, #tpu.memory_space<vmem>>, vector<1x256xf32>,
    }
    %c8_i32_20 = arith.constant 8 : i32
    return
  }
  func.func @transform_0(%arg0: i32) -> (i32, i32) {
    %c0_i32 = arith.constant 0 : i32
    %c0_i32_0 = arith.constant 0 : i32
    return %c0_i32, %arg0 : i32, i32
  }
  func.func @transform_1(%arg0: i32) -> (i32, i32, i32) {
    %c0_i32 = arith.constant 0 : i32
    %c0_i32_0 = arith.constant 0 : i32
    %c0_i32_1 = arith.constant 0 : i32
    %c0_i32_2 = arith.constant 0 : i32
    return %c0_i32, %c0_i32_0, %c0_i32_1 : i32, i32, i32
  }
  func.func @transform_2(%arg0: i32) -> (i32, i32, i32) {
    %c0_i32 = arith.constant 0 : i32
    %c0_i32_0 = arith.constant 0 : i32
    %c0_i32_1 = arith.constant 0 : i32
    %c0_i32_2 = arith.constant 0 : i32
    return %c0_i32, %c0_i32_0, %c0_i32_1 : i32, i32, i32
  }
  func.func @transform_3(%arg0: i32) -> (i32, i32, i32) {
    %c0_i32 = arith.constant 0 : i32
    %c0_i32_0 = arith.constant 0 : i32
    %c0_i32_1 = arith.constant 0 : i32
    %c0_i32_2 = arith.constant 0 : i32
    return %c0_i32, %c0_i32_0, %c0_i32_1 : i32, i32, i32
  }
  func.func @transform_4(%arg0: i32) -> (i32, i32) {
    %c0_i32 = arith.constant 0 : i32
    %c0_i32_0 = arith.constant 0 : i32
    return %c0_i32, %arg0 : i32, i32
  }
}

</mosaic_0001>

<bundles_post_ra>
// kernel: tpu_custom_call.1
= control target key start
LH: loop header
LB: loop body
LE: loop exit
PB: predicated region body
PF: predicated region fallthrough
CT: control target
= control target key end

     0   :  { %9 = vsyncpa [#allocation3], 0  ;;  %s6638_s0 = inlined_call_operand.hbm [shape: f32[2,4096], index: 0, kind: input, shape index: {}]   ;;  %s6639_s1 = inlined_call_operand.vmem [shape: f32[4,32,32], index: 1, kind: input, shape index: {}]   ;;  %s6640_s2 = inlined_call_operand.hbm [shape: f32[4,32,32], index: 2, kind: input, shape index: {}]   ;;  %s6641_s3 = inlined_call_operand.vmem [shape: f32[4,32,1], index: 3, kind: input, shape index: {}]   ;;  %s6642_s4 = inlined_call_operand.hbm [shape: f32[1,4096], index: 4, kind: output, shape index: {}]  }
   0x1   :  { %11 = vsyncpa [#allocation3 + $0x1], 0 }
   0x2   :  { %12 = vsyncpa [#allocation6], 0 }
   0x3   :  { %13 = vsyncpa [#allocation4], 0 }
   0x4   :  { %15 = vsyncpa [#allocation4 + $0x1], 0  ;;  %s4163_s15 = smov 0   ;;  %s4165_s16 = smov 0  }
   0x5   :  { %s4167_s17 = smov 0   ;;  %s4169_s18 = smov 0  }
   0x6 LB: > { %s4184_s19 = sadd.s32 4294967295, %s4117_s18   ;;  %s3530_s20 = sadd.s32 4294967294, %s4117_s18   ;;  %s4117_s18 = sphi %s4169_s18, %s6869_s18   ;;  %s4113_s17 = sphi %s4167_s17, %s6868_s17   ;;  %s4109_s16 = sphi %s4165_s16, %s6867_s16   ;;  %s4105_s15 = sphi %s4163_s15, %s6866_s15  }
   0x7   : > { %p41_p0 = scmp.ne.s32.totalorder %s4109_s16, %s4105_s15  ;;  %p6643_p1 = scmp.eq.s32.totalorder %s4184_s19, 0 }
   0x8   : > { %p134_p3 = scmp.eq.s32.totalorder %s3530_s20, 1  ;;  %p3531_p5 = scmp.ge.s32.totalorder %s4117_s18, 1 }
   0x9   : > { %p4193_p4 = por %p6643_p1, %p41_p0  ;;  %p141_p7 = scmp.lt.s32.totalorder %s4117_s18, 3 }
   0xa   : > { %p4198_p6 = por %p134_p3, %p41_p0  ;;  %s4123_s24 = smov [#allocation5]  }
   0xb   : > { %s6709_s21 = scalar_select %p4193_p4, 1, 0 }
   0xc   : > { %s6710_s22 = scalar_select %p4198_p6, 1, 0 }
   0xd   : > { %p4203_p8 = pnand %p3531_p5, %p141_p7  ;;  %s156_s25 = sshll.u32 %s4123_s24, 4  ;;  %s4207_s25 = int_to_ptr.vmem [resolvable:$true] %s156_s25 }
   0xe   : > { %s4219_s27 = sadd.s32 1, %s4117_s18   ;;  %s28_s28 = sadd.s32 1, %s4113_s17 }
   0xf   : > { %s6711_s23 = scalar_select %p4203_p8, 1, 0 }
  0x10   : > { %p3807_p9 = pneg %p4203_p8  ;;  %s25_s29 = ssub.s32 %s4117_s18, %s4219_s27 }
  0x11   : > { %s3985_s6 = scalar_lea.hbm %s6640_s2, 2048 }
  0x12   : > { %p4214_p11 = pnand %p3807_p9, %p6643_p1  ;;  %p3986_p12 = scmp.ne.s32.totalorder %s6640_s2, %s3985_s6 }
  0x13   : > { %p3992_p5 = scmp.lt.u32.totalorder %s3985_s6, %s6640_s2 }
  0x14   : > { %p3987_p13 = pneg %p4214_p11 }
  0x16   : > { %p3988_p0 = pnand %p3987_p13, %p3986_p12 }
  0x18   : > { %p3989_p3 = pneg %p3988_p0 }
  0x1a   : > { %p3994_p7 = pnand %p3992_p5, %p3989_p3 }
  0x1c   : > { %3997 = shalt.err (!%p3994_p7)
}
  0x1d   : > { %s3998_s11 = scalar_lea.vmem %s4207_s25, 2048  ;;  %p4006_p2 = scmp.lt.s32.totalorder %s4207_s25, %s4207_s25 }
  0x1e   : > { %p3999_p9 = scmp.ne.s32.totalorder %s4207_s25, %s3998_s11  ;;  %p4007_p6 = scmp.lt.s32.totalorder %s3998_s11, %s3998_s11 }
  0x20   : > { %p4001_p10 = pnand %p3999_p9, %p3987_p13  ;;  %p4008_p4 = por %p4007_p6, %p4006_p2 }
  0x22   : > { %p4002_p1 = pneg %p4001_p10 }
  0x24   : > { %p4009_p8 = pnand %p4008_p4, %p4002_p1 }
  0x26   : > { %4012 = shalt.err (!%p4009_p8)
}
  0x27   : > { %s4124_s12 = smov 128   ;;  %s4125_s13 = smov 8  }
  0x28   : > { %3810 = dma.hbm_to_vmem [thread:$0]  (!%p4214_p11), %s6640_s2, 2048, %s4207_s25, [#allocation6], %s4124_s12, %s4124_s12, %s4125_s13  }
  0x29   : > { %p26_p2 = scmp.eq.s32.totalorder %s25_s29, 0  ;;  %p35_p1 = scmp.ne.s32.totalorder %s4113_s17, %s4109_s16 }
  0x2a   : > { %p36_p4 = scmp.eq.s32.totalorder %s4117_s18, 0  ;;  %p3820_p6 = scmp.lt.s32.totalorder %s4117_s18, 2 }
  0x2b   : > { %s4250_s24 = scalar_select %p26_p2, %s4113_s17, %s28_s28  }
  0x2c   : > { %p37_p8 = por %p36_p4, %p35_p1  ;;  %p6713_p10 = scmp.eq.s32.totalorder %s4184_s19, 1 }
  0x2d   : > { %s173_s5 = sand.u32 1, %s4113_s17   ;;  %s3677_s6 = sshll.u32 %s4117_s18, 9 }
  0x2e   : > { %p4254_p12 = por %p6713_p10, %p35_p1  ;;  %s3534_s7 = sshll.u32 %s173_s5, 5 }
  0x2f   : > { %s4263_s9 = scalar_lea.hbm %s6638_s0, %s3677_s6  ;;  %s177_s25 = scalar_lea.vmem [#allocation2], %s3534_s7 }
  0x30   : > { %s185_s28 = sshll.u32 %s177_s25, 4  ;;  %p4265_p11 = pnand %p3820_p6, %p37_p8  ;;  %s4269_s28 = int_to_ptr.vmem [resolvable:$true] %s185_s28 }
  0x31   : > { %s174_s10 = scalar_lea.sflag [#allocation3], %s173_s5  ;;  %s4013_s11 = scalar_lea.hbm %s4263_s9, 512 }
  0x32   : > { %p4014_p13 = scmp.ne.s32.totalorder %s4263_s9, %s4013_s11  ;;  %p4015_p0 = pneg %p4265_p11 }
  0x33   : > { %s4018_s14 = scalar_lea.hbm %s6638_s0, 1024  ;;  %p4019_p7 = scmp.lt.u32.totalorder %s4263_s9, %s6638_s0 }
  0x34   : > { %p4016_p3 = pnand %p4015_p0, %p4014_p13  ;;  %p4020_p9 = scmp.lt.u32.totalorder %s4018_s14, %s4013_s11 }
  0x35   : > { %p4022_p1 = scmp.lt.u32.totalorder %s4013_s11, %s4263_s9 }
  0x36   : > { %p4017_p5 = pneg %p4016_p3  ;;  %p4021_p2 = por %p4020_p9, %p4019_p7 }
  0x38   : > { %p4023_p4 = por %p4022_p1, %p4021_p2 }
  0x3a   : > { %p4024_p6 = pnand %p4023_p4, %p4017_p5 }
  0x3c   : > { %4027 = shalt.err (!%p4024_p6)
}
  0x3d   : > { %s4028_s5 = scalar_lea.vmem %s4269_s28, 512  ;;  %s4126_s7 = smov [#allocation2]  }
  0x3e   : > { %p4029_p8 = scmp.ne.s32.totalorder %s4269_s28, %s4028_s5  ;;  %s4033_s26 = sshll.u32 %s4126_s7, 4  ;;  %s4034_s26 = int_to_ptr.vmem [resolvable:$false] %s4033_s26 }
  0x3f   : > { %s4035_s8 = scalar_lea.vmem %s4034_s26, 1024  ;;  %p4036_p3 = scmp.lt.s32.totalorder %s4269_s28, %s4034_s26 }
  0x40   : > { %p4031_p10 = pnand %p4029_p8, %p4015_p0  ;;  %p4037_p7 = scmp.lt.s32.totalorder %s4035_s8, %s4028_s5 }
  0x42   : > { %p4032_p13 = pneg %p4031_p10  ;;  %p4038_p9 = por %p4037_p7, %p4036_p3 }
  0x44   : > { %p4039_p2 = pnand %p4038_p9, %p4032_p13 }
  0x46   : > { %4042 = shalt.err (!%p4039_p2)
}
  0x47   : > { %3814 = dma.hbm_to_vmem [thread:$0]  (!%p4265_p11), %s4263_s9, 512, %s4269_s28, %s174_s10  }
  0x48   : > { %p6716_p5 = scmp.ne.s32.totalorder %s6711_s23, 0 }
  0x4a   : > { %194 = sbr.rel (%p6716_p5) target bundleno = 1519 (0x5ef), region = 36 }
  0x51   : > { %s4299_s25 = sand.u32 1, %s4109_s16   ;;  %p6717_p0 = scmp.ne.s32.totalorder %s6709_s21, 0 }
  0x52   : > { %s3538_s11 = sshll.u32 %s4299_s25, 5  ;;  %s197_s12 = scalar_lea.sflag [#allocation3], %s4299_s25 }
  0x53   : > { %s4303_s13 = scalar_lea.vmem [#allocation2], %s3538_s11 }
  0x54   : > { %4092 = dma.done.wait (%p6717_p0), %s197_s12, 512  }
  0x55   : > { %4094 = vsyncadd (%p6717_p0), %s197_s12, 4294966784  ;;  %p6718_p11 = scmp.eq.s32.totalorder %s4184_s19, 0 }
  0x57   : > { %4096 = dma.done.wait (%p6718_p11), [#allocation6], 2048   ;;  %p6719_p1 = pmov %p6718_p11 }
  0x58   : > { %v4127_v0 = vmov 1   ;;  %v4128_v1 = vmov 0   ;;  %v4316_v2 = vld [vmem:[%s6639_s1 + $0x20] sm:$0xff]  ;;  %v4321_v3 = vld [vmem:[%s6639_s1 + $0x28] sm:$0xff]  ;;  %v4326_v4 = vld [vmem:[%s6639_s1 + $0x30] sm:$0xff]  ;;  %s3540_s10 = sshll.u32 %s4299_s25, 4 }
  0x59   : > { %4098 = vsyncadd (%p6719_p1), [#allocation6], 4294965248  ;;  %3877 = vset.pattern.permute.xlu0 %v4127_v0  ;;  %3876 = vset.pattern.permute.xlu1 %v4128_v1  ;;  %6720 = vst [vmem:[#allocation11_spill] sm:$0xff] %v4316_v2  ;;  %v4331_v5 = vld [vmem:[%s6639_s1 + $0x38] sm:$0xff]  ;;  %v4336_v6 = vld [vmem:[%s6639_s1 + $0x40] sm:$0xff]  ;;  %s4455_s14 = scalar_lea.vmem [#allocation7], %s3540_s10 }
  0x5a   : > { %6721 = vst [vmem:[#allocation12_spill] sm:$0xff] %v4321_v3  ;;  %6722 = vst [vmem:[#allocation13_spill] sm:$0xff] %v4326_v4  ;;  %v4341_v7 = vld [vmem:[%s6639_s1 + $0x48] sm:$0xff]  ;;  %v4346_v8 = vld [vmem:[%s6639_s1 + $0x50] sm:$0xff]  ;;  %s4457_s20 = smov 0  }
  0x5b   : > { %6723 = vst [vmem:[#allocation14_spill] sm:$0xff] %v4331_v5  ;;  %6724 = vst [vmem:[#allocation15_spill] sm:$0xff] %v4336_v6  ;;  %v4351_v9 = vld [vmem:[%s6639_s1 + $0x58] sm:$0xff]  ;;  %v255_v10 = vld [vmem:[%s6639_s1] sm:$0xff] }
  0x5c   : > { %6725 = vst [vmem:[#allocation16_spill] sm:$0xff] %v4341_v7  ;;  %6726 = vst [vmem:[#allocation17_spill] sm:$0xff] %v4346_v8  ;;  %280 = vperm.xlu0 %3877, %v255_v10   ;;  %v233_v11 = vld [vmem:[%s6641_s3 + $0x10] sm:$0xff]  ;;  %v258_v12 = vld [vmem:[%s6639_s1 + $0x18] sm:$0xff] }
  0x5d   : > { %6727 = vst [vmem:[#allocation18_spill] sm:$0xff] %v4351_v9  ;;  %247 = vperm.xlu1 %3876, %v233_v11   ;;  %v234_v13 = vld [vmem:[%s6641_s3 + $0x18] sm:$0xff]  ;;  %v256_v14 = vld [vmem:[%s6639_s1 + $0x8] sm:$0xff]  ;;  %v231_v15 = vld [vmem:[%s6641_s3] sm:$0xff] }
  0x5e   : > { %v232_v16 = vld [vmem:[%s6641_s3 + $0x8] sm:$0xff]  ;;  %v257_v17 = vld [vmem:[%s6639_s1 + $0x10] sm:$0xff]  ;;  %v3541_v19 = vld [vmem:[%s6641_s3 + $0x20] sm:$0xff] }
  0x5f   : > { %v3542_v18 = vld [vmem:[%s6641_s3 + $0x28] sm:$0xff]  ;;  %v3549_v20 = vld [vmem:[%s6641_s3 + $0x40] sm:$0xff]  ;;  %v3543_v21 = vld [vmem:[%s6641_s3 + $0x30] sm:$0xff] }
  0x60   : > { %292 = vperm.xlu0 %3877, %v258_v12   ;;  %v3551_v22 = vld [vmem:[%s6641_s3 + $0x50] sm:$0xff]  ;;  %v3544_v23 = vld [vmem:[%s6641_s3 + $0x38] sm:$0xff]  ;;  %v3557_v24 = vld [vmem:[%s6641_s3 + $0x60] sm:$0x1] }
  0x61   : > { %252 = vperm.xlu1 %3876, %v234_v13   ;;  %v3550_v25 = vld [vmem:[%s6641_s3 + $0x48] sm:$0xff]  ;;  %v3552_v27 = vld [vmem:[%s6641_s3 + $0x58] sm:$0xff]  ;;  %v363_v29 = vld [vmem:[#allocation5 + $0x60] sm:$0xff] }
  0x62   : > { %v364_v26 = vld [vmem:[#allocation5 + $0x68] sm:$0xff]  ;;  %v366_v28 = vld [vmem:[#allocation5 + $0x78] sm:$0xff]  ;;  %v365_v30 = vld [vmem:[#allocation5 + $0x70] sm:$0xff] }
  0x64   : > { %3879 = vset.pattern.permute.xlu0 %v4128_v1 }
  0x65   : > { %266 = vperm.xlu1 %3876, %v256_v14   ;;  %237 = vperm.xlu0 %3879, %v231_v15  }
  0x69   : > { %276 = vperm.xlu1 %3876, %v258_v12   ;;  %242 = vperm.xlu0 %3879, %v232_v16  }
  0x6d   : > { %3878 = vset.pattern.permute.xlu1 %v4127_v0  ;;  %261 = vperm.xlu0 %3879, %v255_v10  }
  0x6e   : > { %284 = vperm.xlu1 %3878, %v256_v14  }
  0x71   : > { %271 = vperm.xlu0 %3879, %v257_v17  }
  0x72   : > { %288 = vperm.xlu1 %3878, %v257_v17  }
  0x75   : > { %307 = vperm.xlu0 %3879, %v3542_v18  }
  0x76   : > { %3880 = vset.pattern.permute.xlu1 %v4128_v1 }
  0x77   : > { %302 = vperm.xlu1 %3880, %v3541_v19  }
  0x79   : > { %332 = vperm.xlu0 %3879, %v3549_v20  }
  0x7b   : > { %312 = vperm.xlu1 %3880, %v3543_v21  }
  0x7d   : > { %342 = vperm.xlu0 %3879, %v3551_v22  }
  0x7f   : > { %317 = vperm.xlu1 %3880, %v3544_v23  }
  0x81   : > { %359 = vperm.xlu0 %3879, %v3557_v24  }
  0x83   : > { %337 = vperm.xlu1 %3880, %v3550_v25  }
  0x85   : > { %374 = vperm.xlu0 %3879, %v364_v26  }
  0x87   : > { %347 = vperm.xlu1 %3880, %v3552_v27  }
  0x89   : > { %384 = vperm.xlu0 %3879, %v366_v28  }
  0x8b   : > { %369 = vperm.xlu1 %3880, %v363_v29  }
  0x8f   : > { %379 = vperm.xlu1 %3880, %v365_v30  }
  0xdb   : > { %v4405_v31 = vpop.permute.xlu0 %280 }
  0xdc   : > { %6728 = vst [vmem:[#allocation19_spill] sm:$0xff] %v4405_v31  ;;  %v4407_v32 = vpop.permute.xlu1 %247 }
  0xdd   : > { %6729 = vst [vmem:[#allocation20_spill] sm:$0xff] %v4407_v32 }
  0xdf   : > { %v4409_v33 = vpop.permute.xlu0 %292 }
  0xe0   : > { %6730 = vst [vmem:[#allocation21_spill] sm:$0xff] %v4409_v33  ;;  %v4411_v34 = vpop.permute.xlu1 %252 }
  0xe1   : > { %6731 = vst [vmem:[#allocation22_spill] sm:$0xff] %v4411_v34 }
  0xe4   : > { %v4413_v35 = vpop.permute.xlu1 %266  ;;  %v4415_v36 = vpop.permute.xlu0 %237 }
  0xe5   : > { %6732 = vst [vmem:[#allocation23_spill] sm:$0xff] %v4413_v35  ;;  %6733 = vst [vmem:[#allocation24_spill] sm:$0xff] %v4415_v36 }
  0xe8   : > { %v4417_v37 = vpop.permute.xlu1 %276  ;;  %v4419_v38 = vpop.permute.xlu0 %242 }
  0xe9   : > { %6734 = vst [vmem:[#allocation25_spill] sm:$0xff] %v4417_v37  ;;  %6735 = vst [vmem:[#allocation26_spill] sm:$0xff] %v4419_v38 }
  0xec   : > { %v4421_v39 = vpop.permute.xlu0 %261 }
  0xed   : > { %6736 = vst [vmem:[#allocation27_spill] sm:$0xff] %v4421_v39  ;;  %v4423_v40 = vpop.permute.xlu1 %284 }
  0xee   : > { %6737 = vst [vmem:[#allocation28_spill] sm:$0xff] %v4423_v40 }
  0xf0   : > { %v4425_v41 = vpop.permute.xlu0 %271 }
  0xf1   : > { %6738 = vst [vmem:[#allocation29_spill] sm:$0xff] %v4425_v41  ;;  %v4427_v42 = vpop.permute.xlu1 %288 }
  0xf2   : > { %6739 = vst [vmem:[#allocation30_spill] sm:$0xff] %v4427_v42 }
  0xf4   : > { %v4429_v43 = vpop.permute.xlu0 %307 }
  0xf5   : > { %6740 = vst [vmem:[#allocation31_spill] sm:$0xff] %v4429_v43 }
  0xf6   : > { %v4431_v44 = vpop.permute.xlu1 %302 }
  0xf7   : > { %6741 = vst [vmem:[#allocation32_spill] sm:$0xff] %v4431_v44 }
  0xf8   : > { %v4433_v45 = vpop.permute.xlu0 %332 }
  0xf9   : > { %6742 = vst [vmem:[#allocation33_spill] sm:$0xff] %v4433_v45 }
  0xfa   : > { %v4435_v46 = vpop.permute.xlu1 %312 }
  0xfb   : > { %6743 = vst [vmem:[#allocation34_spill] sm:$0xff] %v4435_v46 }
  0xfc   : > { %v4437_v47 = vpop.permute.xlu0 %342 }
  0xfd   : > { %6744 = vst [vmem:[#allocation35_spill] sm:$0xff] %v4437_v47 }
  0xfe   : > { %v4439_v48 = vpop.permute.xlu1 %317 }
  0xff   : > { %6745 = vst [vmem:[#allocation36_spill] sm:$0xff] %v4439_v48 }
 0x100   : > { %v4441_v49 = vpop.permute.xlu0 %359 }
 0x101   : > { %6746 = vst [vmem:[#allocation37_spill] sm:$0xff] %v4441_v49 }
 0x102   : > { %v4443_v50 = vpop.permute.xlu1 %337 }
 0x103   : > { %6747 = vst [vmem:[#allocation38_spill] sm:$0xff] %v4443_v50 }
 0x104   : > { %v4445_v51 = vpop.permute.xlu0 %374 }
 0x105   : > { %6748 = vst [vmem:[#allocation39_spill] sm:$0xff] %v4445_v51 }
 0x106   : > { %v4447_v52 = vpop.permute.xlu1 %347 }
 0x107   : > { %6749 = vst [vmem:[#allocation40_spill] sm:$0xff] %v4447_v52 }
 0x108   : > { %v4449_v53 = vpop.permute.xlu0 %384 }
 0x109   : > { %6750 = vst [vmem:[#allocation41_spill] sm:$0xff] %v4449_v53 }
 0x10a   : > { %v4451_v54 = vpop.permute.xlu1 %369 }
 0x10b   : > { %6751 = vst [vmem:[#allocation42_spill] sm:$0xff] %v4451_v54 }
 0x10e   : > { %v4453_v55 = vpop.permute.xlu1 %379 }
 0x10f   : > { %6752 = vst [vmem:[#allocation43_spill] sm:$0xff] %v4453_v55 }
 0x110 LB: >> { %v6753_v46 = vld [vmem:[#allocation34_spill] sm:$0xff]  ;;  %v6754_v44 = vld [vmem:[#allocation32_spill] sm:$0xff]  ;;  %v6755_v43 = vld [vmem:[#allocation31_spill] sm:$0xff]  ;;  %v6646_v56 = vlaneseq  ;;  %s3558_s6 = sshll.u32 %s4121_s20, 8  ;;  %s392_s20 = sadd.s32 1, %s4121_s20   ;;  %s4121_s20 = sphi %s4457_s20, %s392_s20  }
 0x111   : >> { %v6756_v42 = vld [vmem:[#allocation30_spill] sm:$0xff]  ;;  %v6757_v41 = vld [vmem:[#allocation29_spill] sm:$0xff]  ;;  %v6758_v40 = vld [vmem:[#allocation28_spill] sm:$0xff]  ;;  %s4466_s5 = sshra.s32 %s3558_s6, 7  ;;  %p389_p4 = scmp.ge.s32.totalorder %s392_s20, 8  }
 0x112   : >> { %v6759_v39 = vld [vmem:[#allocation27_spill] sm:$0xff]  ;;  %v6760_v38 = vld [vmem:[#allocation26_spill] sm:$0xff]  ;;  %v6761_v37 = vld [vmem:[#allocation25_spill] sm:$0xff]  ;;  %v4464_v57 = vshrl.u32 %v6646_v56, 7  ;;  %s3559_s7 = sshll.u32 %s4466_s5, 1  ;;  %s3421_s8 = scalar_lea.vmem %s4455_s14, %s4466_s5 [#allocation7] }
 0x113   : >> { %v6762_v36 = vld [vmem:[#allocation24_spill] sm:$0xff]  ;;  %v6763_v35 = vld [vmem:[#allocation23_spill] sm:$0xff]  ;;  %v6764_v34 = vld [vmem:[#allocation22_spill] sm:$0xff]  ;;  %s397_s26 = scalar_lea.vmem %s4303_s13, %s3559_s7 [#allocation2]  ;;  %s3678_s11 = sshll.u32 (%p389_p4), %s4184_s19, 8 }
 0x114   : >> { %v6765_v33 = vld [vmem:[#allocation21_spill] sm:$0xff]  ;;  %v6766_v32 = vld [vmem:[#allocation20_spill] sm:$0xff]  ;;  %v6767_v31 = vld [vmem:[#allocation19_spill] sm:$0xff]  ;;  %6768 = vst [vmem:[#allocation44_spill] sm:$0xff] %v4464_v57  ;;  %v402_v58 = vsub.s32 0, %v4464_v57  ;;  %v406_v59 = vsub.s32 2, %v4464_v57  ;;  %s6599_s9 = scalar_lea.hbm (%p389_p4), %s6642_s4, %s3678_s11 }
 0x115   : >> { %v436_v60 = vsub.s32 1, %v4464_v57  ;;  %v440_v61 = vsub.s32 3, %v4464_v57  ;;  %v398_v62 = vld [vmem:[%s397_s26] sm:$0xf]  ;;  %v6799_v3 = vld [vmem:[#allocation12_spill] sm:$0xff]  ;;  %v6800_v4 = vld [vmem:[#allocation13_spill] sm:$0xff] }
 0x116   : >> { %v403_v63 = vrot.slane %v398_v62, %v402_v58  ;;  %v407_v0 = vrot.slane %v398_v62, %v406_v59  ;;  %v6798_v2 = vld [vmem:[#allocation11_spill] sm:$0xff]  ;;  %v6801_v5 = vld [vmem:[#allocation14_spill] sm:$0xff]  ;;  %s3442_s28 = sshll.u32 (%p389_p4), %s4455_s14, 4  ;;  %s3428_s29 = scalar_lea.sflag (%p389_p4), [#allocation4], %s4299_s25  ;;  %s3443_s28 = int_to_ptr.vmem [resolvable:$true] %s3442_s28 }
 0x117   : >> { %v437_v1 = vrot.slane %v398_v62, %v436_v60  ;;  %v441_v10 = vrot.slane %v398_v62, %v440_v61  ;;  %s4043_s21 = scalar_lea.vmem (%p389_p4), %s3443_s28, 256  ;;  %s4137_s10 = smov (%p389_p4), [#allocation7]  }
 0x118   : >> { %v413_v11 = vrot.slane %v403_v63, %v402_v58  ;;  %v417_v12 = vrot.slane %v407_v0, %v402_v58  ;;  %p4044_p6 = scmp.ne.s32.totalorder (%p389_p4), %s3443_s28, %s4043_s21  ;;  %s4047_s20 = sshll.u32 (%p389_p4), %s4137_s10, 4  ;;  %s4048_s20 = int_to_ptr.vmem [resolvable:$false] %s4047_s20 }
 0x119   : >> { %v447_v13 = vrot.slane %v437_v1, %v436_v60  ;;  %v451_v17 = vrot.slane %v441_v10, %v436_v60  ;;  %s4049_s13 = scalar_lea.vmem (%p389_p4), %s4048_s20, 512  ;;  %p4050_p13 = scmp.lt.s32.totalorder (%p389_p4), %s3443_s28, %s4048_s20 }
 0x11a   : >> { %v418_v14 = vmul.f32 %v413_v11, %v6759_v39  ;;  %v419_v15 = vmul.f32 %v417_v12, %v6759_v39  ;;  %v420_v16 = vmul.f32 %v413_v11, %v6763_v35  ;;  %v422_v18 = vmul.f32 %v413_v11, %v6757_v41  ;;  %p4045_p8 = pnand (%p389_p4), %p4044_p6, %p4254_p12  ;;  %p4051_p3 = scmp.lt.s32.totalorder (%p389_p4), %s4049_s13, %s4043_s21 }
 0x11b   : >> { %v423_v19 = vmul.f32 %v417_v12, %v6757_v41  ;;  %v424_v20 = vmul.f32 %v413_v11, %v6761_v37  ;;  %v425_v21 = vmul.f32 %v417_v12, %v6761_v37  ;;  %v452_v29 = vmul.f32 %v447_v13, %v6767_v31 }
 0x11c   : >> { %v426_v22 = vadd.f32 %v418_v14, %v6762_v36  ;;  %v427_v23 = vadd.f32 %v419_v15, %v6762_v36  ;;  %v428_v24 = vadd.f32 %v420_v16, %v6760_v38  ;;  %v430_v25 = vadd.f32 %v422_v18, %v6766_v32  ;;  %p4046_p10 = pneg (%p389_p4), %p4045_p8  ;;  %p4052_p7 = por (%p389_p4), %p4051_p3, %p4050_p13 }
 0x11d   : >> { %v431_v26 = vadd.f32 %v423_v19, %v6766_v32  ;;  %v432_v27 = vadd.f32 %v424_v20, %v6764_v34  ;;  %v433_v28 = vadd.f32 %v425_v21, %v6764_v34  ;;  %v453_v30 = vmul.f32 %v451_v17, %v6767_v31 }
 0x11e   : >> { %v454_v58 = vmul.f32 %v447_v13, %v6758_v40  ;;  %v456_v59 = vmul.f32 %v447_v13, %v6756_v42  ;;  %v457_v60 = vmul.f32 %v451_v17, %v6756_v42  ;;  %v458_v61 = vmul.f32 %v447_v13, %v6765_v33  ;;  %p4053_p9 = pnand (%p389_p4), %p4052_p7, %p4046_p10 }
 0x11f   : >> { %v459_v62 = vmul.f32 %v451_v17, %v6765_v33  ;;  %v4495_v63 = vadd.f32 %v452_v29, %v426_v22  ;;  %v4497_v0 = vadd.f32 %v453_v30, %v427_v23  ;;  %v6668_v34 = vmov 1326507024  }
 0x120   : >> { %v4499_v1 = vadd.f32 %v454_v58, %v428_v24  ;;  %v4501_v10 = vadd.f32 %v456_v59, %v430_v25  ;;  %v4503_v11 = vadd.f32 %v457_v60, %v431_v26  ;;  %v4505_v14 = vadd.f32 %v458_v61, %v432_v27 }
 0x121   : >> { %v4507_v15 = vadd.f32 %v459_v62, %v433_v28  ;;  %v6648_v16 = vand.u32 2147483647, %v4495_v63  ;;  %v471_v13 = vand.u32 2139095040, %v4495_v63  ;;  %v6647_v18 = vand.u32 2147483647, %v4497_v0 }
 0x122   : >> { %v575_v19 = vand.u32 2139095040, %v4497_v0  ;;  %v679_v24 = vand.u32 2139095040, %v4499_v1  ;;  %v421_v26 = vmul.f32 %v417_v12, %v6763_v35  ;;  %v6769_v42 = vmov 2475754826  }
 0x123   : >> { %v472_v20 = vshrl.u32 %v471_v13, 23  ;;  %v475_v21 = vand.u32 8388607, %v6648_v16  ;;  %v579_v23 = vand.u32 8388607, %v6647_v18  ;;  %v4523_v13 = vmul.f32 %v451_v17, %v6758_v40 }
 0x124   : >> { %v576_v22 = vshrl.u32 %v575_v19, 23  ;;  %v680_v28 = vshrl.u32 %v679_v24, 23  ;;  %v4520_v61 = vadd.f32 %v421_v26, %v6760_v38  ;;  %v6663_v18 = vmov 2102212464  }
 0x125   : >> { %v3560_v25 = vadd.s32 4294967169, %v472_v20  ;;  %v476_v30 = vor.u32 8388608, %v475_v21  ;;  %v580_v58 = vor.u32 8388608, %v579_v23 }
 0x126   : >> { %v3564_v27 = vadd.s32 4294967169, %v576_v22  ;;  %v3568_v60 = vadd.s32 4294967169, %v680_v28 }
 0x127   : >> { %v478_v29 = vadd.s32 1, %v3560_v25  ;;  %v4525_v12 = vshll.u32 %v476_v30, 8  ;;  %v4527_v24 = vshll.u32 %v580_v58, 8  ;;  %v6671_v25 = vmov 683565275  }
 0x128   : >> { %v582_v59 = vadd.s32 1, %v3564_v27  ;;  %v4529_v21 = vadd.s32 1, %v3568_v60  ;;  %v6658_v27 = vmov 2475754826   ;;  %v6665_v30 = vmov 920167782  }
 0x129   : >> { %vm479_vm0 = vcmp.gt.s32.totalorder %v478_v29, 0 }
 0x12a   : >> { %v480_v62 = vsel %vm479_vm0, %v478_v29, 0  ;;  %vm583_vm1 = vcmp.gt.s32.totalorder %v582_v59, 0  ;;  %v6660_v29 = vmov 2131351028   ;;  %vm687_vm6 = vcmp.gt.s32.totalorder %v4529_v21, 0 }
 0x12b   : >> { %v481_v19 = vshrl.u32 %v480_v62, 5  ;;  %v482_v20 = vand.u32 31, %v480_v62  ;;  %v584_v56 = vsel %vm583_vm1, %v582_v59, 0 }
 0x12c   : >> { %v586_v22 = vand.u32 31, %v584_v56  ;;  %v4536_v58 = vshrl.u32 %v584_v56, 5 }
 0x12d   : >> { %v483_v23 = vsub.s32 32, %v482_v20  ;;  %v485_v26 = vshll.u32 %v6671_v25, %v482_v20  ;;  %v488_v28 = vshll.u32 %v6658_v27, %v482_v20  ;;  %v491_v17 = vshll.u32 %v6660_v29, %v482_v20 }
 0x12e   : >> { %v494_v59 = vshll.u32 %v6663_v18, %v482_v20  ;;  %v497_v62 = vshll.u32 %v6665_v30, %v482_v20  ;;  %vm500_vm2 = vcmp.lt.s32.totalorder %v481_v19, 1  ;;  %vm501_vm3 = vcmp.lt.s32.totalorder %v481_v19, 2 }
 0x12f   : >> { %v484_v60 = vshrl.u32 %v6671_v25, %v483_v23  ;;  %v486_v16 = vshrl.u32 %v6658_v27, %v483_v23  ;;  %v489_v31 = vshrl.u32 %v6660_v29, %v483_v23  ;;  %v492_v32 = vshrl.u32 %v6663_v18, %v483_v23 }
 0x130   : >> { %v495_v33 = vshrl.u32 %v6665_v30, %v483_v23  ;;  %v498_v35 = vshrl.u32 %v6668_v34, %v483_v23  ;;  %vm503_vm4 = vcmp.lt.s32.totalorder %v481_v19, 4  ;;  %v587_v56 = vsub.s32 32, %v586_v22 }
 0x131   : >> { %v487_v36 = vor.u32 %v486_v16, %v485_v26  ;;  %v490_v20 = vor.u32 %v489_v31, %v488_v28  ;;  %v493_v37 = vor.u32 %v492_v32, %v491_v17  ;;  %vm502_vm5 = vcmp.lt.s32.totalorder %v481_v19, 3 }
 0x132   : >> { %v496_v38 = vor.u32 %v495_v33, %v494_v59  ;;  %v499_v39 = vor.u32 %v498_v35, %v497_v62  ;;  %v589_v27 = vshll.u32 %v6671_v25, %v586_v22  ;;  %v592_v16 = vshll.u32 %v6769_v42, %v586_v22 }
 0x133   : >> { %v504_v29 = vsel %vm500_vm2, %v484_v60, %v487_v36  ;;  %v505_v40 = vsel %vm503_vm4, %v493_v37, 2102212464  ;;  %v508_v18 = vsel %vm500_vm2, %v487_v36, %v490_v20  ;;  %v512_v30 = vsel %vm500_vm2, %v490_v20, %v493_v37 }
 0x134   : >> { %v506_v41 = vsel %vm502_vm5, %v490_v20, %v505_v40  ;;  %v509_v23 = vsel %vm503_vm4, %v496_v38, 920167782  ;;  %v513_v34 = vsel %vm503_vm4, %v499_v39, 1326507024  ;;  %v588_v33 = vshrl.u32 %v6671_v25, %v587_v56 }
 0x135   : >> { %v510_v31 = vsel %vm502_vm5, %v493_v37, %v509_v23  ;;  %v514_v32 = vsel %vm502_vm5, %v496_v38, %v513_v34  ;;  %v590_v35 = vshrl.u32 %v6769_v42, %v587_v56  ;;  %v507_v26 = vsel %vm501_vm3, %v504_v29, %v506_v41 }
 0x136   : >> { %v511_v28 = vsel %vm501_vm3, %v508_v18, %v510_v31  ;;  %v515_v36 = vsel %vm501_vm3, %v512_v30, %v514_v32  ;;  %v6770_v17 = vmov 2131351028   ;;  %v6771_v41 = vmov 2102212464  }
 0x137   : >> { %v593_v40 = vshrl.u32 %v6770_v17, %v587_v56  ;;  %v4557_v39 = vmul.u32.u64.low %v4525_v12, %v515_v36  ;;  %v4558_v59 = vmul.u32.u64.high %v4525_v12, %v515_v36, %v4557_v39  ;;  %v591_v34 = vor.u32 %v590_v35, %v589_v27 }
 0x138   : >> { %v4561_v62 = vmul.u32.u64.low %v4525_v12, %v511_v28  ;;  %v4562_v37 = vmul.u32.u64.high %v4525_v12, %v511_v28, %v4561_v62  ;;  %v595_v60 = vshll.u32 %v6770_v17, %v586_v22  ;;  %v596_v29 = vshrl.u32 %v6771_v41, %v587_v56 }
 0x139   : >> { %v594_v38 = vor.u32 %v593_v40, %v592_v16  ;;  %v598_v18 = vshll.u32 %v6771_v41, %v586_v22  ;;  %v6772_v19 = vmov 920167782   ;;  %v6773_v23 = vmov 1326507024  }
 0x13a   : >> { %v599_v30 = vshrl.u32 %v6772_v19, %v587_v56  ;;  %v601_v20 = vshll.u32 %v6772_v19, %v586_v22  ;;  %v602_v31 = vshrl.u32 %v6773_v23, %v587_v56  ;;  %v523_v32 = vmul.u32 %v4525_v12, %v507_v26 }
 0x13b   : >> { %v597_v36 = vor.u32 %v596_v29, %v595_v60  ;;  %vm604_vm7 = vcmp.lt.s32.totalorder %v4536_v58, 1  ;;  %vm605_vm8 = vcmp.lt.s32.totalorder %v4536_v58, 2  ;;  %vm525_vm9 = vc.u32 %v4558_v59, %v4561_v62 }
 0x13c   : >> { %v526_v27 = vadd.s32 1, %v4562_v37  ;;  %v600_v16 = vor.u32 %v599_v30, %v598_v18  ;;  %vm606_vm10 = vcmp.lt.s32.totalorder %v4536_v58, 3  ;;  %v603_v35 = vor.u32 %v602_v31, %v601_v20 }
 0x13d   : >> { %vm607_vm11 = vcmp.lt.s32.totalorder %v4536_v58, 4  ;;  %v608_v22 = vsel %vm604_vm7, %v588_v33, %v591_v34  ;;  %v612_v56 = vsel %vm604_vm7, %v591_v34, %v594_v38  ;;  %v616_v40 = vsel %vm604_vm7, %v594_v38, %v597_v36 }
 0x13e   : >> { %v527_v12 = vsel %vm525_vm9, %v526_v27, %v4562_v37  ;;  %v609_v26 = vsel %vm607_vm11, %v597_v36, 2102212464  ;;  %v613_v28 = vsel %vm607_vm11, %v600_v16, 920167782  ;;  %v617_v25 = vsel %vm607_vm11, %v603_v35, 1326507024 }
 0x13f   : >> { %v528_v39 = vadd.s32 %v527_v12, %v523_v32  ;;  %v610_v60 = vsel %vm606_vm10, %v594_v38, %v609_v26  ;;  %v614_v29 = vsel %vm606_vm10, %v597_v36, %v613_v28  ;;  %v618_v30 = vsel %vm606_vm10, %v600_v16, %v617_v25 }
 0x140   : >> { %v611_v57 = vsel %vm605_vm8, %v608_v22, %v610_v60  ;;  %v615_v18 = vsel %vm605_vm8, %v612_v56, %v614_v29  ;;  %v688_v33 = vsel %vm687_vm6, %v4529_v21, 0  ;;  %v619_v37 = vsel %vm605_vm8, %v616_v40, %v618_v30 }
 0x141   : >> { %v529_v34 = vadd.s32 536870912, %v528_v39  ;;  %v4590_v20 = vmul.u32.u64.low %v4527_v24, %v615_v18  ;;  %v4591_v38 = vmul.u32.u64.high %v4527_v24, %v615_v18, %v4590_v20  ;;  %v6674_v25 = vand.u32 2147483647, %v4499_v1 }
 0x142   : >> { %v4595_v31 = vmul.u32.u64.low %v4527_v24, %v619_v37  ;;  %v4596_v32 = vmul.u32.u64.high %v4527_v24, %v619_v37, %v4595_v31  ;;  %v690_v27 = vand.u32 31, %v688_v33  ;;  %v4603_v21 = vadd.f32 %v4523_v13, %v4520_v61 }
 0x143   : >> { %v4598_v36 = vshrl.u32 %v529_v34, 30  ;;  %v627_v58 = vmul.u32 %v4527_v24, %v611_v57  ;;  %v630_v35 = vadd.s32 1, %v4591_v38  ;;  %v683_v26 = vand.u32 8388607, %v6674_v25 }
 0x144   : >> { %v691_v22 = vsub.s32 32, %v690_v27  ;;  %vm629_vm12 = vc.u32 %v4596_v32, %v4590_v20  ;;  %v689_v61 = vshrl.u32 %v688_v33, 5  ;;  %v6774_v13 = vmov 683565275  }
 0x145   : >> { %v531_v16 = vshll.u32 %v4598_v36, 30  ;;  %v631_v12 = vsel %vm629_vm12, %v630_v35, %v4591_v38  ;;  %v693_v40 = vshll.u32 %v6774_v13, %v690_v27  ;;  %v783_v57 = vand.u32 2139095040, %v4603_v21 }
 0x146   : >> { %v632_v28 = vadd.s32 %v631_v12, %v627_v58  ;;  %v694_v60 = vshrl.u32 %v6769_v42, %v691_v22  ;;  %v696_v29 = vshll.u32 %v6769_v42, %v690_v27  ;;  %v699_v30 = vshll.u32 %v6770_v17, %v690_v27 }
 0x147   : >> { %v4610_v56 = vsub.s32 %v528_v39, %v531_v16  ;;  %v697_v39 = vshrl.u32 %v6770_v17, %v691_v22  ;;  %v700_v34 = vshrl.u32 %v6771_v41, %v691_v22  ;;  %v702_v37 = vshll.u32 %v6771_v41, %v690_v27 }
 0x148   : >> { %v633_v18 = vadd.s32 536870912, %v632_v28  ;;  %v703_v38 = vshrl.u32 %v6772_v19, %v691_v22  ;;  %v684_v58 = vor.u32 8388608, %v683_v26  ;;  %v705_v16 = vshll.u32 %v6772_v19, %v690_v27 }
 0x149   : >> { %v534_v24 = vsub.s32 0, %v4610_v56  ;;  %v706_v35 = vshrl.u32 %v6773_v23, %v691_v22  ;;  %v695_v25 = vor.u32 %v694_v60, %v693_v40  ;;  %vm711_vm13 = vcmp.lt.s32.totalorder %v689_v61, 4 }
 0x14a   : >> { %v4626_v31 = vshrl.u32 %v633_v18, 30  ;;  %v784_v49 = vshrl.u32 %v783_v57, 23  ;;  %v698_v55 = vor.u32 %v697_v39, %v696_v29  ;;  %v701_v51 = vor.u32 %v700_v34, %v699_v30 }
 0x14b   : >> { %v3561_v33 = vmin.u32 %v534_v24, %v4610_v56  ;;  %v704_v54 = vor.u32 %v703_v38, %v702_v37  ;;  %v707_v24 = vor.u32 %v706_v35, %v705_v16  ;;  %vm708_vm14 = vcmp.lt.s32.totalorder %v689_v61, 1 }
 0x14c   : >> { %v635_v53 = vshll.u32 %v4626_v31, 30  ;;  %vm710_vm15 = vcmp.lt.s32.totalorder %v689_v61, 3  ;;  %v692_v26 = vshrl.u32 %v6774_v13, %v691_v22  ;;  %vm709_vm0 = vcmp.lt.s32.totalorder %v689_v61, 2 }
 0x14d   : >> { %v536_v12 = vclz %v3561_v33  ;;  %v717_v27 = vsel %vm711_vm13, %v704_v54, 920167782  ;;  %v713_v40 = vsel %vm711_vm13, %v701_v51, 2102212464  ;;  %v3572_v60 = vadd.s32 4294967169, %v784_v49 }
 0x14e   : >> { %v4631_v18 = vsub.s32 %v632_v28, %v635_v53  ;;  %v716_v29 = vsel %vm708_vm14, %v695_v25, %v698_v55  ;;  %v718_v39 = vsel %vm710_vm15, %v701_v51, %v717_v27  ;;  %v720_v30 = vsel %vm708_vm14, %v698_v55, %v701_v51 }
 0x14f   : >> { %v3562_v52 = vadd.s32 4294967294, %v536_v12  ;;  %v721_v53 = vsel %vm711_vm13, %v707_v24, 1326507024  ;;  %v724_v28 = vshll.u32 %v684_v58, 8  ;;  %v712_v34 = vsel %vm708_vm14, %v692_v26, %v695_v25 }
 0x150   : >> { %v638_v57 = vsub.s32 0, %v4631_v18  ;;  %v714_v37 = vsel %vm710_vm15, %v698_v55, %v713_v40  ;;  %v722_v49 = vsel %vm710_vm15, %v704_v54, %v721_v53  ;;  %v719_v33 = vsel %vm709_vm0, %v716_v29, %v718_v39 }
 0x151   : >> { %vm3563_vm1 = vcmp.lt.s32.totalorder %v3562_v52, 0  ;;  %v723_v38 = vsel %vm709_vm0, %v720_v30, %v722_v49  ;;  %v790_v16 = vadd.s32 1, %v3572_v60  ;;  %v715_v51 = vsel %vm709_vm0, %v712_v34, %v714_v37 }
 0x152   : >> { %v3565_v22 = vmin.u32 %v638_v57, %v4631_v18  ;;  %v539_v35 = vsel %vm3563_vm1, 0, %v3562_v52  ;;  %v4648_v27 = vmul.u32.u64.low %v724_v28, %v723_v38  ;;  %v4649_v24 = vmul.u32.u64.high %v724_v28, %v723_v38, %v4648_v27 }
 0x153   : >> { %v4651_v57 = vmul.u32.u64.low %v724_v28, %v719_v33  ;;  %v4652_v47 = vmul.u32.u64.high %v724_v28, %v719_v33, %v4651_v57  ;;  %vm791_vm2 = vcmp.gt.s32.totalorder %v790_v16, 0  ;;  %v544_v55 = vsub.s32 4294967266, %v539_v35 }
 0x154   : >> { %v640_v12 = vclz %v3565_v22  ;;  %v792_v54 = vsel %vm791_vm2, %v790_v16, 0  ;;  %v6682_v25 = vand.u32 2147483647, %v4603_v21  ;;  %v524_v52 = vadd.s32 %v4561_v62, %v4558_v59 }
 0x155   : >> { %v794_v26 = vand.u32 31, %v792_v54  ;;  %v540_v40 = vsub.s32 32, %v539_v35  ;;  %v731_v61 = vmul.u32 %v724_v28, %v715_v51  ;;  %vm733_vm3 = vc.u32 %v4649_v24, %v4651_v57 }
 0x156   : >> { %v3566_v58 = vadd.s32 4294967294, %v640_v12  ;;  %v734_v60 = vadd.s32 1, %v4652_v47  ;;  %v545_v29 = vadd.s32 127, %v544_v55  ;;  %v787_v53 = vand.u32 8388607, %v6682_v25 }
 0x157   : >> { %v795_v39 = vsub.s32 32, %v794_v26  ;;  %v541_v22 = vshll.u32 %v4610_v56, %v539_v35  ;;  %v542_v34 = vshrl.u32 %v524_v52, %v540_v40  ;;  %v797_v62 = vshll.u32 %v6774_v13, %v794_v26 }
 0x158   : >> { %vm3567_vm4 = vcmp.lt.s32.totalorder %v3566_v58, 0  ;;  %v735_v30 = vsel %vm733_vm3, %v734_v60, %v4652_v47  ;;  %v800_v49 = vshll.u32 %v6769_v42, %v794_v26  ;;  %v546_v38 = vshll.u32 %v545_v29, 23 }
 0x159   : >> { %v643_v37 = vsel %vm3567_vm4, 0, %v3566_v58  ;;  %v736_v59 = vadd.s32 %v735_v30, %v731_v61  ;;  %v798_v28 = vshrl.u32 %v6769_v42, %v795_v39  ;;  %v801_v33 = vshrl.u32 %v6770_v17, %v795_v39 }
 0x15a   : >> { %v793_v12 = vshrl.u32 %v792_v54, 5  ;;  %v806_v47 = vshll.u32 %v6771_v41, %v794_v26  ;;  %v648_v51 = vsub.s32 4294967266, %v643_v37  ;;  %v788_v27 = vor.u32 8388608, %v787_v53 }
 0x15b   : >> { %v737_v16 = vadd.s32 536870912, %v736_v59  ;;  %v803_v56 = vshll.u32 %v6770_v17, %v794_v26  ;;  %v804_v35 = vshrl.u32 %v6771_v41, %v795_v39  ;;  %v543_v58 = vor.u32 %v542_v34, %v541_v22 }
 0x15c   : >> { %v628_v55 = vadd.s32 %v4590_v20, %v4596_v32  ;;  %v807_v40 = vshrl.u32 %v6772_v19, %v795_v39  ;;  %v799_v61 = vor.u32 %v798_v28, %v797_v62  ;;  %v802_v60 = vor.u32 %v801_v33, %v800_v49 }
 0x15d   : >> { %v4674_v52 = vshrl.u32 %v737_v16, 30  ;;  %v809_v54 = vshll.u32 %v6772_v19, %v794_v26  ;;  %v810_v29 = vshrl.u32 %v6773_v23, %v795_v39  ;;  %v547_v30 = vor.u32 4788187, %v546_v38 }
 0x15e   : >> { %v808_v25 = vor.u32 %v807_v40, %v806_v47  ;;  %vm812_vm5 = vcmp.lt.s32.totalorder %v793_v12, 1  ;;  %v644_v50 = vsub.s32 32, %v643_v37  ;;  %v649_v22 = vadd.s32 127, %v648_v51 }
 0x15f   : >> { %v739_v53 = vshll.u32 %v4674_v52, 30  ;;  %v805_v34 = vor.u32 %v804_v35, %v803_v56  ;;  %v828_v45 = vshll.u32 %v788_v27, 8  ;;  %v796_v32 = vshrl.u32 %v6774_v13, %v795_v39 }
 0x160   : >> { %vm814_vm6 = vcmp.lt.s32.totalorder %v793_v12, 3  ;;  %vm815_vm7 = vcmp.lt.s32.totalorder %v793_v12, 4  ;;  %v811_v62 = vor.u32 %v810_v29, %v809_v54  ;;  %vm813_vm8 = vcmp.lt.s32.totalorder %v793_v12, 2 }
 0x161   : >> { %v4680_v20 = vsub.s32 %v736_v59, %v739_v53  ;;  %v817_v26 = vsel %vm815_vm7, %v805_v34, 2102212464  ;;  %v820_v28 = vsel %vm812_vm5, %v799_v61, %v802_v60  ;;  %v548_v49 = vand.u32 2147483647, %v547_v30 }
 0x162   : >> { %v550_v33 = vcvt.s32.f32 %v543_v58  ;;  %v821_v16 = vsel %vm815_vm7, %v808_v25, 920167782  ;;  %v645_v47 = vshll.u32 %v4631_v18, %v643_v37  ;;  %v646_v59 = vshrl.u32 %v628_v55, %v644_v50 }
 0x163   : >> { %v742_v38 = vsub.s32 0, %v4680_v20  ;;  %v650_v51 = vshll.u32 %v649_v22, 23  ;;  %v822_v39 = vsel %vm814_vm6, %v805_v34, %v821_v16  ;;  %v816_v56 = vsel %vm812_vm5, %v796_v32, %v799_v61 }
 0x164   : >> { %v818_v35 = vsel %vm814_vm6, %v802_v60, %v817_v26  ;;  %v823_v40 = vsel %vm813_vm8, %v820_v28, %v822_v39  ;;  %v824_v58 = vsel %vm812_vm5, %v802_v60, %v805_v34  ;;  %v825_v54 = vsel %vm815_vm7, %v811_v62, 1326507024 }
 0x165   : >> { %v3569_v27 = vmin.u32 %v742_v38, %v4680_v20  ;;  %v4695_v29 = vmul.u32.u64.low %v828_v45, %v823_v40  ;;  %v4696_v30 = vmul.u32.u64.high %v828_v45, %v823_v40, %v4695_v29  ;;  %v551_v18 = vmul.f32 %v550_v33, %v548_v49 }
 0x166   : >> { %v554_v37 = vsub.s32 4, %v4598_v36  ;;  %v647_v55 = vor.u32 %v646_v59, %v645_v47  ;;  %v826_v53 = vsel %vm814_vm6, %v808_v25, %v825_v54  ;;  %v651_v61 = vor.u32 4788187, %v650_v51 }
 0x167   : >> { %v744_v50 = vclz %v3569_v27  ;;  %v819_v32 = vsel %vm813_vm8, %v816_v56, %v818_v35  ;;  %v827_v26 = vsel %vm813_vm8, %v824_v58, %v826_v53  ;;  %v838_v62 = vadd.s32 1, %v4696_v30 }
 0x168   : >> { %v4703_v60 = vmul.u32.u64.low %v828_v45, %v827_v26  ;;  %v4704_v34 = vmul.u32.u64.high %v828_v45, %v827_v26, %v4703_v60  ;;  %vm470_vm10 = vcmp.lt.s32.totalorder %v4495_v63, 0  ;;  %v658_v28 = vsub.s32 4, %v4626_v31 }
 0x169   : >> { %v3570_v22 = vadd.s32 4294967294, %v744_v50  ;;  %v835_v49 = vmul.u32 %v828_v45, %v819_v32  ;;  %v887_v33 = vand.u32 2139095040, %v4501_v10  ;;  %v552_v25 = vxor.u32 2147483648, %v551_v18 }
 0x16a   : >> { %v555_v38 = vsel %vm470_vm10, %v554_v37, %v4598_v36  ;;  %v652_v12 = vand.u32 2147483647, %v651_v61  ;;  %v654_v16 = vcvt.s32.f32 %v647_v55  ;;  %vm837_vm11 = vc.u32 %v4704_v34, %v4695_v29 }
 0x16b   : >> { %vm3571_vm9 = vcmp.lt.s32.totalorder %v3570_v22, 0  ;;  %v888_v59 = vshrl.u32 %v887_v33, 23  ;;  %v6775_v51 = vand.u32 2147483647, %v4495_v63  ;;  %vm574_vm13 = vcmp.lt.s32.totalorder %v4497_v0, 0 }
 0x16c   : >> { %v747_v47 = vsel %vm3571_vm9, 0, %v3570_v22  ;;  %v839_v45 = vsel %vm837_vm11, %v838_v62, %v4696_v30  ;;  %v659_v27 = vsel %vm574_vm13, %v658_v28, %v4626_v31  ;;  %v553_v40 = vsel %vm470_vm10, %v552_v25, %v551_v18 }
 0x16d   : >> { %vm4717_vm12 = vcmp.le.f32.partialorder %v6775_v51, 0.7853982  ;;  %v840_v56 = vadd.s32 %v839_v45, %v835_v49  ;;  %v3576_v35 = vadd.s32 4294967169, %v888_v59  ;;  %v655_v58 = vmul.f32 %v654_v16, %v652_v12 }
 0x16e   : >> { %v557_v36 = vsel %vm4717_vm12, 0, %v555_v38  ;;  %v752_v54 = vsub.s32 4294967266, %v747_v47  ;;  %v6686_v50 = vand.u32 2147483647, %v4501_v10  ;;  %v6778_v37 = vand.u32 2147483647, %v4497_v0 }
 0x16f   : >> { %v841_v55 = vadd.s32 536870912, %v840_v56  ;;  %v894_v53 = vadd.s32 1, %v3576_v35  ;;  %v561_v61 = vadd.s32 3, %v557_v36  ;;  %v732_v22 = vadd.s32 %v4651_v57, %v4649_v24 }
 0x170   : >> { %vm4733_vm14 = vcmp.le.f32.partialorder %v6778_v37, 0.7853982  ;;  %v4744_v18 = vsel %vm4717_vm12, %v4495_v63, %v553_v40  ;;  %v748_v32 = vsub.s32 32, %v747_v47  ;;  %v656_v60 = vxor.u32 2147483648, %v655_v58 }
 0x171   : >> { %v661_v31 = vsel %vm4733_vm14, 0, %v659_v27  ;;  %v4746_v26 = vshrl.u32 %v841_v55, 30  ;;  %vm895_vm15 = vcmp.gt.s32.totalorder %v894_v53, 0  ;;  %v753_v62 = vadd.s32 127, %v752_v54 }
 0x172   : >> { %v891_v28 = vand.u32 8388607, %v6686_v50  ;;  %v896_v49 = vsel %vm895_vm15, %v894_v53, 0  ;;  %v991_v25 = vand.u32 2139095040, %v4503_v11  ;;  %v4752_v24 = vand.u32 3, %v561_v61 }
 0x173   : >> { %v843_v33 = vshll.u32 %v4746_v26, 30  ;;  %v4754_v57 = vadd.s32 3, %v661_v31  ;;  %v898_v38 = vand.u32 31, %v896_v49  ;;  %3881 = vcosq.f32 %v4744_v18 }
 0x174   : >> { %v749_v12 = vshll.u32 %v4680_v20, %v747_v47  ;;  %v750_v16 = vshrl.u32 %v732_v22, %v748_v32  ;;  %v657_v51 = vsel %vm574_vm13, %v656_v60, %v655_v58  ;;  %v754_v39 = vshll.u32 %v753_v62, 23 }
 0x175   : >> { %v4758_v59 = vsub.s32 %v840_v56, %v843_v33  ;;  %v892_v45 = vor.u32 8388608, %v891_v28  ;;  %v899_v36 = vsub.s32 32, %v898_v38  ;;  %v901_v35 = vshll.u32 %v6774_v13, %v898_v38 }
 0x176   : >> { %v904_v40 = vshll.u32 %v6769_v42, %v898_v38  ;;  %v992_v54 = vshrl.u32 %v991_v25, 23  ;;  %v4765_v37 = vshrl.u32 %v896_v49, 5  ;;  %v907_v56 = vshll.u32 %v6770_v17, %v898_v38 }
 0x177   : >> { %v846_v27 = vsub.s32 0, %v4758_v59  ;;  %v902_v20 = vshrl.u32 %v6769_v42, %v899_v36  ;;  %v905_v47 = vshrl.u32 %v6770_v17, %v899_v36  ;;  %v4773_v58 = vsel %vm4733_vm14, %v4497_v0, %v657_v51 }
 0x178   : >> { %v751_v55 = vor.u32 %v750_v16, %v749_v12  ;;  %v908_v61 = vshrl.u32 %v6771_v41, %v899_v36  ;;  %v755_v31 = vor.u32 4788187, %v754_v39  ;;  %v836_v22 = vadd.s32 %v4695_v29, %v4704_v34 }
 0x179   : >> { %v3573_v53 = vmin.u32 %v846_v27, %v4758_v59  ;;  %v910_v32 = vshll.u32 %v6771_v41, %v898_v38  ;;  %v4780_v60 = vshll.u32 %v892_v45, 8  ;;  %v903_v28 = vor.u32 %v902_v20, %v901_v35 }
 0x17a   : >> { %v906_v49 = vor.u32 %v905_v47, %v904_v40  ;;  %v3580_v33 = vadd.s32 4294967169, %v992_v54  ;;  %v909_v30 = vor.u32 %v908_v61, %v907_v56  ;;  %v911_v25 = vshrl.u32 %v6772_v19, %v899_v36 }
 0x17b   : >> { %v848_v62 = vclz %v3573_v53  ;;  %v913_v12 = vshll.u32 %v6772_v19, %v898_v38  ;;  %vm916_vm0 = vcmp.lt.s32.totalorder %v4765_v37, 1  ;;  %v758_v16 = vcvt.s32.f32 %v751_v55 }
 0x17c   : >> { %v914_v39 = vshrl.u32 %v6773_v23, %v899_v36  ;;  %vm919_vm1 = vcmp.lt.s32.totalorder %v4765_v37, 4  ;;  %v756_v29 = vand.u32 2147483647, %v755_v31  ;;  %v912_v34 = vor.u32 %v911_v25, %v910_v32 }
 0x17d   : >> { %v3574_v51 = vadd.s32 4294967294, %v848_v62  ;;  %vm917_vm2 = vcmp.lt.s32.totalorder %v4765_v37, 2  ;;  %vm918_vm3 = vcmp.lt.s32.totalorder %v4765_v37, 3  ;;  %v4789_v45 = vpop.eup %3881  ;;  %v900_v27 = vshrl.u32 %v6774_v13, %v899_v36 }
 0x17e   : >> { %v915_v38 = vor.u32 %v914_v39, %v913_v12  ;;  %v924_v35 = vsel %vm916_vm0, %v903_v28, %v906_v49  ;;  %v925_v54 = vsel %vm919_vm1, %v912_v34, 920167782  ;;  %v928_v20 = vsel %vm916_vm0, %v906_v49, %v909_v30 }
 0x17f   : >> { %vm3575_vm4 = vcmp.lt.s32.totalorder %v3574_v51, 0  ;;  %v998_v47 = vadd.s32 1, %v3580_v33  ;;  %v926_v61 = vsel %vm918_vm3, %v909_v30, %v925_v54  ;;  %v921_v36 = vsel %vm919_vm1, %v909_v30, 2102212464 }
 0x180   : >> { %v851_v40 = vsel %vm3575_vm4, 0, %v3574_v51  ;;  %v927_v31 = vsel %vm917_vm2, %v924_v35, %v926_v61  ;;  %v929_v32 = vsel %vm919_vm1, %v915_v38, 1326507024  ;;  %v920_v12 = vsel %vm916_vm0, %v900_v27, %v903_v28 }
 0x181   : >> { %v852_v56 = vsub.s32 32, %v851_v40  ;;  %v853_v55 = vshll.u32 %v4758_v59, %v851_v40  ;;  %v856_v53 = vsub.s32 4294967266, %v851_v40  ;;  %vm999_vm5 = vcmp.gt.s32.totalorder %v998_v47, 0 }
 0x182   : >> { %v930_v33 = vsel %vm918_vm3, %v912_v34, %v929_v32  ;;  %v1000_v59 = vsel %vm999_vm5, %v998_v47, 0  ;;  %v4814_v30 = vmul.u32.u64.low %v4780_v60, %v927_v31  ;;  %v4815_v39 = vmul.u32.u64.high %v4780_v60, %v927_v31, %v4814_v30 }
 0x183   : >> { %v854_v62 = vshrl.u32 %v836_v22, %v852_v56  ;;  %v857_v25 = vadd.s32 127, %v856_v53  ;;  %v931_v51 = vsel %vm917_vm2, %v928_v20, %v930_v33  ;;  %vm678_vm6 = vcmp.lt.s32.totalorder %v4499_v1, 0 }
 0x184   : >> { %v922_v35 = vsel %vm918_vm3, %v906_v49, %v921_v36  ;;  %v1002_v34 = vand.u32 31, %v1000_v59  ;;  %v759_v40 = vmul.f32 %v758_v16, %v756_v29  ;;  %v6685_v27 = vand.u32 2147483647, %v4503_v11 }
 0x185   : >> { %v855_v38 = vor.u32 %v854_v62, %v853_v55  ;;  %v858_v22 = vshll.u32 %v857_v25, 23  ;;  %v4822_v54 = vmul.u32.u64.low %v4780_v60, %v931_v51  ;;  %v4823_v28 = vmul.u32.u64.high %v4780_v60, %v931_v51, %v4822_v54 }
 0x186   : >> { %3883 = vsinq.f32 %v4744_v18  ;;  %vm782_vm7 = vcmp.lt.s32.totalorder %v4603_v21, 0  ;;  %v1003_v56 = vsub.s32 32, %v1002_v34  ;;  %v762_v55 = vsub.s32 4, %v4674_v52 }
 0x187   : >> { %v859_v20 = vor.u32 4788187, %v858_v22  ;;  %v862_v47 = vcvt.s32.f32 %v855_v38  ;;  %v923_v49 = vsel %vm917_vm2, %v920_v12, %v922_v35  ;;  %v1001_v53 = vshrl.u32 %v1000_v59, 5 }
 0x188   : >> { %v1005_v16 = vshll.u32 %v6774_v13, %v1002_v34  ;;  %3885 = vcosq.f32 %v4773_v58  ;;  %v6781_v29 = vand.u32 2147483647, %v4499_v1  ;;  %v1006_v36 = vshrl.u32 %v6769_v42, %v1003_v56 }
 0x189   : >> { %v860_v18 = vand.u32 2147483647, %v859_v20  ;;  %v1008_v31 = vshll.u32 %v6769_v42, %v1002_v34  ;;  %v760_v32 = vxor.u32 2147483648, %v759_v40  ;;  %v942_v37 = vadd.s32 1, %v4815_v39 }
 0x18a   : >> { %vm4835_vm8 = vcmp.le.f32.partialorder %v6781_v29, 0.7853982  ;;  %v995_v62 = vand.u32 8388607, %v6685_v27  ;;  %v1009_v25 = vshrl.u32 %v6770_v17, %v1003_v56  ;;  %v6784_v33 = vand.u32 2147483647, %v4603_v21 }
 0x18b   : >> { %v863_v12 = vmul.f32 %v862_v47, %v860_v18  ;;  %v939_v51 = vmul.u32 %v4780_v60, %v923_v49  ;;  %vm941_vm10 = vc.u32 %v4823_v28, %v4814_v30  ;;  %v1011_v38 = vshll.u32 %v6770_v17, %v1002_v34 }
 0x18c   : >> { %vm4847_vm9 = vcmp.le.f32.partialorder %v6784_v33, 0.7853982  ;;  %v1007_v22 = vor.u32 %v1006_v36, %v1005_v16  ;;  %v1012_v35 = vshrl.u32 %v6771_v41, %v1003_v56  ;;  %v1014_v54 = vshll.u32 %v6771_v41, %v1002_v34 }
 0x18d   : >> { %vm1020_vm11 = vcmp.lt.s32.totalorder %v1001_v53, 1  ;;  %v1010_v20 = vor.u32 %v1009_v25, %v1008_v31  ;;  %v1015_v29 = vshrl.u32 %v6772_v19, %v1003_v56  ;;  %v1017_v33 = vshll.u32 %v6772_v19, %v1002_v34 }
 0x18e   : >> { %v1018_v47 = vshrl.u32 %v6773_v23, %v1003_v56  ;;  %v864_v18 = vxor.u32 2147483648, %v863_v12  ;;  %v943_v60 = vsel %vm941_vm10, %v942_v37, %v4815_v39  ;;  %v1004_v49 = vshrl.u32 %v6774_v13, %v1003_v56 }
 0x18f   : >> { %v1013_v27 = vor.u32 %v1012_v35, %v1011_v38  ;;  %v996_v50 = vor.u32 8388608, %v995_v62  ;;  %v1016_v16 = vor.u32 %v1015_v29, %v1014_v54  ;;  %vm1023_vm12 = vcmp.lt.s32.totalorder %v1001_v53, 4 }
 0x190   : >> { %v1019_v36 = vor.u32 %v1018_v47, %v1017_v33  ;;  %3887 = vsinq.f32 %v4773_v58  ;;  %v761_v31 = vsel %vm678_vm6, %v760_v32, %v759_v40  ;;  %vm1022_vm13 = vcmp.lt.s32.totalorder %v1001_v53, 3  ;;  %v3884_v25 = vpop.eup %3883 }
 0x191   : >> { %v1025_v34 = vsel %vm1023_vm12, %v1013_v27, 2102212464  ;;  %v4866_v9 = vadd.s32 %v943_v60, %v939_v51  ;;  %vm1021_vm14 = vcmp.lt.s32.totalorder %v1001_v53, 2  ;;  %v1028_v39 = vsel %vm1020_vm11, %v1007_v22, %v1010_v20 }
 0x192   : >> { %v1029_v56 = vsel %vm1023_vm12, %v1016_v16, 920167782  ;;  %v865_v37 = vsel %vm782_vm7, %v864_v18, %v863_v12  ;;  %v866_v62 = vsub.s32 4, %v4746_v26  ;;  %v1024_v58 = vsel %vm1020_vm11, %v1004_v49, %v1007_v22  ;;  %v3886_v32 = vpop.eup %3885 }
 0x193   : >> { %v1026_v40 = vsel %vm1022_vm13, %v1010_v20, %v1025_v34  ;;  %v1030_v38 = vsel %vm1022_vm13, %v1013_v27, %v1029_v56  ;;  %v1032_v51 = vsel %vm1020_vm11, %v1010_v20, %v1013_v27  ;;  %v1033_v35 = vsel %vm1023_vm12, %v1019_v36, 1326507024 }
 0x194   : >> { %v1036_v54 = vshll.u32 %v996_v50, 8  ;;  %v763_v29 = vsel %vm678_vm6, %v762_v55, %v4674_v52  ;;  %v764_v12 = vsel %vm4835_vm8, %v4499_v1, %v761_v31  ;;  %v1031_v22 = vsel %vm1021_vm14, %v1028_v39, %v1030_v38 }
 0x195   : >> { %v1034_v33 = vsel %vm1022_vm13, %v1016_v16, %v1033_v35  ;;  %v945_v47 = vadd.s32 536870912, %v4866_v9  ;;  %v868_v52 = vsel %vm4847_vm9, %v4603_v21, %v865_v37  ;;  %v1027_v50 = vsel %vm1021_vm14, %v1024_v58, %v1026_v40 }
 0x196   : >> { %v1035_v18 = vsel %vm1021_vm14, %v1032_v51, %v1034_v33  ;;  %v4888_v27 = vmul.u32.u64.low %v1036_v54, %v1031_v22  ;;  %v4889_v20 = vmul.u32.u64.high %v1036_v54, %v1031_v22, %v4888_v27  ;;  %vm564_vm15 = vcmp.eq.s32.totalorder %v4752_v24, 0 }
 0x197   : >> { %v4896_v55 = vmul.u32.u64.low %v1036_v54, %v1035_v18  ;;  %v4897_v60 = vmul.u32.u64.high %v1036_v54, %v1035_v18, %v4896_v55  ;;  %3889 = vcosq.f32 %v764_v12  ;;  %v867_v49 = vsel %vm782_vm7, %v866_v62, %v4746_v26 }
 0x198   : >> { %v666_v16 = vand.u32 3, %v4754_v57  ;;  %v765_v36 = vsel %vm4835_vm8, 0, %v763_v29  ;;  %3891 = vsinq.f32 %v764_v12  ;;  %v1095_v31 = vand.u32 2139095040, %v4505_v14 }
 0x199   : >> { %v568_v53 = vxor.u32 2147483648, %v4789_v45  ;;  %3893 = vcosq.f32 %v868_v52  ;;  %v1043_v34 = vmul.u32 %v1036_v54, %v1027_v50  ;;  %v1046_v39 = vadd.s32 1, %v4889_v20 }
 0x19a   : >> { %v3888_v56 = vpop.eup %3887  ;;  %v565_v37 = vxor.u32 2147483648, %v3884_v25  ;;  %v869_v58 = vsel %vm4847_vm9, 0, %v867_v49  ;;  %3895 = vsinq.f32 %v868_v52  ;;  %v4911_v26 = vshrl.u32 %v945_v47, 30 }
 0x19b   : >> { %vm567_vm0 = vcmp.eq.s32.totalorder %v4752_v24, 2  ;;  %v769_v57 = vadd.s32 3, %v765_v36  ;;  %vm1045_vm1 = vc.u32 %v4897_v60, %v4888_v27  ;;  %v1096_v61 = vshrl.u32 %v1095_v31, 23 }
 0x19c   : >> { %vm563_vm2 = vcmp.lt.s32.totalorder %v4752_v24, 2  ;;  %vm671_vm3 = vcmp.eq.s32.totalorder %v666_v16, 2  ;;  %v1047_v62 = vsel %vm1045_vm1, %v1046_v39, %v4889_v20  ;;  %v672_v40 = vxor.u32 2147483648, %v3886_v32 }
 0x19d   : >> { %v873_v38 = vadd.s32 3, %v869_v58  ;;  %v4918_v51 = vadd.s32 %v1047_v62, %v1043_v34  ;;  %v3584_v59 = vadd.s32 4294967169, %v1096_v61  ;;  %v566_v35 = vsel %vm564_vm15, %v4789_v45, %v565_v37 }
 0x19e   : >> { %v569_v54 = vsel %vm567_vm0, %v568_v53, %v3884_v25  ;;  %v669_v29 = vxor.u32 2147483648, %v3888_v56  ;;  %v947_v12 = vshll.u32 %v4911_v26, 30  ;;  %vm668_vm4 = vcmp.eq.s32.totalorder %v666_v16, 0 }
 0x19f   : >> { %v4924_v22 = vand.u32 3, %v769_v57  ;;  %v1102_v33 = vadd.s32 1, %v3584_v59  ;;  %vm560_vm5 = vweird.f32 %v4495_v63  ;;  %vm667_vm6 = vcmp.lt.s32.totalorder %v666_v16, 2 }
 0x1a0   : >> { %v1049_v47 = vadd.s32 536870912, %v4918_v51  ;;  %v570_v20 = vsel %vm563_vm2, %v566_v35, %v569_v54  ;;  %v673_v52 = vsel %vm671_vm3, %v672_v40, %v3888_v56  ;;  %v4931_v45 = vand.u32 3, %v873_v38 }
 0x1a1   : >> { %v3890_v18 = vpop.eup %3889  ;;  %vm1103_vm7 = vcmp.gt.s32.totalorder %v1102_v33, 0  ;;  %v670_v50 = vsel %vm668_vm4, %v3886_v32, %v669_v29  ;;  %v4934_v55 = vsub.s32 %v4866_v9, %v947_v12  ;;  %v6687_v49 = vand.u32 2147483647, %v4505_v14 }
 0x1a2   : >> { %v3892_v25 = vpop.eup %3891  ;;  %v1104_v36 = vsel %vm1103_vm7, %v1102_v33, 0  ;;  %vm664_vm8 = vweird.f32 %v4497_v0  ;;  %vm772_vm9 = vcmp.eq.s32.totalorder %v4924_v22, 0  ;;  %v4941_v34 = vsel %vm560_vm5, nan, %v570_v20 }
 0x1a3   : >> { %v3894_v31 = vpop.eup %3893  ;;  %v1106_v24 = vand.u32 31, %v1104_v36  ;;  %vm771_vm10 = vcmp.lt.s32.totalorder %v4924_v22, 2  ;;  %vm775_vm11 = vcmp.eq.s32.totalorder %v4924_v22, 2  ;;  %v776_v9 = vxor.u32 2147483648, %v3890_v18 }
 0x1a4   : >> { %v3896_v53 = vpop.eup %3895  ;;  %v4945_v32 = vshrl.u32 %v1049_v47, 30  ;;  %v674_v39 = vsel %vm667_vm6, %v670_v50, %v673_v52  ;;  %vm875_vm12 = vcmp.lt.s32.totalorder %v4931_v45, 2  ;;  %vm876_vm13 = vcmp.eq.s32.totalorder %v4931_v45, 0 }
 0x1a5   : >> { %v1107_v56 = vsub.s32 32, %v1106_v24  ;;  %v773_v37 = vxor.u32 2147483648, %v3892_v25  ;;  %vm879_vm14 = vcmp.eq.s32.totalorder %v4931_v45, 2  ;;  %v950_v63 = vsub.s32 0, %v4934_v55 }
 0x1a6   : >> { %v1099_v58 = vand.u32 8388607, %v6687_v49  ;;  %v877_v57 = vxor.u32 2147483648, %v3896_v53  ;;  %v880_v61 = vxor.u32 2147483648, %v3894_v31  ;;  %v1109_v62 = vshll.u32 %v6774_v13, %v1106_v24 }
 0x1a7   : >> { %v1110_v16 = vshrl.u32 %v6769_v42, %v1107_v56  ;;  %vm768_vm15 = vweird.f32 %v4499_v1  ;;  %v777_v40 = vsel %vm775_vm11, %v776_v9, %v3892_v25  ;;  %vm872_vm0 = vweird.f32 %v4603_v21 }
 0x1a8   : >> { %v1051_v38 = vshll.u32 %v4945_v32, 30  ;;  %v1112_v59 = vshll.u32 %v6769_v42, %v1106_v24  ;;  %v1113_v35 = vshrl.u32 %v6770_v17, %v1107_v56  ;;  %v1105_v54 = vshrl.u32 %v1104_v36, 5 }
 0x1a9   : >> { %v1115_v29 = vshll.u32 %v6770_v17, %v1106_v24  ;;  %v1116_v12 = vshrl.u32 %v6771_v41, %v1107_v56  ;;  %v1118_v33 = vshll.u32 %v6771_v41, %v1106_v24  ;;  %v774_v47 = vsel %vm772_vm9, %v3890_v18, %v773_v37 }
 0x1aa   : >> { %v3577_v20 = vmin.u32 %v950_v63, %v4934_v55  ;;  %v1119_v52 = vshrl.u32 %v6772_v19, %v1107_v56  ;;  %v1199_v25 = vand.u32 2139095040, %v4507_v15  ;;  %v878_v50 = vsel %vm876_vm13, %v3894_v31, %v877_v57 }
 0x1ab   : >> { %v881_v36 = vsel %vm879_vm14, %v880_v61, %v3896_v53  ;;  %v1100_v9 = vor.u32 8388608, %v1099_v58  ;;  %v1111_v49 = vor.u32 %v1110_v16, %v1109_v62  ;;  %v1114_v8 = vor.u32 %v1113_v35, %v1112_v59 }
 0x1ac   : >> { %v1120_v7 = vor.u32 %v1119_v52, %v1118_v33  ;;  %v1121_v6 = vshll.u32 %v6772_v19, %v1106_v24  ;;  %v1122_v18 = vshrl.u32 %v6773_v23, %v1107_v56  ;;  %v4978_v37 = vsub.s32 %v4918_v51, %v1051_v38 }
 0x1ad   : >> { %v1108_v63 = vshrl.u32 %v6774_v13, %v1107_v56  ;;  %v1117_v48 = vor.u32 %v1116_v12, %v1115_v29  ;;  %vm1124_vm1 = vcmp.lt.s32.totalorder %v1105_v54, 1  ;;  %v675_v31 = vsel %vm664_vm8, nan, %v674_v39 }
 0x1ae   : >> { %v1123_v57 = vor.u32 %v1122_v18, %v1121_v6  ;;  %vm1127_vm2 = vcmp.lt.s32.totalorder %v1105_v54, 4  ;;  %v1200_v53 = vshrl.u32 %v1199_v25, 23  ;;  %v778_v58 = vsel %vm771_vm10, %v774_v47, %v777_v40 }
 0x1af   : >> { %vm1126_vm3 = vcmp.lt.s32.totalorder %v1105_v54, 3  ;;  %v1129_v24 = vsel %vm1127_vm2, %v1117_v48, 2102212464  ;;  %v1140_v61 = vshll.u32 %v1100_v9, 8  ;;  %v882_v51 = vsel %vm875_vm12, %v878_v50, %v881_v36 }
 0x1b0   : >> { %vm1125_vm4 = vcmp.lt.s32.totalorder %v1105_v54, 2  ;;  %v1132_v56 = vsel %vm1124_vm1, %v1111_v49, %v1114_v8  ;;  %v1133_v62 = vsel %vm1127_vm2, %v1120_v7, 920167782  ;;  %v952_v0 = vclz %v3577_v20 }
 0x1b1   : >> { %v1054_v6 = vsub.s32 0, %v4978_v37  ;;  %v1128_v39 = vsel %vm1124_vm1, %v1108_v63, %v1111_v49  ;;  %v1130_v22 = vsel %vm1126_vm3, %v1114_v8, %v1129_v24  ;;  %v1134_v16 = vsel %vm1126_vm3, %v1117_v48, %v1133_v62 }
 0x1b2   : >> { %v1136_v40 = vsel %vm1124_vm1, %v1114_v8, %v1117_v48  ;;  %v1137_v38 = vsel %vm1127_vm2, %v1123_v57, 1326507024  ;;  %v3588_v45 = vadd.s32 4294967169, %v1200_v53  ;;  %v779_v59 = vsel %vm768_vm15, nan, %v778_v58 }
 0x1b3   : >> { %v883_v35 = vsel %vm872_vm0, nan, %v882_v51  ;;  %v1135_v29 = vsel %vm1125_vm4, %v1132_v56, %v1134_v16  ;;  %v1138_v12 = vsel %vm1126_vm3, %v1120_v7, %v1137_v38  ;;  %v1131_v49 = vsel %vm1125_vm4, %v1128_v39, %v1130_v22 }
 0x1b4   : >> { %v1139_v33 = vsel %vm1125_vm4, %v1136_v40, %v1138_v12  ;;  %v5004_v47 = vmul.u32.u64.low %v1140_v61, %v1135_v29  ;;  %v5005_v20 = vmul.u32.u64.high %v1140_v61, %v1135_v29, %v5004_v47  ;;  %v3581_v8 = vmin.u32 %v1054_v6, %v4978_v37 }
 0x1b5   : >> { %v5009_v48 = vmul.u32.u64.low %v1140_v61, %v1139_v33  ;;  %v5010_v1 = vmul.u32.u64.high %v1140_v61, %v1139_v33, %v5009_v48  ;;  %v3578_v52 = vadd.s32 4294967294, %v952_v0  ;;  %v1206_v21 = vadd.s32 1, %v3588_v45 }
 0x1b6   : >> { %v1147_v25 = vmul.u32 %v1140_v61, %v1131_v49  ;;  %v3679_v50 = vpack.c.bf16 %v883_v35, %v675_v31  ;;  %v3681_v36 = vpack.c.bf16 %v779_v59, %v4941_v34  ;;  %v1150_v7 = vadd.s32 1, %v5005_v20 }
 0x1b7   : >> { %v1196_v54 = vand.u32 2147483647, %v4507_v15  ;;  %vm1207_vm5 = vcmp.gt.s32.totalorder %v1206_v21, 0  ;;  %v1056_v9 = vclz %v3581_v8  ;;  %vm1149_vm6 = vc.u32 %v5010_v1, %v5004_v47 }
 0x1b8   : >> { %v1208_v18 = vsel %vm1207_vm5, %v1206_v21, 0  ;;  %3680 = vmatprep.subr.bf16.mxu0 %v3679_v50  ;;  %v6689_v63 = vmov 0.0   ;;  %vm3579_vm7 = vcmp.lt.s32.totalorder %v3578_v52, 0  ;;  %v1151_v57 = vsel %vm1149_vm6, %v1150_v7, %v5005_v20 }
 0x1b9   : >> { %1377 = vmatprep.mubr.f32.mxu0 %v6689_v63  ;;  %v1210_v31 = vand.u32 31, %v1208_v18  ;;  %3682 = vmatpush1.bf16.msra.mxu0 %v3681_v36  ;;  %v1152_v34 = vadd.s32 %v1151_v57, %v1147_v25  ;;  %v1203_v53 = vand.u32 8388607, %v1196_v54  ;;  %v5022_v24 = vsel %vm3579_vm7, 0, %v3578_v52 }
 0x1ba   : >> { %2310 = vmatprep.mubr.f32.mxu1 %v6689_v63  ;;  %v3582_v61 = vadd.s32 4294967294, %v1056_v9  ;;  %v1209_v22 = vshrl.u32 %v1208_v18, 5  ;;  %v940_v38 = vadd.s32 %v4814_v30, %v4823_v28  ;;  %v956_v45 = vsub.s32 32, %v5022_v24 }
 0x1bb   : >> { %v1211_v58 = vsub.s32 32, %v1210_v31  ;;  %v1153_v51 = vadd.s32 536870912, %v1152_v34  ;;  %v1213_v56 = vshll.u32 %v6774_v13, %v1210_v31  ;;  %v1216_v0 = vshll.u32 %v6769_v42, %v1210_v31 }
 0x1bc   : >> { %v1219_v16 = vshll.u32 %v6770_v17, %v1210_v31  ;;  %v960_v59 = vsub.s32 4294967266, %v5022_v24  ;;  %v1204_v35 = vor.u32 8388608, %v1203_v53  ;;  %vm3583_vm8 = vcmp.lt.s32.totalorder %v3582_v61, 0 }
 0x1bd   : >> { %v1214_v62 = vshrl.u32 %v6769_v42, %v1211_v58  ;;  %v1217_v6 = vshrl.u32 %v6770_v17, %v1211_v58  ;;  %v5028_v39 = vshrl.u32 %v1153_v51, 30  ;;  %v1220_v40 = vshrl.u32 %v6771_v41, %v1211_v58 }
 0x1be   : >> { %v1212_v12 = vshrl.u32 %v6774_v13, %v1211_v58  ;;  %v1222_v20 = vshll.u32 %v6771_v41, %v1210_v31  ;;  %v1223_v8 = vshrl.u32 %v6772_v19, %v1211_v58  ;;  %v1225_v48 = vshll.u32 %v6772_v19, %v1210_v31 }
 0x1bf   : >> { %v1155_v29 = vshll.u32 %v5028_v39, 30  ;;  %v1215_v49 = vor.u32 %v1214_v62, %v1213_v56  ;;  %v1218_v33 = vor.u32 %v1217_v6, %v1216_v0  ;;  %v1221_v30 = vor.u32 %v1220_v40, %v1219_v16 }
 0x1c0   : >> { %v1226_v28 = vshrl.u32 %v6773_v23, %v1211_v58  ;;  %vm1228_vm9 = vcmp.lt.s32.totalorder %v1209_v22, 1  ;;  %v961_v21 = vadd.s32 127, %v960_v59  ;;  %v1059_v25 = vsel %vm3583_vm8, 0, %v3582_v61 }
 0x1c1   : >> { %v5041_v52 = vsub.s32 %v1152_v34, %v1155_v29  ;;  %v1224_v50 = vor.u32 %v1223_v8, %v1222_v20  ;;  %vm1230_vm10 = vcmp.lt.s32.totalorder %v1209_v22, 3  ;;  %vm1229_vm11 = vcmp.lt.s32.totalorder %v1209_v22, 2 }
 0x1c2   : >> { %v1227_v7 = vor.u32 %v1226_v28, %v1225_v48  ;;  %vm1231_vm12 = vcmp.lt.s32.totalorder %v1209_v22, 4  ;;  %v1236_v18 = vsel %vm1228_vm9, %v1215_v49, %v1218_v33  ;;  %v1244_v31 = vshll.u32 %v1204_v35, 8 }
 0x1c3   : >> { %v1158_v36 = vsub.s32 0, %v5041_v52  ;;  %v1233_v9 = vsel %vm1231_vm12, %v1221_v30, 2102212464  ;;  %v1237_v57 = vsel %vm1231_vm12, %v1224_v50, 920167782  ;;  %v1064_v34 = vsub.s32 4294967266, %v1059_v25 }
 0x1c4   : >> { %v1232_v58 = vsel %vm1228_vm9, %v1212_v12, %v1215_v49  ;;  %v1238_v51 = vsel %vm1230_vm10, %v1221_v30, %v1237_v57  ;;  %v1234_v61 = vsel %vm1230_vm10, %v1218_v33, %v1233_v9  ;;  %v1240_v62 = vsel %vm1228_vm9, %v1218_v33, %v1221_v30 }
 0x1c5   : >> { %v3585_v53 = vmin.u32 %v1158_v36, %v5041_v52  ;;  %v1239_v56 = vsel %vm1229_vm11, %v1236_v18, %v1238_v51  ;;  %v1241_v0 = vsel %vm1231_vm12, %v1227_v7, 1326507024  ;;  %v957_v6 = vshll.u32 %v4934_v55, %v5022_v24 }
 0x1c6   : >> { %v1044_v16 = vadd.s32 %v4888_v27, %v4897_v60  ;;  %v958_v59 = vshrl.u32 %v940_v38, %v956_v45  ;;  %v1242_v35 = vsel %vm1230_vm10, %v1224_v50, %v1241_v0  ;;  %v962_v49 = vshll.u32 %v961_v21, 23 }
 0x1c7   : >> { %v1160_v40 = vclz %v3585_v53  ;;  %v5057_v29 = vmul.u32.u64.low %v1244_v31, %v1239_v56  ;;  %v5058_v12 = vmul.u32.u64.high %v1244_v31, %v1239_v56, %v5057_v29  ;;  %v1235_v8 = vsel %vm1229_vm11, %v1232_v58, %v1234_v61 }
 0x1c8   : >> { %v1243_v33 = vsel %vm1229_vm11, %v1240_v62, %v1242_v35  ;;  %v1060_v48 = vsub.s32 32, %v1059_v25  ;;  %v1065_v30 = vadd.s32 127, %v1064_v34  ;;  %v1148_v27 = vadd.s32 %v5004_v47, %v5010_v1 }
 0x1c9   : >> { %v3586_v20 = vadd.s32 4294967294, %v1160_v40  ;;  %v5062_v28 = vmul.u32.u64.low %v1244_v31, %v1243_v33  ;;  %v5063_v55 = vmul.u32.u64.high %v1244_v31, %v1243_v33, %v5062_v28  ;;  %v1251_v24 = vmul.u32 %v1244_v31, %v1235_v8 }
 0x1ca   : >> { %v1254_v38 = vadd.s32 1, %v5058_v12  ;;  %v959_v45 = vor.u32 %v958_v59, %v957_v6  ;;  %v963_v21 = vor.u32 4788187, %v962_v49  ;;  %v1061_v22 = vshll.u32 %v4978_v37, %v1059_v25 }
 0x1cb   : >> { %vm3587_vm13 = vcmp.lt.s32.totalorder %v3586_v20, 0  ;;  %v1062_v7 = vshrl.u32 %v1044_v16, %v1060_v48  ;;  %v1066_v9 = vshll.u32 %v1065_v30, 23  ;;  %vm1253_vm14 = vc.u32 %v5063_v55, %v5057_v29 }
 0x1cc   : >> { %v1163_v60 = vsel %vm3587_vm13, 0, %v3586_v20  ;;  %v1255_v47 = vsel %vm1253_vm14, %v1254_v38, %v5058_v12  ;;  %v964_v61 = vand.u32 2147483647, %v963_v21  ;;  %v966_v56 = vcvt.s32.f32 %v959_v45 }
 0x1cd   : >> { %v1164_v50 = vsub.s32 32, %v1163_v60  ;;  %v1168_v36 = vsub.s32 4294967266, %v1163_v60  ;;  %v1165_v18 = vshll.u32 %v5041_v52, %v1163_v60  ;;  %v1256_v1 = vadd.s32 %v1255_v47, %v1251_v24 }
 0x1ce   : >> { %v1063_v53 = vor.u32 %v1062_v7, %v1061_v22  ;;  %v1067_v58 = vor.u32 4788187, %v1066_v9  ;;  %v967_v52 = vmul.f32 %v966_v56, %v964_v61  ;;  %vm886_vm15 = vcmp.lt.s32.totalorder %v4501_v10, 0 }
 0x1cf   : >> { %v1166_v57 = vshrl.u32 %v1148_v27, %v1164_v50  ;;  %v1169_v34 = vadd.s32 127, %v1168_v36  ;;  %v1257_v51 = vadd.s32 536870912, %v1256_v1  ;;  %v6787_v28 = vand.u32 2147483647, %v4501_v10 }
 0x1d0   : >> { %v1068_v25 = vand.u32 2147483647, %v1067_v58  ;;  %v1070_v6 = vcvt.s32.f32 %v1063_v53  ;;  %v968_v20 = vxor.u32 2147483648, %v967_v52  ;;  %vm990_vm1 = vcmp.lt.s32.totalorder %v4503_v11, 0 }
 0x1d1   : >> { %v1170_v31 = vshll.u32 %v1169_v34, 23  ;;  %v1167_v62 = vor.u32 %v1166_v57, %v1165_v18  ;;  %v5072_v37 = vshrl.u32 %v1257_v51, 30  ;;  %vm5078_vm0 = vcmp.le.f32.partialorder %v6787_v28, 0.7853982 }
 0x1d2   : >> { %v1071_v12 = vmul.f32 %v1070_v6, %v1068_v25  ;;  %v969_v60 = vsel %vm886_vm15, %v968_v20, %v967_v52  ;;  %vm1094_vm2 = vcmp.lt.s32.totalorder %v4505_v14, 0  ;;  %v6790_v45 = vand.u32 2147483647, %v4503_v11 }
 0x1d3   : >> { %v1171_v0 = vor.u32 4788187, %v1170_v31  ;;  %v1259_v16 = vshll.u32 %v5072_v37, 30  ;;  %v1174_v59 = vcvt.s32.f32 %v1167_v62  ;;  %v972_v50 = vsel %vm5078_vm0, %v4501_v10, %v969_v60 }
 0x1d4   : >> { %v1072_v48 = vxor.u32 2147483648, %v1071_v12  ;;  %vm5088_vm3 = vcmp.le.f32.partialorder %v6790_v45, 0.7853982  ;;  %v1252_v22 = vadd.s32 %v5057_v29, %v5063_v55  ;;  %v6793_v7 = vand.u32 2147483647, %v4505_v14 }
 0x1d5   : >> { %v1172_v40 = vand.u32 2147483647, %v1171_v0  ;;  %v1260_v35 = vsub.s32 %v1256_v1, %v1259_v16  ;;  %v970_v34 = vsub.s32 4, %v4911_v26  ;;  %3897 = vcosq.f32 %v972_v50 }
 0x1d6   : >> { %v1073_v36 = vsel %vm990_vm1, %v1072_v48, %v1071_v12  ;;  %vm5100_vm5 = vcmp.le.f32.partialorder %v6793_v7, 0.7853982  ;;  %v1178_v55 = vsub.s32 4, %v5028_v39  ;;  %3899 = vsinq.f32 %v972_v50 }
 0x1d7   : >> { %v1262_v49 = vsub.s32 0, %v1260_v35  ;;  %v1175_v8 = vmul.f32 %v1174_v59, %v1172_v40  ;;  %v1076_v29 = vsel %vm5088_vm3, %v4503_v11, %v1073_v36  ;;  %v1074_v61 = vsub.s32 4, %v4945_v32 }
 0x1d8   : >> { %v971_v56 = vsel %vm886_vm15, %v970_v34, %v4911_v26  ;;  %3901 = vcosq.f32 %v1076_v29  ;;  %v1179_v25 = vsel %vm1094_vm2, %v1178_v55, %v5028_v39  ;;  %v1282_v59 = vsub.s32 4, %v5072_v37 }
 0x1d9   : >> { %v3589_v33 = vmin.u32 %v1262_v49, %v1260_v35  ;;  %v1176_v24 = vxor.u32 2147483648, %v1175_v8  ;;  %v973_v52 = vsel %vm5078_vm0, 0, %v971_v56  ;;  %v1075_v40 = vsel %vm990_vm1, %v1074_v61, %v4945_v32 }
 0x1da   : >> { %v977_v12 = vadd.s32 3, %v973_v52  ;;  %v1077_v39 = vsel %vm5088_vm3, 0, %v1075_v40  ;;  %vm1198_vm6 = vcmp.lt.s32.totalorder %v4507_v15, 0  ;;  %vm5134_vm7 = vcmp.le.f32.partialorder %v1196_v54, 0.7853982 }
 0x1db   : >> { %v1264_v30 = vclz %v3589_v33  ;;  %v1177_v18 = vsel %vm1094_vm2, %v1176_v24, %v1175_v8  ;;  %v1283_v48 = vsel %vm1198_vm6, %v1282_v59, %v5072_v37  ;;  %v1081_v28 = vadd.s32 3, %v1077_v39 }
 0x1dc   : >> { %v1180_v53 = vsel %vm5100_vm5, %v4505_v14, %v1177_v18  ;;  %v978_v60 = vand.u32 3, %v977_v12  ;;  %v1285_v21 = vsel %vm5134_vm7, 0, %v1283_v48  ;;  %vm976_vm1 = vweird.f32 %v4501_v10 }
 0x1dd   : >> { %v3590_v38 = vadd.s32 4294967294, %v1264_v30  ;;  %3903 = vcosq.f32 %v1180_v53  ;;  %v1289_v7 = vadd.s32 3, %v1285_v21  ;;  %vm1184_vm2 = vweird.f32 %v4505_v14 }
 0x1de   : >> { %3905 = vsinq.f32 %v1180_v53  ;;  %vm980_vm8 = vcmp.eq.s32.totalorder %v978_v60, 0  ;;  %vm983_vm9 = vcmp.eq.s32.totalorder %v978_v60, 2  ;;  %vm979_vm14 = vcmp.lt.s32.totalorder %v978_v60, 2 }
 0x1df   : >> { %vm3591_vm4 = vcmp.lt.s32.totalorder %v3590_v38, 0  ;;  %3907 = vsinq.f32 %v1076_v29  ;;  %v3898_v20 = vpop.eup %3897 }
 0x1e0   : >> { %v1267_v57 = vsel %vm3591_vm4, 0, %v3590_v38  ;;  %v3900_v30 = vpop.eup %3899  ;;  %v984_v37 = vxor.u32 2147483648, %v3898_v20  ;;  %vm1080_vm4 = vweird.f32 %v4503_v11 }
 0x1e1   : >> { %v1268_v47 = vsub.s32 32, %v1267_v57  ;;  %v1269_v1 = vshll.u32 %v1260_v35, %v1267_v57  ;;  %v1272_v31 = vsub.s32 4294967266, %v1267_v57  ;;  %v1181_v35 = vsel %vm5100_vm5, 0, %v1179_v25 }
 0x1e2   : >> { %v1185_v8 = vadd.s32 3, %v1181_v35  ;;  %v3902_v27 = vpop.eup %3901  ;;  %v981_v9 = vxor.u32 2147483648, %v3900_v30 }
 0x1e3   : >> { %v1270_v58 = vshrl.u32 %v1252_v22, %v1268_v47  ;;  %v1273_v51 = vadd.s32 127, %v1272_v31  ;;  %v1082_v22 = vand.u32 3, %v1081_v28  ;;  %v1088_v47 = vxor.u32 2147483648, %v3902_v27 }
 0x1e4   : >> { %v1186_v50 = vand.u32 3, %v1185_v8  ;;  %v1290_v31 = vand.u32 3, %v1289_v7  ;;  %v982_v29 = vsel %vm980_vm8, %v3898_v20, %v981_v9  ;;  %vm1300_vm8 = vcmask 261120  }
 0x1e5   : >> { %v1271_v62 = vor.u32 %v1270_v58, %v1269_v1  ;;  %v1274_v0 = vshll.u32 %v1273_v51, 23  ;;  %vm1084_vm12 = vcmp.eq.s32.totalorder %v1082_v22, 0  ;;  %vm1087_vm13 = vcmp.eq.s32.totalorder %v1082_v22, 2 }
 0x1e6   : >> { %vm1188_vm10 = vcmp.eq.s32.totalorder %v1186_v50, 0  ;;  %vm1191_vm11 = vcmp.eq.s32.totalorder %v1186_v50, 2  ;;  %v985_v1 = vsel %vm983_vm9, %v984_v37, %v3900_v30  ;;  %vm1187_vm15 = vcmp.lt.s32.totalorder %v1186_v50, 2 }
 0x1e7   : >> { %v1275_v6 = vor.u32 4788187, %v1274_v0  ;;  %v1278_v16 = vcvt.s32.f32 %v1271_v62  ;;  %v3904_v38 = vpop.eup %3903  ;;  %vm1083_vm0 = vcmp.lt.s32.totalorder %v1082_v22, 2  ;;  %v986_v56 = vsel %vm979_vm14, %v982_v29, %v985_v1 }
 0x1e8   : >> { %v3906_v54 = vpop.eup %3905  ;;  %v1192_v57 = vxor.u32 2147483648, %v3904_v38  ;;  %vm1295_vm3 = vcmp.eq.s32.totalorder %v1290_v31, 2  ;;  %vm1292_vm5 = vcmp.eq.s32.totalorder %v1290_v31, 0  ;;  %v987_v52 = vsel %vm976_vm1, nan, %v986_v56 }
 0x1e9   : >> { %v1276_v26 = vand.u32 2147483647, %v1275_v6  ;;  %v3908_v36 = vpop.eup %3907  ;;  %v1189_v18 = vxor.u32 2147483648, %v3906_v54 }
 0x1ea   : >> { %v1085_v34 = vxor.u32 2147483648, %v3908_v36  ;;  %v1193_v53 = vsel %vm1191_vm11, %v1192_v57, %v3906_v54  ;;  %v1089_v51 = vsel %vm1087_vm13, %v1088_v47, %v3908_v36 }
 0x1eb   : >> { %v1279_v49 = vmul.f32 %v1278_v16, %v1276_v26  ;;  %v1190_v55 = vsel %vm1188_vm10, %v3904_v38, %v1189_v18 }
 0x1ec   : >> { %v1086_v58 = vsel %vm1084_vm12, %v3902_v27, %v1085_v34  ;;  %v1194_v62 = vsel %vm1187_vm15, %v1190_v55, %v1193_v53 }
 0x1ed   : >> { %v1280_v33 = vxor.u32 2147483648, %v1279_v49  ;;  %v1090_v25 = vsel %vm1083_vm0, %v1086_v58, %v1089_v51  ;;  %v1195_v40 = vsel %vm1184_vm2, nan, %v1194_v62 }
 0x1ee   : >> { %v1091_v10 = vsel %vm1080_vm4, nan, %v1090_v25  ;;  %v3685_v14 = vpack.c.bf16 %v1195_v40, %v987_v52 }
 0x1ef   : >> { %v1281_v24 = vsel %vm1198_vm6, %v1280_v33, %v1279_v49  ;;  %vm1291_vm6 = vcmp.lt.s32.totalorder %v1290_v31, 2 }
 0x1f0   : >> { %v1284_v45 = vsel %vm5134_vm7, %v4507_v15, %v1281_v24  ;;  %vm1288_vm7 = vweird.f32 %v4507_v15 }
 0x1f1   : >> { %3909 = vcosq.f32 %v1284_v45 }
 0x1f2   : >> { %3911 = vsinq.f32 %v1284_v45 }
 0x1fb   : >> { %v3910_v61 = vpop.eup %3909 }
 0x1fc   : >> { %v3912_v0 = vpop.eup %3911  ;;  %v1296_v6 = vxor.u32 2147483648, %v3910_v61 }
 0x1fd   : >> { %v1293_v16 = vxor.u32 2147483648, %v3912_v0 }
 0x1fe   : >> { %v1297_v26 = vsel %vm1295_vm3, %v1296_v6, %v3912_v0 }
 0x1ff   : >> { %v1294_v59 = vsel %vm1292_vm5, %v3910_v61, %v1293_v16 }
 0x200   : >> { %v1298_v35 = vsel %vm1291_vm6, %v1294_v59, %v1297_v26 }
 0x201   : >> { %v1299_v12 = vsel %vm1288_vm7, nan, %v1298_v35 }
 0x202   : >> { %v3683_v39 = vpack.c.bf16 %v1299_v12, %v1091_v10 }
 0x204   : >> { %3684 = vmatprep.subr.bf16.mxu0 %v3683_v39 }
 0x205   : >> { %3686 = vmatpush1.bf16.msra.mxu0 %v3685_v14 }
 0x208   : >> { %3592 = vmatmul.mubr.msk.f32.vlgmr.msra.gmra.mrb[0].mxu0 %vm1300_vm8, %v6798_v2 }
 0x209   : >> { %1383 = vmatprep.mubr.f32.mxu0 %v6689_v63 }
 0x20c   : >> { %3593 = vmatmul.mubr.msk.f32.gmra.mrb[2].mxu0 %vm1300_vm8, %v6799_v3 }
 0x20d   : >> { %1389 = vmatprep.mubr.f32.mxu0 %v6689_v63 }
 0x210   : >> { %3594 = vmatmul.mubr.msk.f32.gmra.mrb[4].mxu0 %vm1300_vm8, %v6800_v4 }
 0x211   : >> { %1395 = vmatprep.mubr.f32.mxu0 %v6689_v63 }
 0x214   : >> { %3595 = vmatmul.mubr.msk.f32.gmra.mrb[6].mxu0 %vm1300_vm8, %v6801_v5 }
 0x2db   : >> { %v1379_v11 = vpop.f32.mrb[0].mxu0 }
 0x2dc   : >> { %v5161_v15 = vadd.f32 %v1379_v11, %v6754_v44  ;;  %v1381_v49 = vpop.f32.mrb[1].mxu0 }
 0x2dd   : >> { %v5164_v20 = vadd.f32 %v1381_v49, %v6754_v44 }
 0x2de   : >> { %v1402_v8 = vand.u32 2147483647, %v5161_v15  ;;  %v1405_v32 = vand.u32 2139095040, %v5161_v15  ;;  %vm1404_vm6 = vcmp.lt.s32.totalorder %v5161_v15, 0 }
 0x2df   : >> { %v1385_v33 = vpop.f32.mrb[2].mxu0  ;;  %v1506_v48 = vand.u32 2147483647, %v5164_v20  ;;  %v1509_v30 = vand.u32 2139095040, %v5164_v20 }
 0x2e0   : >> { %v5171_v28 = vadd.f32 %v1385_v33, %v6755_v43  ;;  %v5173_v27 = vpop.f32.mrb[3].mxu0  ;;  %v1406_v60 = vshrl.u32 %v1405_v32, 23  ;;  %v1409_v24 = vand.u32 8388607, %v1402_v8 }
 0x2e1   : >> { %v1510_v38 = vshrl.u32 %v1509_v30, 23  ;;  %v1513_v45 = vand.u32 8388607, %v1506_v48 }
 0x2e2   : >> { %v3596_v21 = vadd.s32 4294967169, %v1406_v60  ;;  %v1613_v36 = vand.u32 2139095040, %v5171_v28  ;;  %v1410_v7 = vor.u32 8388608, %v1409_v24 }
 0x2e3   : >> { %v5179_v54 = vpop.f32.mrb[4].mxu0  ;;  %v3600_v50 = vadd.s32 4294967169, %v1510_v38  ;;  %v1514_v9 = vor.u32 8388608, %v1513_v45 }
 0x2e4   : >> { %v5182_v22 = vpop.f32.mrb[5].mxu0  ;;  %v1412_v37 = vadd.s32 1, %v3596_v21  ;;  %v1614_v57 = vshrl.u32 %v1613_v36, 23  ;;  %v5188_v53 = vshll.u32 %v1410_v7, 8 }
 0x2e5   : >> { %v1516_v18 = vadd.s32 1, %v3600_v50  ;;  %v5190_v58 = vshll.u32 %v1514_v9, 8 }
 0x2e6   : >> { %vm1413_vm9 = vcmp.gt.s32.totalorder %v1412_v37, 0  ;;  %v5192_v51 = vadd.s32 4294967169, %v1614_v57 }
 0x2e7   : >> { %v5184_v34 = vpop.f32.mrb[6].mxu0  ;;  %v1414_v47 = vsel %vm1413_vm9, %v1412_v37, 0  ;;  %vm1517_vm10 = vcmp.gt.s32.totalorder %v1516_v18, 0 }
 0x2e8   : >> { %v5186_v1 = vpop.f32.mrb[7].mxu0  ;;  %v1415_v31 = vshrl.u32 %v1414_v47, 5  ;;  %v1416_v29 = vand.u32 31, %v1414_v47  ;;  %v1518_v55 = vsel %vm1517_vm10, %v1516_v18, 0 }
 0x2e9   : >> { %v5195_v62 = vshrl.u32 %v1518_v55, 5  ;;  %v1520_v0 = vand.u32 31, %v1518_v55 }
 0x2ea   : >> { %v1417_v61 = vsub.s32 32, %v1416_v29  ;;  %v1419_v56 = vshll.u32 %v6774_v13, %v1416_v29  ;;  %v1422_v25 = vshll.u32 %v6769_v42, %v1416_v29  ;;  %v1425_v6 = vshll.u32 %v6770_v17, %v1416_v29 }
 0x2eb   : >> { %v1428_v16 = vshll.u32 %v6771_v41, %v1416_v29  ;;  %v1431_v52 = vshll.u32 %v6772_v19, %v1416_v29  ;;  %vm1434_vm11 = vcmp.lt.s32.totalorder %v1415_v31, 1  ;;  %vm1435_vm12 = vcmp.lt.s32.totalorder %v1415_v31, 2 }
 0x2ec   : >> { %v1420_v40 = vshrl.u32 %v6769_v42, %v1417_v61  ;;  %v1423_v26 = vshrl.u32 %v6770_v17, %v1417_v61  ;;  %v1426_v10 = vshrl.u32 %v6771_v41, %v1417_v61  ;;  %v1418_v59 = vshrl.u32 %v6774_v13, %v1417_v61 }
 0x2ed   : >> { %v1429_v35 = vshrl.u32 %v6772_v19, %v1417_v61  ;;  %v1432_v12 = vshrl.u32 %v6773_v23, %v1417_v61  ;;  %v1521_v49 = vsub.s32 32, %v1520_v0  ;;  %vm1436_vm13 = vcmp.lt.s32.totalorder %v1415_v31, 3 }
 0x2ee   : >> { %v1421_v14 = vor.u32 %v1420_v40, %v1419_v56  ;;  %v1424_v39 = vor.u32 %v1423_v26, %v1422_v25  ;;  %v1427_v11 = vor.u32 %v1426_v10, %v1425_v6  ;;  %vm1437_vm14 = vcmp.lt.s32.totalorder %v1415_v31, 4 }
 0x2ef   : >> { %v1430_v32 = vor.u32 %v1429_v35, %v1428_v16  ;;  %v1433_v33 = vor.u32 %v1432_v12, %v1431_v52  ;;  %v1523_v36 = vshll.u32 %v6774_v13, %v1520_v0  ;;  %v1524_v9 = vshrl.u32 %v6769_v42, %v1521_v49 }
 0x2f0   : >> { %v1438_v30 = vsel %vm1434_vm11, %v1418_v59, %v1421_v14  ;;  %v1439_v60 = vsel %vm1437_vm14, %v1427_v11, 2102212464  ;;  %v1442_v24 = vsel %vm1434_vm11, %v1421_v14, %v1424_v39  ;;  %v1446_v38 = vsel %vm1434_vm11, %v1424_v39, %v1427_v11 }
 0x2f1   : >> { %v1440_v45 = vsel %vm1436_vm13, %v1424_v39, %v1439_v60  ;;  %v1443_v21 = vsel %vm1437_vm14, %v1430_v32, 920167782  ;;  %v1447_v50 = vsel %vm1437_vm14, %v1433_v33, 1326507024  ;;  %v1526_v18 = vshll.u32 %v6769_v42, %v1520_v0 }
 0x2f2   : >> { %v1444_v37 = vsel %vm1436_vm13, %v1427_v11, %v1443_v21  ;;  %v1448_v7 = vsel %vm1436_vm13, %v1430_v32, %v1447_v50  ;;  %v1441_v57 = vsel %vm1435_vm12, %v1438_v30, %v1440_v45  ;;  %v1527_v55 = vshrl.u32 %v6770_v17, %v1521_v49 }
 0x2f3   : >> { %v1445_v47 = vsel %vm1435_vm12, %v1442_v24, %v1444_v37  ;;  %v1449_v29 = vsel %vm1435_vm12, %v1446_v38, %v1448_v7  ;;  %v1525_v16 = vor.u32 %v1524_v9, %v1523_v36  ;;  %v1529_v40 = vshll.u32 %v6770_v17, %v1520_v0 }
 0x2f4   : >> { %v5218_v61 = vmul.u32.u64.low %v5188_v53, %v1449_v29  ;;  %v5219_v56 = vmul.u32.u64.high %v5188_v53, %v1449_v29, %v5218_v61  ;;  %v5222_v25 = vmul.u32.u64.low %v5188_v53, %v1445_v47  ;;  %v5223_v6 = vmul.u32.u64.high %v5188_v53, %v1445_v47, %v5222_v25 }
 0x2f5   : >> { %v1528_v52 = vor.u32 %v1527_v55, %v1526_v18  ;;  %v1530_v26 = vshrl.u32 %v6771_v41, %v1521_v49  ;;  %v1522_v10 = vshrl.u32 %v6774_v13, %v1521_v49  ;;  %v1532_v31 = vshll.u32 %v6771_v41, %v1520_v0 }
 0x2f6   : >> { %v1533_v59 = vshrl.u32 %v6772_v19, %v1521_v49  ;;  %v1536_v35 = vshrl.u32 %v6773_v23, %v1521_v49  ;;  %v1457_v12 = vmul.u32 %v5188_v53, %v1441_v57  ;;  %v1535_v39 = vshll.u32 %v6772_v19, %v1520_v0 }
 0x2f7   : >> { %v1531_v14 = vor.u32 %v1530_v26, %v1529_v40  ;;  %vm1538_vm15 = vcmp.lt.s32.totalorder %v5195_v62, 1  ;;  %vm1459_vm0 = vc.u32 %v5219_v56, %v5222_v25  ;;  %v1460_v11 = vadd.s32 1, %v5223_v6 }
 0x2f8   : >> { %v1534_v32 = vor.u32 %v1533_v59, %v1532_v31  ;;  %vm1539_vm1 = vcmp.lt.s32.totalorder %v5195_v62, 2  ;;  %v1537_v33 = vor.u32 %v1536_v35, %v1535_v39  ;;  %vm1540_vm2 = vcmp.lt.s32.totalorder %v5195_v62, 3 }
 0x2f9   : >> { %vm1541_vm3 = vcmp.lt.s32.totalorder %v5195_v62, 4  ;;  %v1546_v49 = vsel %vm1538_vm15, %v1525_v16, %v1528_v52  ;;  %v1461_v53 = vsel %vm1459_vm0, %v1460_v11, %v5223_v6  ;;  %v1550_v0 = vsel %vm1538_vm15, %v1528_v52, %v1531_v14 }
 0x2fa   : >> { %v1543_v30 = vsel %vm1541_vm3, %v1531_v14, 2102212464  ;;  %v1547_v60 = vsel %vm1541_vm3, %v1534_v32, 920167782  ;;  %v1462_v24 = vadd.s32 %v1461_v53, %v1457_v12  ;;  %v1542_v38 = vsel %vm1538_vm15, %v1522_v10, %v1525_v16 }
 0x2fb   : >> { %v1548_v45 = vsel %vm1540_vm2, %v1531_v14, %v1547_v60  ;;  %v1551_v21 = vsel %vm1541_vm3, %v1537_v33, 1326507024  ;;  %v1544_v50 = vsel %vm1540_vm2, %v1528_v52, %v1543_v30  ;;  %v1620_v7 = vadd.s32 1, %v5192_v51 }
 0x2fc   : >> { %v1549_v36 = vsel %vm1539_vm1, %v1546_v49, %v1548_v45  ;;  %v1552_v37 = vsel %vm1540_vm2, %v1534_v32, %v1551_v21  ;;  %v1463_v9 = vadd.s32 536870912, %v1462_v24  ;;  %v1610_v61 = vand.u32 2147483647, %v5171_v28 }
 0x2fd   : >> { %v1553_v18 = vsel %vm1539_vm1, %v1550_v0, %v1552_v37  ;;  %v5246_v57 = vmul.u32.u64.low %v5190_v58, %v1549_v36  ;;  %v5247_v47 = vmul.u32.u64.high %v5190_v58, %v1549_v36, %v5246_v57  ;;  %vm1621_vm4 = vcmp.gt.s32.totalorder %v1620_v7, 0 }
 0x2fe   : >> { %v5251_v29 = vmul.u32.u64.low %v5190_v58, %v1553_v18  ;;  %v5252_v55 = vmul.u32.u64.high %v5190_v58, %v1553_v18, %v5251_v29  ;;  %v5255_v6 = vshrl.u32 %v1463_v9, 30  ;;  %v1545_v51 = vsel %vm1539_vm1, %v1542_v38, %v1544_v50 }
 0x2ff   : >> { %v1622_v16 = vsel %vm1621_vm4, %v1620_v7, 0  ;;  %v5261_v40 = vadd.f32 %v5173_v27, %v6755_v43  ;;  %v1564_v10 = vadd.s32 1, %v5247_v47  ;;  %v1561_v31 = vmul.u32 %v5190_v58, %v1545_v51 }
 0x300   : >> { %v1624_v52 = vand.u32 31, %v1622_v16  ;;  %v1465_v26 = vshll.u32 %v5255_v6, 30  ;;  %vm1563_vm5 = vc.u32 %v5252_v55, %v5246_v57  ;;  %v1617_v59 = vand.u32 8388607, %v1610_v61 }
 0x301   : >> { %v1565_v12 = vsel %vm1563_vm5, %v1564_v10, %v5247_v47  ;;  %v1717_v33 = vand.u32 2139095040, %v5261_v40  ;;  %v1458_v58 = vadd.s32 %v5222_v25, %v5219_v56  ;;  %v1623_v0 = vshrl.u32 %v1622_v16, 5 }
 0x302   : >> { %v1625_v62 = vsub.s32 32, %v1624_v52  ;;  %v1466_v35 = vsub.s32 %v1462_v24, %v1465_v26  ;;  %v1566_v14 = vadd.s32 %v1565_v12, %v1561_v31  ;;  %v1618_v11 = vor.u32 8388608, %v1617_v59 }
 0x303   : >> { %v1627_v24 = vshll.u32 %v6774_v13, %v1624_v52  ;;  %v1630_v21 = vshll.u32 %v6769_v42, %v1624_v52  ;;  %v1633_v50 = vshll.u32 %v6770_v17, %v1624_v52  ;;  %v1636_v37 = vshll.u32 %v6771_v41, %v1624_v52 }
 0x304   : >> { %v1468_v39 = vsub.s32 0, %v1466_v35  ;;  %v1567_v27 = vadd.s32 536870912, %v1566_v14  ;;  %v1628_v32 = vshrl.u32 %v6769_v42, %v1625_v62  ;;  %v1631_v53 = vshrl.u32 %v6770_v17, %v1625_v62 }
 0x305   : >> { %v1634_v30 = vshrl.u32 %v6771_v41, %v1625_v62  ;;  %v1637_v38 = vshrl.u32 %v6772_v19, %v1625_v62  ;;  %v1640_v36 = vshrl.u32 %v6773_v23, %v1625_v62  ;;  %v1658_v7 = vshll.u32 %v1618_v11, 8 }
 0x306   : >> { %v3597_v49 = vmin.u32 %v1468_v39, %v1466_v35  ;;  %v5276_v60 = vshrl.u32 %v1567_v27, 30  ;;  %v1629_v25 = vor.u32 %v1628_v32, %v1627_v24  ;;  %v1632_v18 = vor.u32 %v1631_v53, %v1630_v21 }
 0x307   : >> { %v1635_v47 = vor.u32 %v1634_v30, %v1633_v50  ;;  %v1639_v29 = vshll.u32 %v6772_v19, %v1624_v52  ;;  %v1488_v51 = vsub.s32 4, %v5255_v6  ;;  %v1638_v26 = vor.u32 %v1637_v38, %v1636_v37 }
 0x308   : >> { %v1470_v45 = vclz %v3597_v49  ;;  %v1569_v56 = vshll.u32 %v5276_v60, 30  ;;  %v1718_v10 = vshrl.u32 %v1717_v33, 23  ;;  %v1626_v31 = vshrl.u32 %v6774_v13, %v1625_v62 }
 0x309   : >> { %v1641_v59 = vor.u32 %v1640_v36, %v1639_v29  ;;  %vm1642_vm9 = vcmp.lt.s32.totalorder %v1623_v0, 1  ;;  %vm1644_vm10 = vcmp.lt.s32.totalorder %v1623_v0, 3  ;;  %vm1645_vm11 = vcmp.lt.s32.totalorder %v1623_v0, 4 }
 0x30a   : >> { %v3598_v9 = vadd.s32 4294967294, %v1470_v45  ;;  %v5288_v16 = vsub.s32 %v1566_v14, %v1569_v56  ;;  %v1647_v11 = vsel %vm1645_vm11, %v1635_v47, 2102212464  ;;  %v1650_v32 = vsel %vm1642_vm9, %v1629_v25, %v1632_v18 }
 0x30b   : >> { %v1651_v53 = vsel %vm1645_vm11, %v1638_v26, 920167782  ;;  %v1654_v33 = vsel %vm1642_vm9, %v1632_v18, %v1635_v47  ;;  %v1655_v38 = vsel %vm1645_vm11, %v1641_v59, 1326507024  ;;  %vm1643_vm12 = vcmp.lt.s32.totalorder %v1623_v0, 2 }
 0x30c   : >> { %vm3599_vm7 = vcmp.lt.s32.totalorder %v3598_v9, 0  ;;  %v1572_v39 = vsub.s32 0, %v5288_v16  ;;  %v1652_v24 = vsel %vm1644_vm10, %v1635_v47, %v1651_v53  ;;  %v1646_v21 = vsel %vm1642_vm9, %v1626_v31, %v1629_v25 }
 0x30d   : >> { %v1473_v12 = vsel %vm3599_vm7, 0, %v3598_v9  ;;  %v1648_v50 = vsel %vm1644_vm10, %v1632_v18, %v1647_v11  ;;  %v1653_v37 = vsel %vm1643_vm12, %v1650_v32, %v1652_v24  ;;  %v1489_v47 = vsel %vm1404_vm6, %v1488_v51, %v5255_v6 }
 0x30e   : >> { %v1474_v27 = vsub.s32 32, %v1473_v12  ;;  %v1478_v52 = vsub.s32 4294967266, %v1473_v12  ;;  %v1475_v49 = vshll.u32 %v1466_v35, %v1473_v12  ;;  %v3601_v14 = vmin.u32 %v1572_v39, %v5288_v16 }
 0x30f   : >> { %v1656_v35 = vsel %vm1644_vm10, %v1638_v26, %v1655_v38  ;;  %v5299_v12 = vmul.u32.u64.low %v1658_v7, %v1653_v37  ;;  %v5300_v39 = vmul.u32.u64.high %v1658_v7, %v1653_v37, %v5299_v12  ;;  %v1649_v18 = vsel %vm1643_vm12, %v1646_v21, %v1648_v50 }
 0x310   : >> { %v1476_v30 = vshrl.u32 %v1458_v58, %v1474_v27  ;;  %v1479_v62 = vadd.s32 127, %v1478_v52  ;;  %v1574_v45 = vclz %v3601_v14  ;;  %v1657_v29 = vsel %vm1643_vm12, %v1654_v33, %v1656_v35 }
 0x311   : >> { %v5306_v59 = vmul.u32.u64.low %v1658_v7, %v1657_v29  ;;  %v5307_v25 = vmul.u32.u64.high %v1658_v7, %v1657_v29, %v5306_v59  ;;  %v3608_v31 = vadd.s32 4294967169, %v1718_v10  ;;  %vm5311_vm13 = vcmp.le.f32.partialorder %v1402_v8, 0.7853982 }
 0x312   : >> { %v1477_v36 = vor.u32 %v1476_v30, %v1475_v49  ;;  %v1480_v56 = vshll.u32 %v1479_v62, 23  ;;  %v3602_v9 = vadd.s32 4294967294, %v1574_v45  ;;  %v1491_v52 = vsel %vm5311_vm13, 0, %v1489_v47 }
 0x313   : >> { %v1668_v11 = vadd.s32 1, %v5300_v39  ;;  %v1665_v51 = vmul.u32 %v1658_v7, %v1649_v18  ;;  %vm1667_vm15 = vc.u32 %v5307_v25, %v5299_v12  ;;  %v1724_v10 = vadd.s32 1, %v3608_v31 }
 0x314   : >> { %v1481_v58 = vor.u32 4788187, %v1480_v56  ;;  %v1484_v27 = vcvt.s32.f32 %v1477_v36  ;;  %vm3603_vm14 = vcmp.lt.s32.totalorder %v3602_v9, 0  ;;  %v1495_v14 = vadd.s32 3, %v1491_v52 }
 0x315   : >> { %v1669_v32 = vsel %vm1667_vm15, %v1668_v11, %v5300_v39  ;;  %vm1725_vm0 = vcmp.gt.s32.totalorder %v1724_v10, 0  ;;  %v5321_v53 = vsel %vm3603_vm14, 0, %v3602_v9  ;;  %v1714_v38 = vand.u32 2147483647, %v5261_v40 }
 0x316   : >> { %v1482_v26 = vand.u32 2147483647, %v1481_v58  ;;  %v1670_v49 = vadd.s32 %v1669_v32, %v1665_v51  ;;  %v1726_v33 = vsel %vm1725_vm0, %v1724_v10, 0  ;;  %v1582_v45 = vsub.s32 4294967266, %v5321_v53 }
 0x317   : >> { %v1728_v24 = vand.u32 31, %v1726_v33  ;;  %v5334_v36 = vadd.f32 %v5179_v54, %v6753_v46  ;;  %v1496_v56 = vand.u32 3, %v1495_v14  ;;  %v1562_v35 = vadd.s32 %v5246_v57, %v5252_v55 }
 0x318   : >> { %v1485_v6 = vmul.f32 %v1484_v27, %v1482_v26  ;;  %v1671_v62 = vadd.s32 536870912, %v1670_v49  ;;  %v1721_v9 = vand.u32 8388607, %v1714_v38  ;;  %v1578_v58 = vsub.s32 32, %v5321_v53 }
 0x319   : >> { %v1729_v50 = vsub.s32 32, %v1728_v24  ;;  %v1583_v47 = vadd.s32 127, %v1582_v45  ;;  %vm1498_vm1 = vcmp.eq.s32.totalorder %v1496_v56, 0  ;;  %v1731_v18 = vshll.u32 %v6774_v13, %v1728_v24 }
 0x31a   : >> { %v1486_v8 = vxor.u32 2147483648, %v1485_v6  ;;  %v5330_v21 = vshrl.u32 %v1671_v62, 30  ;;  %v1734_v31 = vshll.u32 %v6769_v42, %v1728_v24  ;;  %v1821_v55 = vand.u32 2139095040, %v5334_v36 }
 0x31b   : >> { %v1732_v29 = vshrl.u32 %v6769_v42, %v1729_v50  ;;  %v1735_v39 = vshrl.u32 %v6770_v17, %v1729_v50  ;;  %v1741_v54 = vshrl.u32 %v6772_v19, %v1729_v50  ;;  %v1738_v57 = vshrl.u32 %v6771_v41, %v1729_v50 }
 0x31c   : >> { %v1487_v30 = vsel %vm1404_vm6, %v1486_v8, %v1485_v6  ;;  %v1673_v37 = vshll.u32 %v5330_v21, 30  ;;  %vm1497_vm2 = vcmp.lt.s32.totalorder %v1496_v56, 2  ;;  %vm1501_vm3 = vcmp.eq.s32.totalorder %v1496_v56, 2 }
 0x31d   : >> { %v1490_v7 = vsel %vm5311_vm13, %v5161_v15, %v1487_v30  ;;  %v1727_v26 = vshrl.u32 %v1726_v33, 5  ;;  %v1740_v27 = vshll.u32 %v6771_v41, %v1728_v24  ;;  %vm1494_vm4 = vweird.f32 %v5161_v15 }
 0x31e   : >> { %3913 = vcosq.f32 %v1490_v7  ;;  %v5344_v59 = vsub.s32 %v1670_v49, %v1673_v37  ;;  %v1733_v52 = vor.u32 %v1732_v29, %v1731_v18  ;;  %v1736_v11 = vor.u32 %v1735_v39, %v1734_v31 }
 0x31f   : >> { %3915 = vsinq.f32 %v1490_v7  ;;  %v1737_v6 = vshll.u32 %v6770_v17, %v1728_v24  ;;  %v1744_v51 = vshrl.u32 %v6773_v23, %v1729_v50  ;;  %v1722_v32 = vor.u32 8388608, %v1721_v9 }
 0x320   : >> { %v1676_v0 = vsub.s32 0, %v5344_v59  ;;  %v1742_v8 = vor.u32 %v1741_v54, %v1740_v27  ;;  %v1743_v49 = vshll.u32 %v6772_v19, %v1728_v24  ;;  %v1580_v14 = vshrl.u32 %v1562_v35, %v1578_v58 }
 0x321   : >> { %v1584_v30 = vshll.u32 %v1583_v47, 23  ;;  %v1739_v62 = vor.u32 %v1738_v57, %v1737_v6  ;;  %v1822_v33 = vshrl.u32 %v1821_v55, 23  ;;  %v1730_v37 = vshrl.u32 %v6774_v13, %v1729_v50 }
 0x322   : >> { %v3605_v10 = vmin.u32 %v1676_v0, %v5344_v59  ;;  %v1745_v29 = vor.u32 %v1744_v51, %v1743_v49  ;;  %vm1746_vm5 = vcmp.lt.s32.totalorder %v1727_v26, 1  ;;  %vm1747_vm6 = vcmp.lt.s32.totalorder %v1727_v26, 2 }
 0x323   : >> { %vm1749_vm7 = vcmp.lt.s32.totalorder %v1727_v26, 4  ;;  %v1754_v31 = vsel %vm1746_vm5, %v1733_v52, %v1736_v11  ;;  %vm1748_vm9 = vcmp.lt.s32.totalorder %v1727_v26, 3  ;;  %v1758_v57 = vsel %vm1746_vm5, %v1736_v11, %v1739_v62 }
 0x324   : >> { %v1678_v45 = vclz %v3605_v10  ;;  %v1755_v24 = vsel %vm1749_vm7, %v1742_v8, 920167782  ;;  %v1751_v58 = vsel %vm1749_vm7, %v1739_v62, 2102212464  ;;  %v1759_v0 = vsel %vm1749_vm7, %v1745_v29, 1326507024 }
 0x325   : >> { %v1756_v47 = vsel %vm1748_vm9, %v1739_v62, %v1755_v24  ;;  %v1760_v51 = vsel %vm1748_vm9, %v1742_v8, %v1759_v0  ;;  %v1762_v10 = vshll.u32 %v1722_v32, 8  ;;  %v1752_v62 = vsel %vm1748_vm9, %v1736_v11, %v1751_v58 }
 0x326   : >> { %v3606_v54 = vadd.s32 4294967294, %v1678_v45  ;;  %v1757_v55 = vsel %vm1747_vm6, %v1754_v31, %v1756_v47  ;;  %v3612_v56 = vadd.s32 4294967169, %v1822_v33  ;;  %v1579_v8 = vshll.u32 %v5288_v16, %v5321_v53 }
 0x327   : >> { %v1585_v32 = vor.u32 4788187, %v1584_v30  ;;  %v1666_v33 = vadd.s32 %v5299_v12, %v5307_v25  ;;  %v6693_v58 = vand.u32 2147483647, %v5334_v36  ;;  %vm1508_vm0 = vcmp.lt.s32.totalorder %v5164_v20, 0 }
 0x328   : >> { %v3914_v7 = vpop.eup %3913  ;;  %vm3607_vm10 = vcmp.lt.s32.totalorder %v3606_v54, 0  ;;  %v1581_v24 = vor.u32 %v1580_v14, %v1579_v8  ;;  %vm5512_vm9 = vcmp.le.f32.partialorder %v1714_v38, 0.7853982 }
 0x329   : >> { %v3916_v39 = vpop.eup %3915  ;;  %v1502_v18 = vxor.u32 2147483648, %v3914_v7  ;;  %v1681_v6 = vsel %vm3607_vm10, 0, %v3606_v54  ;;  %v1828_v54 = vadd.s32 1, %v3612_v56  ;;  %v1825_v12 = vand.u32 8388607, %v6693_v58 }
 0x32a   : >> { %v1499_v9 = vxor.u32 2147483648, %v3916_v39  ;;  %v1686_v45 = vsub.s32 4294967266, %v1681_v6  ;;  %v1588_v47 = vcvt.s32.f32 %v1581_v24  ;;  %v1683_v0 = vshll.u32 %v5344_v59, %v1681_v6 }
 0x32b   : >> { %v1503_v35 = vsel %vm1501_vm3, %v1502_v18, %v3916_v39  ;;  %v1750_v39 = vsel %vm1746_vm5, %v1730_v37, %v1733_v52  ;;  %v5374_v18 = vmul.u32.u64.low %v1762_v10, %v1757_v55  ;;  %v5375_v31 = vmul.u32.u64.high %v1762_v10, %v1757_v55, %v5374_v18 }
 0x32c   : >> { %v1500_v50 = vsel %vm1498_vm1, %v3914_v7, %v1499_v9  ;;  %v1761_v7 = vsel %vm1747_vm6, %v1758_v57, %v1760_v51  ;;  %v1687_v9 = vadd.s32 127, %v1686_v45  ;;  %v1682_v52 = vsub.s32 32, %v1681_v6 }
 0x32d   : >> { %v1504_v27 = vsel %vm1497_vm2, %v1500_v50, %v1503_v35  ;;  %v5380_v29 = vmul.u32.u64.low %v1762_v10, %v1761_v7  ;;  %v5381_v15 = vmul.u32.u64.high %v1762_v10, %v1761_v7, %v5380_v29  ;;  %v1753_v11 = vsel %vm1747_vm6, %v1750_v39, %v1752_v62 }
 0x32e   : >> { %v5369_v49 = vsel %vm1494_vm4, nan, %v1504_v27  ;;  %v1772_v37 = vadd.s32 1, %v5375_v31  ;;  %vm1829_vm11 = vcmp.gt.s32.totalorder %v1828_v54, 0  ;;  %v1586_v35 = vand.u32 2147483647, %v1585_v32 }
 0x32f   : >> { %v1688_v16 = vshll.u32 %v1687_v9, 23  ;;  %v1769_v53 = vmul.u32 %v1762_v10, %v1753_v11  ;;  %vm1771_vm12 = vc.u32 %v5381_v15, %v5374_v18  ;;  %v1830_v30 = vsel %vm1829_vm11, %v1828_v54, 0 }
 0x330   : >> { %v1684_v14 = vshrl.u32 %v1666_v33, %v1682_v52  ;;  %v1773_v26 = vsel %vm1771_vm12, %v1772_v37, %v5375_v31  ;;  %v1832_v50 = vand.u32 31, %v1830_v30  ;;  %v1589_v55 = vmul.f32 %v1588_v47, %v1586_v35 }
 0x331   : >> { %v1774_v57 = vadd.s32 %v1773_v26, %v1769_v53  ;;  %v1689_v27 = vor.u32 4788187, %v1688_v16  ;;  %v5396_v45 = vshrl.u32 %v1830_v30, 5  ;;  %v5424_v33 = vadd.f32 %v5182_v22, %v6753_v46 }
 0x332   : >> { %v5394_v25 = vsub.s32 32, %v1832_v50  ;;  %v1685_v10 = vor.u32 %v1684_v14, %v1683_v0  ;;  %v1835_v39 = vshll.u32 %v6774_v13, %v1832_v50  ;;  %v1838_v62 = vshll.u32 %v6769_v42, %v1832_v50 }
 0x333   : >> { %v1775_v51 = vadd.s32 536870912, %v1774_v57  ;;  %v1841_v6 = vshll.u32 %v6770_v17, %v1832_v50  ;;  %v1844_v8 = vshll.u32 %v6771_v41, %v1832_v50  ;;  %v1690_v9 = vand.u32 2147483647, %v1689_v27 }
 0x334   : >> { %v1836_v31 = vshrl.u32 %v6769_v42, %v5394_v25  ;;  %v1839_v59 = vshrl.u32 %v6770_v17, %v5394_v25  ;;  %v1842_v56 = vshrl.u32 %v6771_v41, %v5394_v25  ;;  %v1845_v32 = vshrl.u32 %v6772_v19, %v5394_v25 }
 0x335   : >> { %v5400_v7 = vshrl.u32 %v1775_v51, 30  ;;  %v1848_v29 = vshrl.u32 %v6773_v23, %v5394_v25  ;;  %v1847_v24 = vshll.u32 %v6772_v19, %v1832_v50  ;;  %v1592_v16 = vsub.s32 4, %v5276_v60 }
 0x336   : >> { %v5416_v52 = vor.u32 %v1836_v31, %v1835_v39  ;;  %v5418_v11 = vor.u32 %v1839_v59, %v1838_v62  ;;  %v5420_v37 = vor.u32 %v1842_v56, %v1841_v6  ;;  %v1846_v35 = vor.u32 %v1845_v32, %v1844_v8 }
 0x337   : >> { %v1777_v54 = vshll.u32 %v5400_v7, 30  ;;  %v1849_v30 = vor.u32 %v1848_v29, %v1847_v24  ;;  %v1590_v47 = vxor.u32 2147483648, %v1589_v55  ;;  %v1692_v14 = vcvt.s32.f32 %v1685_v10 }
 0x338   : >> { %v1826_v26 = vor.u32 8388608, %v1825_v12  ;;  %vm1853_vm13 = vcmp.lt.s32.totalorder %v5396_v45, 4  ;;  %vm1850_vm14 = vcmp.lt.s32.totalorder %v5396_v45, 1  ;;  %vm1852_vm15 = vcmp.lt.s32.totalorder %v5396_v45, 3 }
 0x339   : >> { %v1778_v53 = vsub.s32 %v1774_v57, %v1777_v54  ;;  %v1859_v0 = vsel %vm1853_vm13, %v1846_v35, 920167782  ;;  %v1693_v27 = vmul.f32 %v1692_v14, %v1690_v9  ;;  %v1858_v22 = vsel %vm1850_vm14, %v5416_v52, %v5418_v11  ;;  %v6808_v14 = vld [vmem:[#allocation36_spill] sm:$0xff] }
 0x33a   : >> { %v1860_v57 = vsel %vm1852_vm15, %v5420_v37, %v1859_v0  ;;  %v1863_v51 = vsel %vm1853_vm13, %v1849_v30, 1326507024  ;;  %v1862_v10 = vsel %vm1850_vm14, %v5418_v11, %v5420_v37  ;;  %v1593_v39 = vsel %vm1508_vm0, %v1592_v16, %v5276_v60 }
 0x33b   : >> { %v1780_v50 = vsub.s32 0, %v1778_v53  ;;  %vm1851_vm1 = vcmp.lt.s32.totalorder %v5396_v45, 2  ;;  %v1864_v62 = vsel %vm1852_vm15, %v1846_v35, %v1863_v51  ;;  %vm5452_vm2 = vcmp.le.f32.partialorder %v1506_v48, 0.7853982 }
 0x33c   : >> { %v1591_v59 = vsel %vm1508_vm0, %v1590_v47, %v1589_v55  ;;  %v1861_v56 = vsel %vm1851_vm1, %v1858_v22, %v1860_v57  ;;  %v1694_v8 = vxor.u32 2147483648, %v1693_v27  ;;  %v1865_v60 = vsel %vm1851_vm1, %v1862_v10, %v1864_v62 }
 0x33d   : >> { %v3609_v12 = vmin.u32 %v1780_v50, %v1778_v53  ;;  %v5460_v32 = vshll.u32 %v1826_v26, 8  ;;  %v1925_v29 = vand.u32 2139095040, %v5424_v33  ;;  %v1595_v9 = vsel %vm5452_vm2, 0, %v1593_v39 }
 0x33e   : >> { %vm5467_vm3 = vcmp.le.f32.partialorder %v1610_v61, 0.7853982  ;;  %vm1612_vm4 = vcmp.lt.s32.totalorder %v5171_v28, 0  ;;  %v1696_v54 = vsub.s32 4, %v5330_v21  ;;  %v1594_v30 = vsel %vm5452_vm2, %v5164_v20, %v1591_v59 }
 0x33f   : >> { %v1782_v6 = vclz %v3609_v12  ;;  %v5474_v24 = vmul.u32.u64.low %v5460_v32, %v1861_v56  ;;  %v5475_v35 = vmul.u32.u64.high %v5460_v32, %v1861_v56, %v5474_v24  ;;  %v1926_v16 = vshrl.u32 %v1925_v29, 23 }
 0x340   : >> { %v5482_v61 = vmul.u32.u64.low %v5460_v32, %v1865_v60  ;;  %v5483_v47 = vmul.u32.u64.high %v5460_v32, %v1865_v60, %v5482_v61  ;;  %v5487_v26 = vadd.f32 %v5184_v34, %v6808_v14  ;;  %v1695_v50 = vsel %vm1612_vm4, %v1694_v8, %v1693_v27 }
 0x341   : >> { %v3610_v55 = vadd.s32 4294967294, %v1782_v6  ;;  %vm1716_vm6 = vcmp.lt.s32.totalorder %v5261_v40, 0  ;;  %v3616_v22 = vadd.s32 4294967169, %v1926_v16  ;;  %v1599_v57 = vadd.s32 3, %v1595_v9 }
 0x342   : >> { %v1770_v51 = vadd.s32 %v5374_v18, %v5381_v15  ;;  %3917 = vcosq.f32 %v1594_v30  ;;  %v1697_v39 = vsel %vm1612_vm4, %v1696_v54, %v5330_v21  ;;  %v6692_v34 = vand.u32 2147483647, %v5424_v33 }
 0x343   : >> { %vm3611_vm5 = vcmp.lt.s32.totalorder %v3610_v55, 0  ;;  %v1932_v62 = vadd.s32 1, %v3616_v22  ;;  %v1698_v27 = vsel %vm5467_vm3, %v5171_v28, %v1695_v50  ;;  %3919 = vsinq.f32 %v1594_v30 }
 0x344   : >> { %v1785_v0 = vsel %vm3611_vm5, 0, %v3610_v55  ;;  %v1834_v18 = vshrl.u32 %v6774_v13, %v5394_v25  ;;  %v1855_v15 = vsel %vm1853_vm13, %v5420_v37, 2102212464  ;;  %v1800_v8 = vsub.s32 4, %v5400_v7 }
 0x345   : >> { %v1786_v12 = vsub.s32 32, %v1785_v0  ;;  %v1790_v10 = vsub.s32 4294967266, %v1785_v0  ;;  %v1787_v31 = vshll.u32 %v1778_v53, %v1785_v0  ;;  %vm1933_vm7 = vcmp.gt.s32.totalorder %v1932_v62, 0 }
 0x346   : >> { %v1934_v60 = vsel %vm1933_vm7, %v1932_v62, 0  ;;  %3921 = vcosq.f32 %v1698_v27  ;;  %v1876_v29 = vadd.s32 1, %v5475_v35  ;;  %v1929_v53 = vand.u32 8388607, %v6692_v34 }
 0x347   : >> { %v1788_v59 = vshrl.u32 %v1770_v51, %v1786_v12  ;;  %v1791_v6 = vadd.s32 127, %v1790_v10  ;;  %v1936_v9 = vand.u32 31, %v1934_v60  ;;  %v1854_v55 = vsel %vm1850_vm14, %v1834_v18, %v5416_v52 }
 0x348   : >> { %v1856_v54 = vsel %vm1852_vm15, %v5418_v11, %v1855_v15  ;;  %vm1875_vm10 = vc.u32 %v5483_v47, %v5474_v24  ;;  %v5524_v16 = vand.u32 3, %v1599_v57  ;;  %v1699_v38 = vsel %vm5467_vm3, 0, %v1697_v39 }
 0x349   : >> { %v1789_v21 = vor.u32 %v1788_v59, %v1787_v31  ;;  %v1792_v56 = vshll.u32 %v1791_v6, 23  ;;  %3923 = vsinq.f32 %v1698_v27  ;;  %v1937_v30 = vsub.s32 32, %v1936_v9 }
 0x34a   : >> { %v1801_v52 = vsel %vm1716_vm6, %v1800_v8, %v5400_v7  ;;  %v2029_v0 = vand.u32 2139095040, %v5487_v26  ;;  %v1857_v11 = vsel %vm1851_vm1, %v1854_v55, %v1856_v54  ;;  %v1877_v22 = vsel %vm1875_vm10, %v1876_v29, %v5475_v35 }
 0x34b   : >> { %v1793_v37 = vor.u32 4788187, %v1792_v56  ;;  %v1796_v50 = vcvt.s32.f32 %v1789_v21  ;;  %v1930_v57 = vor.u32 8388608, %v1929_v53  ;;  %v1940_v51 = vshrl.u32 %v6769_v42, %v1937_v30 }
 0x34c   : >> { %v1943_v12 = vshrl.u32 %v6770_v17, %v1937_v30  ;;  %v1946_v10 = vshrl.u32 %v6771_v41, %v1937_v30  ;;  %v1949_v39 = vshrl.u32 %v6772_v19, %v1937_v30  ;;  %v5539_v62 = vpop.eup %3917  ;;  %v1939_v7 = vshll.u32 %v6774_v13, %v1936_v9 }
 0x34d   : >> { %v1794_v61 = vand.u32 2147483647, %v1793_v37  ;;  %v1942_v27 = vshll.u32 %v6769_v42, %v1936_v9  ;;  %v1945_v45 = vshll.u32 %v6770_v17, %v1936_v9  ;;  %v1952_v35 = vshrl.u32 %v6773_v23, %v1937_v30  ;;  %v5546_v15 = vpop.eup %3919 }
 0x34e   : >> { %v1935_v59 = vshrl.u32 %v1934_v60, 5  ;;  %v1948_v6 = vshll.u32 %v6771_v41, %v1936_v9  ;;  %v2030_v18 = vshrl.u32 %v2029_v0, 23  ;;  %v1941_v21 = vor.u32 %v1940_v51, %v1939_v7 }
 0x34f   : >> { %v1797_v48 = vmul.f32 %v1796_v50, %v1794_v61  ;;  %v1944_v56 = vor.u32 %v1943_v12, %v1942_v27  ;;  %v1947_v8 = vor.u32 %v1946_v10, %v1945_v45  ;;  %v1951_v29 = vshll.u32 %v6772_v19, %v1936_v9 }
 0x350   : >> { %v1703_v53 = vadd.s32 3, %v1699_v38  ;;  %v1873_v55 = vmul.u32 %v5460_v32, %v1857_v11  ;;  %v1950_v54 = vor.u32 %v1949_v39, %v1948_v6  ;;  %v3922_v61 = vpop.eup %3921  ;;  %v1803_v50 = vsel %vm5512_vm9, 0, %v1801_v52 }
 0x351   : >> { %v1798_v31 = vxor.u32 2147483648, %v1797_v48  ;;  %v1953_v0 = vor.u32 %v1952_v35, %v1951_v29  ;;  %v1970_v51 = vshll.u32 %v1930_v57, 8  ;;  %vm1954_vm11 = vcmp.lt.s32.totalorder %v1935_v59, 1 }
 0x352   : >> { %v5557_v12 = vadd.s32 %v1877_v22, %v1873_v55  ;;  %vm1957_vm12 = vcmp.lt.s32.totalorder %v1935_v59, 4  ;;  %v3620_v9 = vadd.s32 4294967169, %v2030_v18  ;;  %vm1955_vm13 = vcmp.lt.s32.totalorder %v1935_v59, 2 }
 0x353   : >> { %v1799_v37 = vsel %vm1716_vm6, %v1798_v31, %v1797_v48  ;;  %v3924_v38 = vpop.eup %3923  ;;  %v1938_v48 = vshrl.u32 %v6774_v13, %v1937_v30  ;;  %v1959_v32 = vsel %vm1957_vm12, %v1947_v8, 2102212464  ;;  %v1962_v11 = vsel %vm1954_vm11, %v1941_v21, %v1944_v56 }
 0x354   : >> { %v1802_v60 = vsel %vm5512_vm9, %v5261_v40, %v1799_v37  ;;  %vm1956_vm14 = vcmp.lt.s32.totalorder %v1935_v59, 3  ;;  %v1963_v10 = vsel %vm1957_vm12, %v1950_v54, 920167782  ;;  %v1966_v39 = vsel %vm1954_vm11, %v1944_v56, %v1947_v8 }
 0x355   : >> { %3925 = vcosq.f32 %v1802_v60  ;;  %v1958_v25 = vsel %vm1954_vm11, %v1938_v48, %v1941_v21  ;;  %v1964_v52 = vsel %vm1956_vm14, %v1947_v8, %v1963_v10  ;;  %v1967_v7 = vsel %vm1957_vm12, %v1953_v0, 1326507024 }
 0x356   : >> { %3927 = vsinq.f32 %v1802_v60  ;;  %v1960_v57 = vsel %vm1956_vm14, %v1944_v56, %v1959_v32  ;;  %v1965_v22 = vsel %vm1955_vm13, %v1962_v11, %v1964_v52  ;;  %v1968_v27 = vsel %vm1956_vm14, %v1950_v54, %v1967_v7 }
 0x357   : >> { %v2036_v45 = vadd.s32 1, %v3620_v9  ;;  %v1704_v35 = vand.u32 3, %v1703_v53  ;;  %v1969_v31 = vsel %vm1955_vm13, %v1966_v39, %v1968_v27  ;;  %v1807_v18 = vadd.s32 3, %v1803_v50 }
 0x358   : >> { %v5562_v30 = vmul.u32.u64.low %v1970_v51, %v1965_v22  ;;  %v5563_v6 = vmul.u32.u64.high %v1970_v51, %v1965_v22, %v5562_v30  ;;  %v5566_v29 = vmul.u32.u64.low %v1970_v51, %v1969_v31  ;;  %v5567_v37 = vmul.u32.u64.high %v1970_v51, %v1969_v31, %v5566_v29 }
 0x359   : >> { %vm2037_vm15 = vcmp.gt.s32.totalorder %v2036_v45, 0  ;;  %v5571_v21 = vadd.f32 %v5186_v1, %v6808_v14  ;;  %v1961_v56 = vsel %vm1955_vm13, %v1958_v25, %v1960_v57  ;;  %v1707_v55 = vxor.u32 2147483648, %v3924_v38 }
 0x35a   : >> { %v2038_v8 = vsel %vm2037_vm15, %v2036_v45, 0  ;;  %v1710_v53 = vxor.u32 2147483648, %v3922_v61  ;;  %v1879_v54 = vadd.s32 536870912, %v5557_v12  ;;  %vm1605_vm0 = vcmp.eq.s32.totalorder %v5524_v16, 2 }
 0x35b   : >> { %v2040_v60 = vand.u32 31, %v2038_v8  ;;  %v1606_v50 = vxor.u32 2147483648, %v5539_v62  ;;  %vm1706_vm1 = vcmp.eq.s32.totalorder %v1704_v35, 0  ;;  %v1980_v0 = vadd.s32 1, %v5563_v6 }
 0x35c   : >> { %v1603_v9 = vxor.u32 2147483648, %v5546_v15  ;;  %v1808_v48 = vand.u32 3, %v1807_v18  ;;  %v1977_v1 = vmul.u32 %v1970_v51, %v1961_v56  ;;  %vm1979_vm2 = vc.u32 %v5567_v37, %v5562_v30 }
 0x35d   : >> { %vm1709_vm3 = vcmp.eq.s32.totalorder %v1704_v35, 2  ;;  %v1981_v59 = vsel %vm1979_vm2, %v1980_v0, %v5563_v6  ;;  %v6691_v32 = vand.u32 2147483647, %v5487_v26  ;;  %v2041_v11 = vsub.s32 32, %v2040_v60 }
 0x35e   : >> { %vm1702_vm4 = vweird.f32 %v5171_v28  ;;  %v1708_v39 = vsel %vm1706_vm1, %v3922_v61, %v1707_v55  ;;  %v1711_v25 = vsel %vm1709_vm3, %v1710_v53, %v3924_v38  ;;  %v5584_v52 = vshrl.u32 %v1879_v54, 30 }
 0x35f   : >> { %v3926_v10 = vpop.eup %3925  ;;  %v1982_v7 = vadd.s32 %v1981_v59, %v1977_v1  ;;  %vm1601_vm5 = vcmp.lt.s32.totalorder %v5524_v16, 2  ;;  %vm1602_vm6 = vcmp.eq.s32.totalorder %v5524_v16, 0  ;;  %v1607_v51 = vsel %vm1605_vm0, %v1606_v50, %v5546_v15 }
 0x360   : >> { %v3928_v57 = vpop.eup %3927  ;;  %vm1705_vm7 = vcmp.lt.s32.totalorder %v1704_v35, 2  ;;  %v1604_v22 = vsel %vm1602_vm6, %v5539_v62, %v1603_v9  ;;  %vm1810_vm9 = vcmp.eq.s32.totalorder %v1808_v48, 0  ;;  %vm1813_vm10 = vcmp.eq.s32.totalorder %v1808_v48, 2 }
 0x361   : >> { %v1983_v27 = vadd.s32 536870912, %v1982_v7  ;;  %v1712_v61 = vsel %vm1705_vm7, %v1708_v39, %v1711_v25  ;;  %v2033_v38 = vand.u32 8388607, %v6691_v32  ;;  %v2044_v45 = vshrl.u32 %v6769_v42, %v2041_v11 }
 0x362   : >> { %v2047_v31 = vshrl.u32 %v6770_v17, %v2041_v11  ;;  %v1811_v6 = vxor.u32 2147483648, %v3928_v57  ;;  %v1814_v18 = vxor.u32 2147483648, %v3926_v10  ;;  %v1881_v29 = vshll.u32 %v5584_v52, 30 }
 0x363   : >> { %v2050_v15 = vshrl.u32 %v6771_v41, %v2041_v11  ;;  %vm1806_vm11 = vweird.f32 %v5261_v40  ;;  %v2043_v62 = vshll.u32 %v6774_v13, %v2040_v60  ;;  %v2046_v35 = vshll.u32 %v6769_v42, %v2040_v60 }
 0x364   : >> { %v2052_v56 = vshll.u32 %v6771_v41, %v2040_v60  ;;  %v2053_v55 = vshrl.u32 %v6772_v19, %v2041_v11  ;;  %v5603_v53 = vshrl.u32 %v1983_v27, 30  ;;  %v2039_v54 = vshrl.u32 %v2038_v8, 5 }
 0x365   : >> { %v2049_v50 = vshll.u32 %v6770_v17, %v2040_v60  ;;  %v2056_v0 = vshrl.u32 %v6773_v23, %v2041_v11  ;;  %vm1598_vm12 = vweird.f32 %v5164_v20  ;;  %v2045_v9 = vor.u32 %v2044_v45, %v2043_v62 }
 0x366   : >> { %v2048_v1 = vor.u32 %v2047_v31, %v2046_v35  ;;  %v2054_v59 = vor.u32 %v2053_v55, %v2052_v56  ;;  %v2055_v39 = vshll.u32 %v6772_v19, %v2040_v60  ;;  %v1608_v25 = vsel %vm1601_vm5, %v1604_v22, %v1607_v51 }
 0x367   : >> { %v1812_v63 = vsel %vm1810_vm9, %v3926_v10, %v1811_v6  ;;  %v1815_v27 = vsel %vm1813_vm10, %v1814_v18, %v3928_v57  ;;  %v2051_v32 = vor.u32 %v2050_v15, %v2049_v50  ;;  %v1713_v8 = vsel %vm1702_vm4, nan, %v1712_v61 }
 0x368   : >> { %vm1809_vm13 = vcmp.lt.s32.totalorder %v1808_v48, 2  ;;  %v2034_v34 = vor.u32 8388608, %v2033_v38  ;;  %v2057_v58 = vor.u32 %v2056_v0, %v2055_v39  ;;  %v5616_v45 = vsub.s32 %v5557_v12, %v1881_v29 }
 0x369   : >> { %v1985_v31 = vshll.u32 %v5603_v53, 30  ;;  %vm2058_vm14 = vcmp.lt.s32.totalorder %v2039_v54, 1  ;;  %vm2061_vm15 = vcmp.lt.s32.totalorder %v2039_v54, 4  ;;  %v1816_v16 = vsel %vm1809_vm13, %v1812_v63, %v1815_v27 }
 0x36a   : >> { %vm2060_vm0 = vcmp.lt.s32.totalorder %v2039_v54, 3  ;;  %v2066_v60 = vsel %vm2058_vm14, %v2045_v9, %v2048_v1  ;;  %v2067_v10 = vsel %vm2061_vm15, %v2054_v59, 920167782  ;;  %v2042_v57 = vshrl.u32 %v6774_v13, %v2041_v11 }
 0x36b   : >> { %vm2059_vm1 = vcmp.lt.s32.totalorder %v2039_v54, 2  ;;  %v2063_v28 = vsel %vm2061_vm15, %v2051_v32, 2102212464  ;;  %v2068_v48 = vsel %vm2060_vm0, %v2051_v32, %v2067_v10  ;;  %v2070_v12 = vsel %vm2058_vm14, %v2048_v1, %v2051_v32 }
 0x36c   : >> { %v2069_v51 = vsel %vm2059_vm1, %v2066_v60, %v2068_v48  ;;  %v2071_v22 = vsel %vm2061_vm15, %v2057_v58, 1326507024  ;;  %v2074_v61 = vshll.u32 %v2034_v34, 8  ;;  %v1817_v38 = vsel %vm1806_vm11, nan, %v1816_v16 }
 0x36d   : >> { %v1884_v63 = vsub.s32 0, %v5616_v45  ;;  %v5627_v6 = vsub.s32 %v1982_v7, %v1985_v31  ;;  %v2062_v18 = vsel %vm2058_vm14, %v2042_v57, %v2045_v9  ;;  %v2064_v11 = vsel %vm2060_vm0, %v2048_v1, %v2063_v28 }
 0x36e   : >> { %v2072_v29 = vsel %vm2060_vm0, %v2054_v59, %v2071_v22  ;;  %v5632_v15 = vmul.u32.u64.low %v2074_v61, %v2069_v51  ;;  %v5633_v62 = vmul.u32.u64.high %v2074_v61, %v2069_v51, %v5632_v15  ;;  %v1609_v58 = vsel %vm1598_vm12, nan, %v1608_v25 }
 0x36f   : >> { %v2073_v40 = vsel %vm2059_vm1, %v2070_v12, %v2072_v29  ;;  %v2133_v34 = vand.u32 2139095040, %v5571_v21  ;;  %v3687_v35 = vpack.c.bf16 %v1817_v38, %v1609_v58  ;;  %v2065_v56 = vsel %vm2059_vm1, %v2062_v18, %v2064_v11 }
 0x370   : >> { %v5640_v32 = vmul.u32.u64.low %v2074_v61, %v2073_v40  ;;  %v5641_v7 = vmul.u32.u64.high %v2074_v61, %v2073_v40, %v5640_v32  ;;  %v3689_v50 = vpack.c.bf16 %v1713_v8, %v5369_v49  ;;  %v3613_v0 = vmin.u32 %v1884_v63, %v5616_v45 }
 0x371   : >> { %v2134_v55 = vshrl.u32 %v2133_v34, 23  ;;  %v1988_v9 = vsub.s32 0, %v5627_v6  ;;  %v2084_v20 = vadd.s32 1, %v5633_v62  ;;  %3688 = vmatprep.subr.bf16.mxu1 %v3687_v35  ;;  %v2081_v59 = vmul.u32 %v2074_v61, %v2065_v56 }
 0x372   : >> { %3690 = vmatpush1.bf16.msra.mxu1 %v3689_v50  ;;  %vm2083_vm2 = vc.u32 %v5641_v7, %v5632_v15  ;;  %v1886_v54 = vclz %v3613_v0  ;;  %v2130_v28 = vand.u32 2147483647, %v5571_v21  ;;  %vm1820_vm13 = vcmp.lt.s32.totalorder %v5334_v36, 0 }
 0x373   : >> { %v3624_v1 = vadd.s32 4294967169, %v2134_v55  ;;  %v2085_v39 = vsel %vm2083_vm2, %v2084_v20, %v5633_v62  ;;  %v3617_v25 = vmin.u32 %v1988_v9, %v5627_v6  ;;  %vm1924_vm15 = vcmp.lt.s32.totalorder %v5424_v33, 0 }
 0x374   : >> { %v2086_v27 = vadd.s32 %v2085_v39, %v2081_v59  ;;  %v3614_v16 = vadd.s32 4294967294, %v1886_v54  ;;  %v2137_v38 = vand.u32 8388607, %v2130_v28  ;;  %vm2028_vm0 = vcmp.lt.s32.totalorder %v5487_v26, 0 }
 0x375   : >> { %v2140_v49 = vadd.s32 1, %v3624_v1  ;;  %v1990_v60 = vclz %v3617_v25 }
 0x376   : >> { %v2087_v8 = vadd.s32 536870912, %v2086_v27  ;;  %vm3615_vm4 = vcmp.lt.s32.totalorder %v3614_v16, 0  ;;  %v2138_v54 = vor.u32 8388608, %v2137_v38 }
 0x377   : >> { %vm2141_vm3 = vcmp.gt.s32.totalorder %v2140_v49, 0  ;;  %v3618_v12 = vadd.s32 4294967294, %v1990_v60  ;;  %v5667_v40 = vsel %vm3615_vm4, 0, %v3614_v16  ;;  %vm2132_vm4 = vcmp.lt.s32.totalorder %v5571_v21, 0 }
 0x378   : >> { %v2142_v31 = vsel %vm2141_vm3, %v2140_v49, 0  ;;  %v5652_v10 = vshrl.u32 %v2087_v8, 30  ;;  %v1894_v59 = vsub.s32 4294967266, %v5667_v40 }
 0x379   : >> { %v2144_v57 = vand.u32 31, %v2142_v31  ;;  %v2143_v34 = vshrl.u32 %v2142_v31, 5  ;;  %vm3619_vm5 = vcmp.lt.s32.totalorder %v3618_v12, 0 }
 0x37a   : >> { %v2089_v48 = vshll.u32 %v5652_v10, 30  ;;  %v1993_v25 = vsel %vm3619_vm5, 0, %v3618_v12  ;;  %vm5762_vm5 = vcmp.le.f32.partialorder %v2130_v28, 0.7853982 }
 0x37b   : >> { %v2145_v51 = vsub.s32 32, %v2144_v57  ;;  %v2147_v29 = vshll.u32 %v6774_v13, %v2144_v57  ;;  %v2150_v62 = vshll.u32 %v6769_v42, %v2144_v57  ;;  %v2153_v32 = vshll.u32 %v6770_v17, %v2144_v57 }
 0x37c   : >> { %v5656_v22 = vsub.s32 %v2086_v27, %v2089_v48  ;;  %v2156_v35 = vshll.u32 %v6771_v41, %v2144_v57  ;;  %v2159_v20 = vshll.u32 %v6772_v19, %v2144_v57  ;;  %vm2162_vm6 = vcmp.lt.s32.totalorder %v2143_v34, 1 }
 0x37d   : >> { %v2148_v61 = vshrl.u32 %v6769_v42, %v2145_v51  ;;  %v2151_v63 = vshrl.u32 %v6770_v17, %v2145_v51  ;;  %v2154_v18 = vshrl.u32 %v6771_v41, %v2145_v51  ;;  %v2157_v58 = vshrl.u32 %v6772_v19, %v2145_v51 }
 0x37e   : >> { %v2092_v11 = vsub.s32 0, %v5656_v22  ;;  %v2160_v1 = vshrl.u32 %v6773_v23, %v2145_v51  ;;  %v2146_v27 = vshrl.u32 %v6774_v13, %v2145_v51  ;;  %vm2164_vm7 = vcmp.lt.s32.totalorder %v2143_v34, 3 }
 0x37f   : >> { %v2149_v55 = vor.u32 %v2148_v61, %v2147_v29  ;;  %v2152_v50 = vor.u32 %v2151_v63, %v2150_v62  ;;  %v2155_v0 = vor.u32 %v2154_v18, %v2153_v32  ;;  %v2158_v9 = vor.u32 %v2157_v58, %v2156_v35 }
 0x380   : >> { %v3621_v56 = vmin.u32 %v2092_v11, %v5656_v22  ;;  %v2161_v49 = vor.u32 %v2160_v1, %v2159_v20  ;;  %vm2165_vm9 = vcmp.lt.s32.totalorder %v2143_v34, 4  ;;  %vm2163_vm11 = vcmp.lt.s32.totalorder %v2143_v34, 2 }
 0x381   : >> { %v2170_v31 = vsel %vm2162_vm6, %v2149_v55, %v2152_v50  ;;  %v2167_v16 = vsel %vm2165_vm9, %v2155_v0, 2102212464  ;;  %v2171_v60 = vsel %vm2165_vm9, %v2158_v9, 920167782  ;;  %v2174_v57 = vsel %vm2162_vm6, %v2152_v50, %v2155_v0 }
 0x382   : >> { %v2094_v39 = vclz %v3621_v56  ;;  %v2175_v48 = vsel %vm2165_vm9, %v2161_v49, 1326507024  ;;  %v2172_v61 = vsel %vm2164_vm7, %v2155_v0, %v2171_v60  ;;  %v2178_v18 = vshll.u32 %v2138_v54, 8 }
 0x383   : >> { %v2176_v12 = vsel %vm2164_vm7, %v2158_v9, %v2175_v48  ;;  %v2173_v51 = vsel %vm2163_vm11, %v2170_v31, %v2172_v61  ;;  %v1998_v11 = vsub.s32 4294967266, %v1993_v25  ;;  %v2166_v62 = vsel %vm2162_vm6, %v2146_v27, %v2149_v55 }
 0x384   : >> { %v3622_v8 = vadd.s32 4294967294, %v2094_v39  ;;  %v2177_v63 = vsel %vm2163_vm11, %v2174_v57, %v2176_v12  ;;  %v2168_v58 = vsel %vm2164_vm7, %v2152_v50, %v2167_v16  ;;  %v1895_v1 = vadd.s32 127, %v1894_v59 }
 0x385   : >> { %v5682_v32 = vmul.u32.u64.low %v2178_v18, %v2177_v63  ;;  %v5683_v35 = vmul.u32.u64.high %v2178_v18, %v2177_v63, %v5682_v32  ;;  %v5685_v56 = vmul.u32.u64.low %v2178_v18, %v2173_v51  ;;  %v5686_v20 = vmul.u32.u64.high %v2178_v18, %v2173_v51, %v5685_v56 }
 0x386   : >> { %vm3623_vm10 = vcmp.lt.s32.totalorder %v3622_v8, 0  ;;  %v2169_v0 = vsel %vm2163_vm11, %v2166_v62, %v2168_v58  ;;  %v1999_v39 = vadd.s32 127, %v1998_v11  ;;  %v1890_v9 = vsub.s32 32, %v5667_v40 }
 0x387   : >> { %v2097_v38 = vsel %vm3623_vm10, 0, %v3622_v8  ;;  %vm2187_vm12 = vc.u32 %v5683_v35, %v5685_v56  ;;  %v2188_v54 = vadd.s32 1, %v5686_v20  ;;  %v1994_v8 = vsub.s32 32, %v1993_v25 }
 0x388   : >> { %v2102_v29 = vsub.s32 4294967266, %v2097_v38  ;;  %v2185_v55 = vmul.u32 %v2178_v18, %v2169_v0  ;;  %v1874_v34 = vadd.s32 %v5474_v24, %v5483_v47  ;;  %v1896_v50 = vshll.u32 %v1895_v1, 23 }
 0x389   : >> { %v2098_v27 = vsub.s32 32, %v2097_v38  ;;  %v2189_v31 = vsel %vm2187_vm12, %v2188_v54, %v5686_v20  ;;  %v1978_v59 = vadd.s32 %v5562_v30, %v5567_v37  ;;  %v2000_v16 = vshll.u32 %v1999_v39, 23 }
 0x38a   : >> { %v2103_v49 = vadd.s32 127, %v2102_v29  ;;  %v2190_v60 = vadd.s32 %v2189_v31, %v2185_v55  ;;  %v1892_v57 = vshrl.u32 %v1874_v34, %v1890_v9  ;;  %v2082_v48 = vadd.s32 %v5632_v15, %v5641_v7 }
 0x38b   : >> { %v1996_v12 = vshrl.u32 %v1978_v59, %v1994_v8  ;;  %v1891_v63 = vshll.u32 %v5616_v45, %v5667_v40  ;;  %v1897_v24 = vor.u32 4788187, %v1896_v50  ;;  %v1995_v18 = vshll.u32 %v5627_v6, %v1993_v25 }
 0x38c   : >> { %v2104_v61 = vshll.u32 %v2103_v49, 23  ;;  %v2191_v51 = vadd.s32 536870912, %v2190_v60  ;;  %v2100_v47 = vshrl.u32 %v2082_v48, %v2098_v27  ;;  %v2001_v11 = vor.u32 4788187, %v2000_v16 }
 0x38d   : >> { %v1893_v30 = vor.u32 %v1892_v57, %v1891_v63  ;;  %v2099_v37 = vshll.u32 %v5656_v22, %v2097_v38  ;;  %v1997_v58 = vor.u32 %v1996_v12, %v1995_v18  ;;  %v1898_v7 = vand.u32 2147483647, %v1897_v24 }
 0x38e   : >> { %v5701_v29 = vshrl.u32 %v2191_v51, 30  ;;  %v2105_v62 = vor.u32 4788187, %v2104_v61  ;;  %v2002_v20 = vand.u32 2147483647, %v2001_v11  ;;  %v2186_v59 = vadd.s32 %v5685_v56, %v5683_v35 }
 0x38f   : >> { %v2101_v32 = vor.u32 %v2100_v47, %v2099_v37  ;;  %v1900_v0 = vcvt.s32.f32 %v1893_v30  ;;  %v2004_v40 = vcvt.s32.f32 %v1997_v58  ;;  %v6811_v57 = vand.u32 2147483647, %v5334_v36 }
 0x390   : >> { %v2193_v15 = vshll.u32 %v5701_v29, 30  ;;  %v2106_v45 = vand.u32 2147483647, %v2105_v62  ;;  %v6814_v61 = vand.u32 2147483647, %v5424_v33  ;;  %v2112_v58 = vsub.s32 4, %v5652_v10 }
 0x391   : >> { %v1901_v9 = vmul.f32 %v1900_v0, %v1898_v7  ;;  %v2108_v6 = vcvt.s32.f32 %v2101_v32  ;;  %v2005_v25 = vmul.f32 %v2004_v40, %v2002_v20  ;;  %vm5715_vm1 = vcmp.le.f32.partialorder %v6811_v57, 0.7853982 }
 0x392   : >> { %v2194_v1 = vsub.s32 %v2190_v60, %v2193_v15  ;;  %vm5721_vm2 = vcmp.le.f32.partialorder %v6814_v61, 0.7853982  ;;  %v6817_v18 = vand.u32 2147483647, %v5487_v26  ;;  %v2008_v7 = vsub.s32 4, %v5603_v53 }
 0x393   : >> { %v2109_v54 = vmul.f32 %v2108_v6, %v2106_v45  ;;  %v1902_v55 = vxor.u32 2147483648, %v1901_v9  ;;  %v2006_v22 = vxor.u32 2147483648, %v2005_v25  ;;  %v1904_v32 = vsub.s32 4, %v5584_v52 }
 0x394   : >> { %v2196_v39 = vsub.s32 0, %v2194_v1  ;;  %vm5735_vm3 = vcmp.le.f32.partialorder %v6817_v18, 0.7853982  ;;  %v2113_v0 = vsel %vm2028_vm0, %v2112_v58, %v5652_v10  ;;  %v2216_v40 = vsub.s32 4, %v5701_v29 }
 0x395   : >> { %v2110_v34 = vxor.u32 2147483648, %v2109_v54  ;;  %v1903_v50 = vsel %vm1820_vm13, %v1902_v55, %v1901_v9  ;;  %v2007_v31 = vsel %vm1924_vm15, %v2006_v22, %v2005_v25  ;;  %v1905_v9 = vsel %vm1820_vm13, %v1904_v32, %v5584_v52 }
 0x396   : >> { %v3625_v49 = vmin.u32 %v2196_v39, %v2194_v1  ;;  %v1906_v35 = vsel %vm5715_vm1, %v5334_v36, %v1903_v50  ;;  %v2010_v47 = vsel %vm5721_vm2, %v5424_v33, %v2007_v31  ;;  %v2009_v39 = vsel %vm1924_vm15, %v2008_v7, %v5603_v53 }
 0x397   : >> { %v2111_v51 = vsel %vm2028_vm0, %v2110_v34, %v2109_v54  ;;  %3929 = vcosq.f32 %v1906_v35  ;;  %v2115_v25 = vsel %vm5735_vm3, 0, %v2113_v0  ;;  %v2011_v10 = vsel %vm5721_vm2, 0, %v2009_v39 }
 0x398   : >> { %v2198_v8 = vclz %v3625_v49  ;;  %v2114_v30 = vsel %vm5735_vm3, %v5487_v26, %v2111_v51  ;;  %3931 = vcosq.f32 %v2010_v47  ;;  %v2217_v54 = vsel %vm2132_vm4, %v2216_v40, %v5701_v29 }
 0x399   : >> { %3933 = vcosq.f32 %v2114_v30  ;;  %v1907_v52 = vsel %vm5715_vm1, 0, %v1905_v9  ;;  %v2015_v50 = vadd.s32 3, %v2011_v10  ;;  %v2219_v28 = vsel %vm5762_vm5, 0, %v2217_v54  ;;  %v6822_v54 = vld [vmem:[#allocation15_spill] sm:$0xff] }
 0x39a   : >> { %v3626_v38 = vadd.s32 4294967294, %v2198_v8  ;;  %3935 = vsinq.f32 %v2114_v30  ;;  %v1911_v31 = vadd.s32 3, %v1907_v52  ;;  %vm2118_vm2 = vweird.f32 %v5487_v26  ;;  %v6827_v52 = vld [vmem:[#allocation33_spill] sm:$0xff] }
 0x39b   : >> { %3937 = vsinq.f32 %v2010_v47  ;;  %v2016_v57 = vand.u32 3, %v2015_v50  ;;  %v6823_v26 = vmov 0.0  }
 0x39c   : >> { %vm3627_vm14 = vcmp.lt.s32.totalorder %v3626_v38, 0  ;;  %3939 = vsinq.f32 %v1906_v35  ;;  %v1912_v12 = vand.u32 3, %v1911_v31 }
 0x39d   : >> { %v2201_v27 = vsel %vm3627_vm14, 0, %v3626_v38  ;;  %v2119_v38 = vadd.s32 3, %v2115_v25  ;;  %vm2018_vm9 = vcmp.eq.s32.totalorder %v2016_v57, 0  ;;  %vm2021_vm10 = vcmp.eq.s32.totalorder %v2016_v57, 2 }
 0x39e   : >> { %v2202_v16 = vsub.s32 32, %v2201_v27  ;;  %v2206_v60 = vsub.s32 4294967266, %v2201_v27  ;;  %v2203_v56 = vshll.u32 %v2194_v1, %v2201_v27  ;;  %vm1914_vm11 = vcmp.eq.s32.totalorder %v1912_v12, 0 }
 0x39f   : >> { %vm1917_vm12 = vcmp.eq.s32.totalorder %v1912_v12, 2  ;;  %vm2017_vm14 = vcmp.lt.s32.totalorder %v2016_v57, 2  ;;  %vm1913_vm0 = vcmp.lt.s32.totalorder %v1912_v12, 2 }
 0x3a0   : >> { %v2204_v63 = vshrl.u32 %v2186_v59, %v2202_v16  ;;  %v2207_v24 = vadd.s32 127, %v2206_v60  ;;  %v2120_v16 = vand.u32 3, %v2119_v38  ;;  %v2223_v60 = vadd.s32 3, %v2219_v28 }
 0x3a1   : >> { %v3930_v8 = vpop.eup %3929 }
 0x3a2   : >> { %v2205_v37 = vor.u32 %v2204_v63, %v2203_v56  ;;  %v2208_v62 = vshll.u32 %v2207_v24, 23  ;;  %v3932_v22 = vpop.eup %3931  ;;  %v1918_v63 = vxor.u32 2147483648, %v3930_v8  ;;  %vm2122_vm6 = vcmp.eq.s32.totalorder %v2120_v16, 0 }
 0x3a3   : >> { %v3934_v34 = vpop.eup %3933  ;;  %v2022_v35 = vxor.u32 2147483648, %v3932_v22  ;;  %vm2125_vm7 = vcmp.eq.s32.totalorder %v2120_v16, 2  ;;  %v2224_v24 = vand.u32 3, %v2223_v60  ;;  %vm2121_vm13 = vcmp.lt.s32.totalorder %v2120_v16, 2 }
 0x3a4   : >> { %v2209_v15 = vor.u32 4788187, %v2208_v62  ;;  %v2212_v1 = vcvt.s32.f32 %v2205_v37  ;;  %v3936_v27 = vpop.eup %3935  ;;  %v2126_v61 = vxor.u32 2147483648, %v3934_v34 }
 0x3a5   : >> { %v3938_v29 = vpop.eup %3937  ;;  %v2123_v48 = vxor.u32 2147483648, %v3936_v27  ;;  %vm2229_vm15 = vcmp.eq.s32.totalorder %v2224_v24, 2  ;;  %vm2226_vm1 = vcmp.eq.s32.totalorder %v2224_v24, 0  ;;  %vm2225_vm3 = vcmp.lt.s32.totalorder %v2224_v24, 2 }
 0x3a6   : >> { %v2210_v20 = vand.u32 2147483647, %v2209_v15  ;;  %v3940_v59 = vpop.eup %3939  ;;  %v2019_v51 = vxor.u32 2147483648, %v3938_v29  ;;  %v2127_v18 = vsel %vm2125_vm7, %v2126_v61, %v3936_v27  ;;  %v2023_v37 = vsel %vm2021_vm10, %v2022_v35, %v3938_v29 }
 0x3a7   : >> { %v1915_v56 = vxor.u32 2147483648, %v3940_v59  ;;  %v2124_v47 = vsel %vm2122_vm6, %v3934_v34, %v2123_v48  ;;  %v1919_v15 = vsel %vm1917_vm12, %v1918_v63, %v3940_v59  ;;  %vm1910_vm6 = vweird.f32 %v5334_v36  ;;  %v6826_v36 = vld [vmem:[#allocation18_spill] sm:$0xff] }
 0x3a8   : >> { %v2213_v45 = vmul.f32 %v2212_v1, %v2210_v20  ;;  %v2020_v30 = vsel %vm2018_vm9, %v3932_v22, %v2019_v51  ;;  %v2128_v32 = vsel %vm2121_vm13, %v2124_v47, %v2127_v18  ;;  %v6828_v51 = vld [vmem:[#allocation38_spill] sm:$0xff] }
 0x3a9   : >> { %v1916_v58 = vsel %vm1914_vm11, %v3930_v8, %v1915_v56  ;;  %v2024_v1 = vsel %vm2017_vm14, %v2020_v30, %v2023_v37  ;;  %v2129_v39 = vsel %vm2118_vm2, nan, %v2128_v32  ;;  %v6824_v8 = vld [vmem:[#allocation16_spill] sm:$0xff] }
 0x3aa   : >> { %v2214_v6 = vxor.u32 2147483648, %v2213_v45 }
 0x3ac   : >> { %v2215_v53 = vsel %vm2132_vm4, %v2214_v6, %v2213_v45  ;;  %v1920_v45 = vsel %vm1913_vm0, %v1916_v58, %v1919_v15  ;;  %vm2014_vm4 = vweird.f32 %v5424_v33  ;;  %v6825_v33 = vld [vmem:[#allocation17_spill] sm:$0xff] }
 0x3ad   : >> { %v2218_v55 = vsel %vm5762_vm5, %v5571_v21, %v2215_v53  ;;  %vm2222_vm5 = vweird.f32 %v5571_v21  ;;  %v2025_v6 = vsel %vm2014_vm4, nan, %v2024_v1  ;;  %v1921_v10 = vsel %vm1910_vm6, nan, %v1920_v45 }
 0x3ae   : >> { %3941 = vcosq.f32 %v2218_v55  ;;  %v3693_v53 = vpack.c.bf16 %v2129_v39, %v1921_v10 }
 0x3af   : >> { %3943 = vsinq.f32 %v2218_v55 }
 0x3b8   : >> { %v3942_v11 = vpop.eup %3941 }
 0x3b9   : >> { %v3944_v62 = vpop.eup %3943  ;;  %v2230_v7 = vxor.u32 2147483648, %v3942_v11 }
 0x3ba   : >> { %v2227_v20 = vxor.u32 2147483648, %v3944_v62 }
 0x3bb   : >> { %v2231_v0 = vsel %vm2229_vm15, %v2230_v7, %v3944_v62 }
 0x3bc   : >> { %v2228_v40 = vsel %vm2226_vm1, %v3942_v11, %v2227_v20 }
 0x3bd   : >> { %v2232_v9 = vsel %vm2225_vm3, %v2228_v40, %v2231_v0 }
 0x3be   : >> { %v2233_v25 = vsel %vm2222_vm5, nan, %v2232_v9 }
 0x3bf   : >> { %v3691_v49 = vpack.c.bf16 %v2233_v25, %v2025_v6 }
 0x3c1   : >> { %3692 = vmatprep.subr.bf16.mxu1 %v3691_v49 }
 0x3c2   : >> { %3694 = vmatpush1.bf16.msra.mxu1 %v3693_v53 }
 0x3c5   : >> { %3628 = vmatmul.mubr.msk.f32.vlgmr.msra.gmra.mrb[0].mxu1 %vm1300_vm8, %v6822_v54 }
 0x3c6   : >> { %2316 = vmatprep.mubr.f32.mxu1 %v6823_v26 }
 0x3c9   : >> { %3629 = vmatmul.mubr.msk.f32.gmra.mrb[2].mxu1 %vm1300_vm8, %v6824_v8 }
 0x3ca   : >> { %2322 = vmatprep.mubr.f32.mxu1 %v6823_v26 }
 0x3cd   : >> { %3630 = vmatmul.mubr.msk.f32.gmra.mrb[4].mxu1 %vm1300_vm8, %v6825_v33 }
 0x3ce   : >> { %2328 = vmatprep.mubr.f32.mxu1 %v6823_v26 }
 0x3d1   : >> { %3631 = vmatmul.mubr.msk.f32.gmra.mrb[6].mxu1 %vm1300_vm8, %v6826_v36 }
 0x498   : >> { %v2312_v21 = vpop.f32.mrb[0].mxu1 }
 0x499   : >> { %v5790_v55 = vadd.f32 %v2312_v21, %v6827_v52  ;;  %v2314_v22 = vpop.f32.mrb[1].mxu1 }
 0x49a   : >> { %v5793_v38 = vadd.f32 %v2314_v22, %v6827_v52 }
 0x49b   : >> { %v2335_v34 = vand.u32 2147483647, %v5790_v55  ;;  %v2338_v50 = vand.u32 2139095040, %v5790_v55 }
 0x49c   : >> { %v2318_v28 = vpop.f32.mrb[2].mxu1  ;;  %v2442_v27 = vand.u32 2139095040, %v5793_v38 }
 0x49d   : >> { %v5798_v31 = vpop.f32.mrb[3].mxu1  ;;  %v2339_v29 = vshrl.u32 %v2338_v50, 23  ;;  %v2342_v60 = vand.u32 8388607, %v2335_v34  ;;  %v5807_v35 = vadd.f32 %v2318_v28, %v6828_v51 }
 0x49e   : >> { %v2443_v59 = vshrl.u32 %v2442_v27, 23 }
 0x49f   : >> { %v3632_v16 = vadd.s32 4294967169, %v2339_v29  ;;  %v2343_v56 = vor.u32 8388608, %v2342_v60  ;;  %v2546_v62 = vand.u32 2139095040, %v5807_v35 }
 0x4a0   : >> { %v5802_v57 = vpop.f32.mrb[4].mxu1  ;;  %v3636_v48 = vadd.s32 4294967169, %v2443_v59 }
 0x4a1   : >> { %v5804_v61 = vpop.f32.mrb[5].mxu1  ;;  %v2345_v12 = vadd.s32 1, %v3632_v16  ;;  %v2383_v37 = vshll.u32 %v2343_v56, 8  ;;  %v2547_v36 = vshrl.u32 %v2546_v62, 23 }
 0x4a2   : >> { %v2449_v47 = vadd.s32 1, %v3636_v48 }
 0x4a3   : >> { %vm2346_vm8 = vcmp.gt.s32.totalorder %v2345_v12, 0 }
 0x4a4   : >> { %v5809_v63 = vpop.f32.mrb[6].mxu1  ;;  %v2347_v24 = vsel %vm2346_vm8, %v2345_v12, 0  ;;  %vm2450_vm7 = vcmp.gt.s32.totalorder %v2449_v47, 0 }
 0x4a5   : >> { %v5811_v18 = vpop.f32.mrb[7].mxu1  ;;  %v2349_v11 = vand.u32 31, %v2347_v24  ;;  %v2348_v58 = vshrl.u32 %v2347_v24, 5  ;;  %v2451_v49 = vsel %vm2450_vm7, %v2449_v47, 0  ;;  %vm2337_vm7 = vcmp.lt.s32.totalorder %v5790_v55, 0 }
 0x4a6   : >> { %v2453_v29 = vand.u32 31, %v2451_v49 }
 0x4a7   : >> { %v2350_v30 = vsub.s32 32, %v2349_v11  ;;  %v2352_v15 = vshll.u32 %v6774_v13, %v2349_v11  ;;  %v2355_v7 = vshll.u32 %v6769_v42, %v2349_v11  ;;  %v2358_v1 = vshll.u32 %v6770_v17, %v2349_v11 }
 0x4a8   : >> { %v2361_v45 = vshll.u32 %v6771_v41, %v2349_v11  ;;  %v2364_v39 = vshll.u32 %v6772_v19, %v2349_v11  ;;  %vm2367_vm9 = vcmp.lt.s32.totalorder %v2348_v58, 1  ;;  %vm2370_vm10 = vcmp.lt.s32.totalorder %v2348_v58, 4 }
 0x4a9   : >> { %v2353_v32 = vshrl.u32 %v6769_v42, %v2350_v30  ;;  %v2356_v20 = vshrl.u32 %v6770_v17, %v2350_v30  ;;  %v2359_v0 = vshrl.u32 %v6771_v41, %v2350_v30  ;;  %v2362_v40 = vshrl.u32 %v6772_v19, %v2350_v30 }
 0x4aa   : >> { %v2365_v9 = vshrl.u32 %v6773_v23, %v2350_v30  ;;  %v2351_v21 = vshrl.u32 %v6774_v13, %v2350_v30  ;;  %vm2369_vm11 = vcmp.lt.s32.totalorder %v2348_v58, 3  ;;  %vm2368_vm12 = vcmp.lt.s32.totalorder %v2348_v58, 2 }
 0x4ab   : >> { %v2354_v6 = vor.u32 %v2353_v32, %v2352_v15  ;;  %v2357_v25 = vor.u32 %v2356_v20, %v2355_v7  ;;  %v2360_v10 = vor.u32 %v2359_v0, %v2358_v1  ;;  %v2363_v53 = vor.u32 %v2362_v40, %v2361_v45 }
 0x4ac   : >> { %v2366_v54 = vor.u32 %v2365_v9, %v2364_v39  ;;  %v5835_v62 = vsub.s32 32, %v2453_v29  ;;  %v3640_v58 = vadd.s32 4294967169, %v2547_v36  ;;  %v6694_v7 = vand.u32 2147483647, %v5793_v38 }
 0x4ad   : >> { %v2372_v26 = vsel %vm2370_vm10, %v2360_v10, 2102212464  ;;  %v2375_v8 = vsel %vm2367_vm9, %v2354_v6, %v2357_v25  ;;  %v2379_v33 = vsel %vm2367_vm9, %v2357_v25, %v2360_v10  ;;  %v2376_v22 = vsel %vm2370_vm10, %v2363_v53, 920167782 }
 0x4ae   : >> { %v2380_v50 = vsel %vm2370_vm10, %v2366_v54, 1326507024  ;;  %v2377_v28 = vsel %vm2369_vm11, %v2360_v10, %v2376_v22  ;;  %v2371_v59 = vsel %vm2367_vm9, %v2351_v21, %v2354_v6  ;;  %v2373_v16 = vsel %vm2369_vm11, %v2357_v25, %v2372_v26 }
 0x4af   : >> { %v2381_v27 = vsel %vm2369_vm11, %v2363_v53, %v2380_v50  ;;  %v2378_v60 = vsel %vm2368_vm12, %v2375_v8, %v2377_v28  ;;  %v2374_v11 = vsel %vm2368_vm12, %v2371_v59, %v2373_v16  ;;  %v2466_v1 = vshrl.u32 %v6772_v19, %v5835_v62 }
 0x4b0   : >> { %v2382_v48 = vsel %vm2368_vm12, %v2379_v33, %v2381_v27  ;;  %v5828_v24 = vmul.u32.u64.low %v2383_v37, %v2378_v60  ;;  %v5829_v47 = vmul.u32.u64.high %v2383_v37, %v2378_v60, %v5828_v24  ;;  %v2390_v15 = vmul.u32 %v2383_v37, %v2374_v11 }
 0x4b1   : >> { %v5825_v12 = vmul.u32.u64.low %v2383_v37, %v2382_v48  ;;  %v5826_v56 = vmul.u32.u64.high %v2383_v37, %v2382_v48, %v5825_v12  ;;  %v2553_v0 = vadd.s32 1, %v3640_v58  ;;  %v2446_v40 = vand.u32 8388607, %v6694_v7 }
 0x4b2   : >> { %v2393_v30 = vadd.s32 1, %v5829_v47  ;;  %v6695_v39 = vand.u32 2147483647, %v5807_v35  ;;  %v2457_v9 = vshrl.u32 %v6769_v42, %v5835_v62  ;;  %v2460_v37 = vshrl.u32 %v6770_v17, %v5835_v62 }
 0x4b3   : >> { %vm2392_vm13 = vc.u32 %v5826_v56, %v5828_v24  ;;  %v2465_v6 = vshll.u32 %v6771_v41, %v2453_v29  ;;  %vm2554_vm14 = vcmp.gt.s32.totalorder %v2553_v0, 0  ;;  %v5851_v10 = vshrl.u32 %v2451_v49, 5 }
 0x4b4   : >> { %v2394_v32 = vsel %vm2392_vm13, %v2393_v30, %v5829_v47  ;;  %v2463_v53 = vshrl.u32 %v6771_v41, %v5835_v62  ;;  %v2555_v54 = vsel %vm2554_vm14, %v2553_v0, 0  ;;  %v2456_v26 = vshll.u32 %v6774_v13, %v2453_v29 }
 0x4b5   : >> { %v2395_v20 = vadd.s32 %v2394_v32, %v2390_v15  ;;  %v2459_v8 = vshll.u32 %v6769_v42, %v2453_v29  ;;  %v2467_v33 = vor.u32 %v2466_v1, %v2465_v6  ;;  %v2557_v36 = vand.u32 31, %v2555_v54 }
 0x4b6   : >> { %v2447_v22 = vor.u32 8388608, %v2446_v40  ;;  %v2462_v50 = vshll.u32 %v6770_v17, %v2453_v29  ;;  %v2469_v28 = vshrl.u32 %v6773_v23, %v5835_v62  ;;  %v5863_v49 = vadd.f32 %v5798_v31, %v6828_v51 }
 0x4b7   : >> { %v2396_v45 = vadd.s32 536870912, %v2395_v20  ;;  %v5865_v27 = vor.u32 %v2457_v9, %v2456_v26  ;;  %v5867_v59 = vor.u32 %v2460_v37, %v2459_v8  ;;  %v2550_v16 = vand.u32 8388607, %v6695_v39 }
 0x4b8   : >> { %v5871_v48 = vor.u32 %v2463_v53, %v2462_v50  ;;  %v2468_v12 = vshll.u32 %v6772_v19, %v2453_v29  ;;  %vm2474_vm15 = vcmp.lt.s32.totalorder %v5851_v10, 4  ;;  %v5877_v11 = vsub.s32 32, %v2557_v36 }
 0x4b9   : >> { %v5849_v25 = vshrl.u32 %v2396_v45, 30  ;;  %v2480_v47 = vsel %vm2474_vm15, %v2467_v33, 920167782  ;;  %v5879_v58 = vshll.u32 %v2447_v22, 8  ;;  %vm2471_vm0 = vcmp.lt.s32.totalorder %v5851_v10, 1 }
 0x4ba   : >> { %v2470_v30 = vor.u32 %v2469_v28, %v2468_v12  ;;  %vm2473_vm1 = vcmp.lt.s32.totalorder %v5851_v10, 3  ;;  %v2551_v15 = vor.u32 8388608, %v2550_v16  ;;  %v2650_v32 = vand.u32 2139095040, %v5863_v49 }
 0x4bb   : >> { %v2398_v21 = vshll.u32 %v5849_v25, 30  ;;  %vm2472_vm2 = vcmp.lt.s32.totalorder %v5851_v10, 2  ;;  %v2479_v29 = vsel %vm2471_vm0, %v5865_v27, %v5867_v59  ;;  %v2481_v1 = vsel %vm2473_vm1, %v5871_v48, %v2480_v47 }
 0x4bc   : >> { %v2561_v0 = vshrl.u32 %v6769_v42, %v5877_v11  ;;  %v2564_v45 = vshrl.u32 %v6770_v17, %v5877_v11  ;;  %v2567_v40 = vshrl.u32 %v6771_v41, %v5877_v11  ;;  %v2570_v9 = vshrl.u32 %v6772_v19, %v5877_v11 }
 0x4bd   : >> { %v2399_v60 = vsub.s32 %v2395_v20, %v2398_v21  ;;  %v2484_v6 = vsel %vm2474_vm15, %v2470_v30, 1326507024  ;;  %v5902_v53 = vshrl.u32 %v2555_v54, 5  ;;  %v2573_v26 = vshrl.u32 %v6773_v23, %v5877_v11 }
 0x4be   : >> { %v2560_v8 = vshll.u32 %v6774_v13, %v2557_v36  ;;  %v2563_v21 = vshll.u32 %v6769_v42, %v2557_v36  ;;  %v2566_v22 = vshll.u32 %v6770_v17, %v2557_v36  ;;  %v2569_v50 = vshll.u32 %v6771_v41, %v2557_v36 }
 0x4bf   : >> { %v2401_v31 = vsub.s32 0, %v2399_v60  ;;  %v2391_v28 = vadd.s32 %v5828_v24, %v5826_v56  ;;  %v2482_v12 = vsel %vm2472_vm2, %v2479_v29, %v2481_v1  ;;  %v2572_v54 = vshll.u32 %v6772_v19, %v2557_v36 }
 0x4c0   : >> { %v2562_v47 = vor.u32 %v2561_v0, %v2560_v8  ;;  %v2568_v30 = vor.u32 %v2567_v40, %v2566_v22  ;;  %v2483_v7 = vsel %vm2471_vm0, %v5867_v59, %v5871_v48  ;;  %v2485_v39 = vsel %vm2473_vm1, %v2467_v33, %v2484_v6 }
 0x4c1   : >> { %v3633_v20 = vmin.u32 %v2401_v31, %v2399_v60  ;;  %v2565_v31 = vor.u32 %v2564_v45, %v2563_v21  ;;  %v2574_v56 = vor.u32 %v2573_v26, %v2572_v54  ;;  %vm2575_vm4 = vcmp.lt.s32.totalorder %v5902_v53, 1 }
 0x4c2   : >> { %vm2577_vm5 = vcmp.lt.s32.totalorder %v5902_v53, 3  ;;  %vm2578_vm6 = vcmp.lt.s32.totalorder %v5902_v53, 4  ;;  %vm2576_vm8 = vcmp.lt.s32.totalorder %v5902_v53, 2  ;;  %v2591_v21 = vshll.u32 %v2551_v15, 8 }
 0x4c3   : >> { %v2403_v37 = vclz %v3633_v20  ;;  %v2571_v20 = vor.u32 %v2570_v9, %v2569_v50  ;;  %v2583_v45 = vsel %vm2575_vm4, %v2562_v47, %v2565_v31  ;;  %v2587_v40 = vsel %vm2575_vm4, %v2565_v31, %v2568_v30 }
 0x4c4   : >> { %v2588_v8 = vsel %vm2578_vm6, %v2574_v56, 1326507024  ;;  %v2651_v22 = vshrl.u32 %v2650_v32, 23  ;;  %v2421_v15 = vsub.s32 4, %v5849_v25  ;;  %vm5972_vm9 = vcmp.le.f32.partialorder %v2335_v34, 0.7853982 }
 0x4c5   : >> { %v3634_v16 = vadd.s32 4294967294, %v2403_v37  ;;  %v5922_v37 = vmul.u32.u64.low %v5879_v58, %v2482_v12  ;;  %v5923_v29 = vmul.u32.u64.high %v5879_v58, %v2482_v12, %v5922_v37  ;;  %v2584_v33 = vsel %vm2578_vm6, %v2571_v20, 920167782 }
 0x4c6   : >> { %v2585_v26 = vsel %vm2577_vm5, %v2568_v30, %v2584_v33  ;;  %v2580_v33 = vsel %vm2578_vm6, %v2568_v30, 2102212464  ;;  %v2422_v30 = vsel %vm2337_vm7, %v2421_v15, %v5849_v25  ;;  %v6696_v15 = vand.u32 2147483647, %v5863_v49 }
 0x4c7   : >> { %vm3635_vm3 = vcmp.lt.s32.totalorder %v3634_v16, 0  ;;  %v2586_v12 = vsel %vm2576_vm8, %v2583_v45, %v2585_v26  ;;  %v2476_v26 = vsel %vm2474_vm15, %v5871_v48, 2102212464  ;;  %v2497_v25 = vadd.s32 1, %v5923_v29 }
 0x4c8   : >> { %v2406_v24 = vsel %vm3635_vm3, 0, %v3634_v16  ;;  %vm2427_vm3 = vweird.f32 %v5790_v55 }
 0x4c9   : >> { %v2407_v36 = vsub.s32 32, %v2406_v24  ;;  %v2411_v1 = vsub.s32 4294967266, %v2406_v24  ;;  %v2408_v0 = vshll.u32 %v2399_v60, %v2406_v24  ;;  %v2486_v60 = vsel %vm2472_vm2, %v2483_v7, %v2485_v39 }
 0x4ca   : >> { %v5948_v24 = vmul.u32.u64.low %v2591_v21, %v2586_v12  ;;  %v5949_v56 = vmul.u32.u64.high %v2591_v21, %v2586_v12, %v5948_v24 }
 0x4cb   : >> { %v2409_v9 = vshrl.u32 %v2391_v28, %v2407_v36  ;;  %v2412_v6 = vadd.s32 127, %v2411_v1  ;;  %v2589_v28 = vsel %vm2577_vm5, %v2571_v20, %v2588_v8 }
 0x4cc   : >> { %v2590_v54 = vsel %vm2576_vm8, %v2587_v40, %v2589_v28  ;;  %v5957_v32 = vmul.u32.u64.low %v5879_v58, %v2486_v60  ;;  %v5958_v1 = vmul.u32.u64.high %v5879_v58, %v2486_v60, %v5957_v32  ;;  %v2559_v40 = vshrl.u32 %v6774_v13, %v5877_v11 }
 0x4cd   : >> { %v2410_v50 = vor.u32 %v2409_v9, %v2408_v0  ;;  %v2413_v16 = vshll.u32 %v2412_v6, 23  ;;  %v5952_v39 = vmul.u32.u64.low %v2591_v21, %v2590_v54  ;;  %v5953_v36 = vmul.u32.u64.high %v2591_v21, %v2590_v54, %v5952_v39 }
 0x4ce   : >> { %v3644_v0 = vadd.s32 4294967169, %v2651_v22  ;;  %v2455_v6 = vshrl.u32 %v6774_v13, %v5835_v62  ;;  %v2579_v11 = vsel %vm2575_vm4, %v2559_v40, %v2562_v47  ;;  %v2581_v62 = vsel %vm2577_vm5, %v2565_v31, %v2580_v33  ;;  %v6831_v33 = vld [vmem:[#allocation35_spill] sm:$0xff] }
 0x4cf   : >> { %v2414_v7 = vor.u32 4788187, %v2413_v16  ;;  %v2417_v20 = vcvt.s32.f32 %v2410_v50  ;;  %v2601_v34 = vadd.s32 1, %v5949_v56  ;;  %v2477_v50 = vsel %vm2473_vm1, %v5867_v59, %v2476_v26 }
 0x4d0   : >> { %v2657_v8 = vadd.s32 1, %v3644_v0  ;;  %v2475_v48 = vsel %vm2471_vm0, %v2455_v6, %v5865_v27  ;;  %vm2600_vm11 = vc.u32 %v5953_v36, %v5948_v24  ;;  %v2424_v16 = vsel %vm5972_vm9, 0, %v2422_v30 }
 0x4d1   : >> { %v2415_v45 = vand.u32 2147483647, %v2414_v7  ;;  %v2582_v27 = vsel %vm2576_vm8, %v2579_v11, %v2581_v62  ;;  %vm2496_vm12 = vc.u32 %v5958_v1, %v5922_v37  ;;  %v2478_v28 = vsel %vm2472_vm2, %v2475_v48, %v2477_v50 }
 0x4d2   : >> { %vm2658_vm10 = vcmp.gt.s32.totalorder %v2657_v8, 0  ;;  %v2602_v54 = vsel %vm2600_vm11, %v2601_v34, %v5949_v56  ;;  %v2428_v39 = vadd.s32 3, %v2424_v16  ;;  %v2598_v53 = vmul.u32 %v2591_v21, %v2582_v27 }
 0x4d3   : >> { %v2418_v9 = vmul.f32 %v2417_v20, %v2415_v45  ;;  %v2659_v47 = vsel %vm2658_vm10, %v2657_v8, 0  ;;  %v2498_v32 = vsel %vm2496_vm12, %v2497_v25, %v5923_v29  ;;  %v2494_v0 = vmul.u32 %v5879_v58, %v2478_v28 }
 0x4d4   : >> { %v2661_v12 = vand.u32 31, %v2659_v47  ;;  %v2603_v45 = vadd.s32 %v2602_v54, %v2598_v53  ;;  %v6016_v10 = vadd.f32 %v5802_v57, %v6831_v33  ;;  %v2429_v56 = vand.u32 3, %v2428_v39 }
 0x4d5   : >> { %v2419_v22 = vxor.u32 2147483648, %v2418_v9  ;;  %v6018_v40 = vadd.s32 %v2498_v32, %v2494_v0  ;;  %v2654_v21 = vand.u32 8388607, %v6696_v15  ;;  %v6029_v57 = vshrl.u32 %v2659_v47, 5 }
 0x4d6   : >> { %v6007_v7 = vsub.s32 32, %v2661_v12  ;;  %v2673_v6 = vshll.u32 %v6771_v41, %v2661_v12  ;;  %v2604_v26 = vadd.s32 536870912, %v2603_v45  ;;  %v2664_v8 = vshll.u32 %v6774_v13, %v2661_v12 }
 0x4d7   : >> { %v2420_v31 = vsel %vm2337_vm7, %v2419_v22, %v2418_v9  ;;  %v2667_v30 = vshll.u32 %v6769_v42, %v2661_v12  ;;  %v2670_v11 = vshll.u32 %v6770_v17, %v2661_v12  ;;  %v2676_v22 = vshll.u32 %v6772_v19, %v2661_v12 }
 0x4d8   : >> { %v2423_v59 = vsel %vm5972_vm9, %v5790_v55, %v2420_v31  ;;  %v2674_v20 = vshrl.u32 %v6772_v19, %v6007_v7  ;;  %v2665_v9 = vshrl.u32 %v6769_v42, %v6007_v7  ;;  %v2668_v58 = vshrl.u32 %v6770_v17, %v6007_v7 }
 0x4d9   : >> { %3945 = vcosq.f32 %v2423_v59  ;;  %v2671_v29 = vshrl.u32 %v6771_v41, %v6007_v7  ;;  %v2677_v60 = vshrl.u32 %v6773_v23, %v6007_v7  ;;  %vm2430_vm13 = vcmp.lt.s32.totalorder %v2429_v56, 2 }
 0x4da   : >> { %3947 = vsinq.f32 %v2423_v59  ;;  %v2675_v62 = vor.u32 %v2674_v20, %v2673_v6  ;;  %v2500_v48 = vadd.s32 536870912, %v6018_v40  ;;  %v2754_v34 = vand.u32 2139095040, %v6016_v10 }
 0x4db   : >> { %v2666_v25 = vor.u32 %v2665_v9, %v2664_v8  ;;  %v2669_v47 = vor.u32 %v2668_v58, %v2667_v30  ;;  %v2672_v31 = vor.u32 %v2671_v29, %v2670_v11  ;;  %v2678_v16 = vor.u32 %v2677_v60, %v2676_v22 }
 0x4dc   : >> { %vm2431_vm14 = vcmp.eq.s32.totalorder %v2429_v56, 0  ;;  %v6039_v28 = vshrl.u32 %v2604_v26, 30  ;;  %vm2682_vm15 = vcmp.lt.s32.totalorder %v6029_v57, 4  ;;  %vm2434_vm0 = vcmp.eq.s32.totalorder %v2429_v56, 2 }
 0x4dd   : >> { %v2655_v12 = vor.u32 8388608, %v2654_v21  ;;  %v2688_v39 = vsel %vm2682_vm15, %v2675_v62, 920167782  ;;  %vm2679_vm1 = vcmp.lt.s32.totalorder %v6029_v57, 1  ;;  %vm2681_vm2 = vcmp.lt.s32.totalorder %v6029_v57, 3 }
 0x4de   : >> { %v2755_v32 = vshrl.u32 %v2754_v34, 23  ;;  %v2687_v20 = vsel %vm2679_vm1, %v2666_v25, %v2669_v47  ;;  %v2689_v9 = vsel %vm2681_vm2, %v2672_v31, %v2688_v39  ;;  %v2692_v58 = vsel %vm2682_vm15, %v2678_v16, 1326507024 }
 0x4df   : >> { %v2606_v29 = vshll.u32 %v6039_v28, 30  ;;  %vm2680_vm4 = vcmp.lt.s32.totalorder %v6029_v57, 2  ;;  %v2691_v8 = vsel %vm2679_vm1, %v2669_v47, %v2672_v31  ;;  %v2693_v60 = vsel %vm2681_vm2, %v2675_v62, %v2692_v58 }
 0x4e0   : >> { %v2690_v26 = vsel %vm2680_vm4, %v2687_v20, %v2689_v9  ;;  %v3648_v30 = vadd.s32 4294967169, %v2755_v32  ;;  %v6064_v11 = vshrl.u32 %v2500_v48, 30  ;;  %v2695_v55 = vshll.u32 %v2655_v12, 8 }
 0x4e1   : >> { %v6066_v56 = vsub.s32 %v2603_v45, %v2606_v29  ;;  %v2694_v34 = vsel %vm2680_vm4, %v2691_v8, %v2693_v60  ;;  %v2684_v45 = vsel %vm2682_vm15, %v2672_v31, 2102212464  ;;  %v6697_v12 = vand.u32 2147483647, %v6016_v10 }
 0x4e2   : >> { %v2761_v22 = vadd.s32 1, %v3648_v30  ;;  %v2663_v39 = vshrl.u32 %v6774_v13, %v6007_v7  ;;  %v2685_v9 = vsel %vm2681_vm2, %v2669_v47, %v2684_v45  ;;  %v6111_v15 = vadd.f32 %v5804_v61, %v6831_v33 }
 0x4e3   : >> { %v3946_v50 = vpop.eup %3945 }
 0x4e4   : >> { %v3948_v27 = vpop.eup %3947  ;;  %v2435_v59 = vxor.u32 2147483648, %v3946_v50  ;;  %vm2762_vm5 = vcmp.gt.s32.totalorder %v2761_v22, 0  ;;  %v2683_v20 = vsel %vm2679_vm1, %v2663_v39, %v2666_v25 }
 0x4e5   : >> { %v2432_v54 = vxor.u32 2147483648, %v3948_v27  ;;  %v2763_v48 = vsel %vm2762_vm5, %v2761_v22, 0 }
 0x4e6   : >> { %v2436_v53 = vsel %vm2434_vm0, %v2435_v59, %v3948_v27  ;;  %v2502_v27 = vshll.u32 %v6064_v11, 30  ;;  %v2609_v59 = vsub.s32 0, %v6066_v56  ;;  %v2764_v29 = vshrl.u32 %v2763_v48, 5 }
 0x4e7   : >> { %v2433_v0 = vsel %vm2431_vm14, %v3946_v50, %v2432_v54  ;;  %v6070_v50 = vmul.u32.u64.low %v2695_v55, %v2690_v26  ;;  %v6071_v16 = vmul.u32.u64.high %v2695_v55, %v2690_v26, %v6070_v50 }
 0x4e8   : >> { %v2437_v21 = vsel %vm2430_vm13, %v2433_v0, %v2436_v53  ;;  %v6076_v62 = vmul.u32.u64.low %v2695_v55, %v2694_v34  ;;  %v6077_v54 = vmul.u32.u64.high %v2695_v55, %v2694_v34, %v6076_v62  ;;  %v2765_v53 = vand.u32 31, %v2763_v48 }
 0x4e9   : >> { %v6055_v6 = vsel %vm2427_vm3, nan, %v2437_v21  ;;  %v6085_v32 = vsub.s32 %v6018_v40, %v2502_v27  ;;  %v3641_v0 = vmin.u32 %v2609_v59, %v6066_v56  ;;  %v2705_v31 = vadd.s32 1, %v6071_v16 }
 0x4ea   : >> { %v2766_v58 = vsub.s32 32, %v2765_v53  ;;  %v2758_v21 = vand.u32 8388607, %v6697_v12  ;;  %v2768_v7 = vshll.u32 %v6774_v13, %v2765_v53  ;;  %v2771_v26 = vshll.u32 %v6769_v42, %v2765_v53 }
 0x4eb   : >> { %v2774_v25 = vshll.u32 %v6770_v17, %v2765_v53  ;;  %v2777_v47 = vshll.u32 %v6771_v41, %v2765_v53  ;;  %v2686_v34 = vsel %vm2680_vm4, %v2683_v20, %v2685_v9  ;;  %vm2704_vm6 = vc.u32 %v6077_v54, %v6070_v50 }
 0x4ec   : >> { %v2769_v40 = vshrl.u32 %v6769_v42, %v2766_v58  ;;  %v2772_v8 = vshrl.u32 %v6770_v17, %v2766_v58  ;;  %v2775_v60 = vshrl.u32 %v6771_v41, %v2766_v58  ;;  %v2778_v30 = vshrl.u32 %v6772_v19, %v2766_v58 }
 0x4ed   : >> { %v2781_v22 = vshrl.u32 %v6773_v23, %v2766_v58  ;;  %v2780_v59 = vshll.u32 %v6772_v19, %v2765_v53  ;;  %v2759_v62 = vor.u32 8388608, %v2758_v21  ;;  %vm2783_vm8 = vcmp.lt.s32.totalorder %v2764_v29, 1 }
 0x4ee   : >> { %v2770_v27 = vor.u32 %v2769_v40, %v2768_v7  ;;  %v2773_v48 = vor.u32 %v2772_v8, %v2771_v26  ;;  %v2776_v45 = vor.u32 %v2775_v60, %v2774_v25  ;;  %v2779_v39 = vor.u32 %v2778_v30, %v2777_v47 }
 0x4ef   : >> { %v2782_v12 = vor.u32 %v2781_v22, %v2780_v59  ;;  %v2505_v2 = vsub.s32 0, %v6085_v32  ;;  %v2706_v57 = vsel %vm2704_vm6, %v2705_v31, %v6071_v16  ;;  %vm2786_vm7 = vcmp.lt.s32.totalorder %v2764_v29, 4 }
 0x4f0   : >> { %v2791_v20 = vsel %vm2783_vm8, %v2770_v27, %v2773_v48  ;;  %v2611_v9 = vclz %v3641_v0  ;;  %v2702_v7 = vmul.u32 %v2695_v55, %v2686_v34  ;;  %vm2785_vm9 = vcmp.lt.s32.totalorder %v2764_v29, 3 }
 0x4f1   : >> { %v2792_v53 = vsel %vm2786_vm7, %v2779_v39, 920167782  ;;  %vm2784_vm10 = vcmp.lt.s32.totalorder %v2764_v29, 2  ;;  %v2796_v40 = vsel %vm2786_vm7, %v2782_v12, 1326507024  ;;  %v2799_v26 = vshll.u32 %v2759_v62, 8 }
 0x4f2   : >> { %v2793_v21 = vsel %vm2785_vm9, %v2776_v45, %v2792_v53  ;;  %v2707_v8 = vadd.s32 %v2706_v57, %v2702_v7  ;;  %v2788_v61 = vsel %vm2786_vm7, %v2776_v45, 2102212464  ;;  %v2795_v60 = vsel %vm2783_vm8, %v2773_v48, %v2776_v45  ;;  %v6832_v29 = vld [vmem:[#allocation40_spill] sm:$0xff] }
 0x4f3   : >> { %v2794_v25 = vsel %vm2784_vm10, %v2791_v20, %v2793_v21  ;;  %v2767_v47 = vshrl.u32 %v6774_v13, %v2766_v58  ;;  %v2797_v16 = vsel %vm2785_vm9, %v2779_v39, %v2796_v40  ;;  %v3637_v55 = vmin.u32 %v2505_v2, %v6085_v32 }
 0x4f4   : >> { %v6119_v31 = vmul.u32.u64.low %v2799_v26, %v2794_v25  ;;  %v6120_v30 = vmul.u32.u64.high %v2799_v26, %v2794_v25, %v6119_v31  ;;  %v2789_v22 = vsel %vm2785_vm9, %v2773_v48, %v2788_v61  ;;  %v2798_v12 = vsel %vm2784_vm10, %v2795_v60, %v2797_v16 }
 0x4f5   : >> { %v2787_v0 = vsel %vm2783_vm8, %v2767_v47, %v2770_v27  ;;  %v2858_v34 = vand.u32 2139095040, %v6111_v15  ;;  %v3642_v59 = vadd.s32 4294967294, %v2611_v9  ;;  %v2708_v45 = vadd.s32 536870912, %v2707_v8 }
 0x4f6   : >> { %v6127_v62 = vmul.u32.u64.low %v2799_v26, %v2798_v12  ;;  %v6128_v57 = vmul.u32.u64.high %v2799_v26, %v2798_v12, %v6127_v62  ;;  %v2790_v39 = vsel %vm2784_vm10, %v2787_v0, %v2789_v22  ;;  %v2809_v20 = vadd.s32 1, %v6120_v30 }
 0x4f7   : >> { %v2859_v58 = vshrl.u32 %v2858_v34, 23  ;;  %v2507_v7 = vclz %v3637_v55  ;;  %vm3643_vm11 = vcmp.lt.s32.totalorder %v3642_v59, 0  ;;  %v6698_v2 = vand.u32 2147483647, %v6111_v15 }
 0x4f8   : >> { %v6133_v27 = vshrl.u32 %v2708_v45, 30  ;;  %v2806_v48 = vmul.u32 %v2799_v26, %v2790_v39  ;;  %vm2808_vm12 = vc.u32 %v6128_v57, %v6119_v31  ;;  %v6140_v25 = vadd.f32 %v5809_v63, %v6832_v29 }
 0x4f9   : >> { %v3652_v53 = vadd.s32 4294967169, %v2859_v58  ;;  %v2810_v21 = vsel %vm2808_vm12, %v2809_v20, %v6120_v30  ;;  %v3638_v40 = vadd.s32 4294967294, %v2507_v7  ;;  %v6142_v60 = vsel %vm3643_vm11, 0, %v3642_v59 }
 0x4fa   : >> { %v2811_v61 = vadd.s32 %v2810_v21, %v2806_v48  ;;  %v2710_v16 = vshll.u32 %v6133_v27, 30  ;;  %v2862_v26 = vand.u32 8388607, %v6698_v2  ;;  %v2599_v12 = vadd.s32 %v5948_v24, %v5953_v36 }
 0x4fb   : >> { %v2865_v9 = vadd.s32 1, %v3652_v53  ;;  %vm3639_vm14 = vcmp.lt.s32.totalorder %v3638_v40, 0  ;;  %v2615_v63 = vsub.s32 32, %v6142_v60  ;;  %v2619_v34 = vsub.s32 4294967266, %v6142_v60 }
 0x4fc   : >> { %v2812_v55 = vadd.s32 536870912, %v2811_v61  ;;  %v2962_v59 = vand.u32 2139095040, %v6140_v25  ;;  %v6154_v62 = vsub.s32 %v2707_v8, %v2710_v16  ;;  %v2863_v58 = vor.u32 8388608, %v2862_v26 }
 0x4fd   : >> { %vm2866_vm13 = vcmp.gt.s32.totalorder %v2865_v9, 0  ;;  %v2617_v14 = vshrl.u32 %v2599_v12, %v2615_v63  ;;  %v2620_v43 = vadd.s32 127, %v2619_v34  ;;  %vm2545_vm11 = vcmp.lt.s32.totalorder %v5807_v35, 0 }
 0x4fe   : >> { %v2867_v47 = vsel %vm2866_vm13, %v2865_v9, 0  ;;  %v6147_v22 = vshrl.u32 %v2812_v55, 30  ;;  %v2963_v26 = vshrl.u32 %v2962_v59, 23  ;;  %v2903_v59 = vshll.u32 %v2863_v58, 8 }
 0x4ff   : >> { %v2869_v0 = vand.u32 31, %v2867_v47  ;;  %v2868_v21 = vshrl.u32 %v2867_v47, 5  ;;  %v2713_v47 = vsub.s32 0, %v6154_v62 }
 0x500   : >> { %v2814_v45 = vshll.u32 %v6147_v22, 30 }
 0x501   : >> { %v2870_v30 = vsub.s32 32, %v2869_v0  ;;  %v2872_v20 = vshll.u32 %v6774_v13, %v2869_v0  ;;  %v2875_v48 = vshll.u32 %v6769_v42, %v2869_v0  ;;  %v2878_v8 = vshll.u32 %v6770_v17, %v2869_v0 }
 0x502   : >> { %v6162_v36 = vsub.s32 %v2811_v61, %v2814_v45  ;;  %v2881_v16 = vshll.u32 %v6771_v41, %v2869_v0  ;;  %v2884_v55 = vshll.u32 %v6772_v19, %v2869_v0  ;;  %v6171_v61 = vsel %vm3639_vm14, 0, %v3638_v40 }
 0x503   : >> { %v2873_v39 = vshrl.u32 %v6769_v42, %v2870_v30  ;;  %v2876_v7 = vshrl.u32 %v6770_v17, %v2870_v30  ;;  %v2879_v53 = vshrl.u32 %v6771_v41, %v2870_v30  ;;  %v2882_v24 = vshrl.u32 %v6772_v19, %v2870_v30 }
 0x504   : >> { %v2885_v9 = vshrl.u32 %v6773_v23, %v2870_v30  ;;  %v2817_v2 = vsub.s32 0, %v6162_v36  ;;  %v2616_v45 = vshll.u32 %v6066_v56, %v6142_v60  ;;  %vm2887_vm15 = vcmp.lt.s32.totalorder %v2868_v21, 1 }
 0x505   : >> { %v2874_v3 = vor.u32 %v2873_v39, %v2872_v20  ;;  %v2877_v4 = vor.u32 %v2876_v7, %v2875_v48  ;;  %v2880_v5 = vor.u32 %v2879_v53, %v2878_v8  ;;  %v2883_v33 = vor.u32 %v2882_v24, %v2881_v16 }
 0x506   : >> { %v3649_v44 = vmin.u32 %v2817_v2, %v6162_v36  ;;  %v2886_v0 = vor.u32 %v2885_v9, %v2884_v55  ;;  %vm2890_vm0 = vcmp.lt.s32.totalorder %v2868_v21, 4  ;;  %v3656_v39 = vadd.s32 4294967169, %v2963_v26 }
 0x507   : >> { %v2871_v7 = vshrl.u32 %v6774_v13, %v2870_v30  ;;  %v2892_v40 = vsel %vm2890_vm0, %v2880_v5, 2102212464  ;;  %v2895_v53 = vsel %vm2887_vm15, %v2874_v3, %v2877_v4  ;;  %vm2888_vm1 = vcmp.lt.s32.totalorder %v2868_v21, 2 }
 0x508   : >> { %v2819_v20 = vclz %v3649_v44  ;;  %vm2889_vm2 = vcmp.lt.s32.totalorder %v2868_v21, 3  ;;  %v2896_v56 = vsel %vm2890_vm0, %v2883_v33, 920167782  ;;  %v2899_v60 = vsel %vm2887_vm15, %v2877_v4, %v2880_v5 }
 0x509   : >> { %v2891_v63 = vsel %vm2887_vm15, %v2871_v7, %v2874_v3  ;;  %v2897_v34 = vsel %vm2889_vm2, %v2880_v5, %v2896_v56  ;;  %v2900_v24 = vsel %vm2890_vm0, %v2886_v0, 1326507024  ;;  %v2893_v48 = vsel %vm2889_vm2, %v2877_v4, %v2892_v40 }
 0x50a   : >> { %v3650_v12 = vadd.s32 4294967294, %v2819_v20  ;;  %v2898_v2 = vsel %vm2888_vm1, %v2895_v53, %v2897_v34  ;;  %v2901_v8 = vsel %vm2889_vm2, %v2883_v33, %v2900_v24  ;;  %v2969_v9 = vadd.s32 1, %v3656_v39 }
 0x50b   : >> { %v2902_v44 = vsel %vm2888_vm1, %v2899_v60, %v2901_v8  ;;  %v6180_v58 = vmul.u32.u64.low %v2903_v59, %v2898_v2  ;;  %v6181_v30 = vmul.u32.u64.high %v2903_v59, %v2898_v2, %v6180_v58  ;;  %v2621_v16 = vshll.u32 %v2620_v43, 23 }
 0x50c   : >> { %vm3651_vm3 = vcmp.lt.s32.totalorder %v3650_v12, 0  ;;  %v6184_v55 = vmul.u32.u64.low %v2903_v59, %v2902_v44  ;;  %v6185_v26 = vmul.u32.u64.high %v2903_v59, %v2902_v44, %v6184_v55  ;;  %vm2970_vm4 = vcmp.gt.s32.totalorder %v2969_v9, 0 }
 0x50d   : >> { %v3645_v3 = vmin.u32 %v2713_v47, %v6154_v62  ;;  %v2822_v5 = vsel %vm3651_vm3, 0, %v3650_v12  ;;  %v2894_v4 = vsel %vm2888_vm1, %v2891_v63, %v2893_v48  ;;  %v2971_v0 = vsel %vm2970_vm4, %v2969_v9, 0 }
 0x50e   : >> { %v2973_v33 = vand.u32 31, %v2971_v0  ;;  %v2515_v39 = vsub.s32 4294967266, %v6171_v61  ;;  %v2618_v20 = vor.u32 %v2617_v14, %v2616_v45  ;;  %v2913_v7 = vadd.s32 1, %v6181_v30 }
 0x50f   : >> { %v2622_v40 = vor.u32 4788187, %v2621_v16  ;;  %v2827_v53 = vsub.s32 4294967266, %v2822_v5  ;;  %v2910_v56 = vmul.u32 %v2903_v59, %v2894_v4  ;;  %vm2912_vm5 = vc.u32 %v6185_v26, %v6180_v58 }
 0x510   : >> { %v2715_v43 = vclz %v3645_v3  ;;  %v2914_v60 = vsel %vm2912_vm5, %v2913_v7, %v6181_v30  ;;  %v6703_v47 = vand.u32 2147483647, %v6140_v25  ;;  %v2974_v21 = vsub.s32 32, %v2973_v33 }
 0x511   : >> { %v6197_v12 = vadd.f32 %v5811_v18, %v6832_v29  ;;  %v2495_v14 = vadd.s32 %v5922_v37, %v5958_v1  ;;  %v2823_v45 = vsub.s32 32, %v2822_v5  ;;  %v2915_v63 = vadd.s32 %v2914_v60, %v2910_v56 }
 0x512   : >> { %v2511_v59 = vsub.s32 32, %v6171_v61  ;;  %v2512_v34 = vshll.u32 %v6085_v32, %v6171_v61  ;;  %v2516_v24 = vadd.s32 127, %v2515_v39  ;;  %v2625_v48 = vcvt.s32.f32 %v2618_v20 }
 0x513   : >> { %v2623_v2 = vand.u32 2147483647, %v2622_v40  ;;  %v2807_v8 = vadd.s32 %v6119_v31, %v6128_v57  ;;  %v2828_v9 = vadd.s32 127, %v2827_v53  ;;  %v2916_v44 = vadd.s32 536870912, %v2915_v63 }
 0x514   : >> { %v3646_v18 = vadd.s32 4294967294, %v2715_v43  ;;  %v2966_v30 = vand.u32 8388607, %v6703_v47  ;;  %v2977_v37 = vshrl.u32 %v6769_v42, %v2974_v21  ;;  %v2980_v1 = vshrl.u32 %v6770_v17, %v2974_v21 }
 0x515   : >> { %v2825_v16 = vshrl.u32 %v2807_v8, %v2823_v45  ;;  %v6210_v55 = vshrl.u32 %v2916_v44, 30  ;;  %v2972_v32 = vshrl.u32 %v2971_v0, 5  ;;  %v2983_v61 = vshrl.u32 %v6771_v41, %v2974_v21 }
 0x516   : >> { %v2976_v3 = vshll.u32 %v6774_v13, %v2973_v33  ;;  %v2979_v31 = vshll.u32 %v6769_v42, %v2973_v33  ;;  %v2985_v57 = vshll.u32 %v6771_v41, %v2973_v33  ;;  %v2986_v4 = vshrl.u32 %v6772_v19, %v2974_v21 }
 0x517   : >> { %v2829_v39 = vshll.u32 %v2828_v9, 23  ;;  %v2918_v20 = vshll.u32 %v6210_v55, 30  ;;  %v2982_v7 = vshll.u32 %v6770_v17, %v2973_v33  ;;  %v2989_v40 = vshrl.u32 %v6773_v23, %v2974_v21 }
 0x518   : >> { %v2978_v53 = vor.u32 %v2977_v37, %v2976_v3  ;;  %v2981_v56 = vor.u32 %v2980_v1, %v2979_v31  ;;  %v2987_v0 = vor.u32 %v2986_v4, %v2985_v57  ;;  %v2988_v43 = vshll.u32 %v6772_v19, %v2973_v33 }
 0x519   : >> { %v2513_v60 = vshrl.u32 %v2495_v14, %v2511_v59  ;;  %v2517_v45 = vshll.u32 %v2516_v24, 23  ;;  %v2626_v8 = vmul.f32 %v2625_v48, %v2623_v2  ;;  %v2984_v44 = vor.u32 %v2983_v61, %v2982_v7 }
 0x51a   : >> { %vm3647_vm6 = vcmp.lt.s32.totalorder %v3646_v18, 0  ;;  %v2824_v47 = vshll.u32 %v6162_v36, %v2822_v5  ;;  %v2967_v29 = vor.u32 8388608, %v2966_v30  ;;  %v2990_v9 = vor.u32 %v2989_v40, %v2988_v43 }
 0x51b   : >> { %v2830_v46 = vor.u32 4788187, %v2829_v39  ;;  %v6222_v51 = vsub.s32 %v2915_v63, %v2918_v20  ;;  %vm2991_vm8 = vcmp.lt.s32.totalorder %v2972_v32, 1  ;;  %vm2994_vm7 = vcmp.lt.s32.totalorder %v2972_v32, 4 }
 0x51c   : >> { %v2826_v52 = vor.u32 %v2825_v16, %v2824_v47  ;;  %vm2993_vm9 = vcmp.lt.s32.totalorder %v2972_v32, 3  ;;  %v2999_v37 = vsel %vm2991_vm8, %v2978_v53, %v2981_v56  ;;  %v3000_v1 = vsel %vm2994_vm7, %v2987_v0, 920167782 }
 0x51d   : >> { %v2975_v33 = vshrl.u32 %v6774_v13, %v2974_v21  ;;  %vm2992_vm10 = vcmp.lt.s32.totalorder %v2972_v32, 2  ;;  %v2996_v14 = vsel %vm2994_vm7, %v2984_v44, 2102212464  ;;  %v3001_v59 = vsel %vm2993_vm9, %v2984_v44, %v3000_v1 }
 0x51e   : >> { %v3002_v36 = vsel %vm2992_vm10, %v2999_v37, %v3001_v59  ;;  %v3003_v5 = vsel %vm2991_vm8, %v2981_v56, %v2984_v44  ;;  %v3004_v24 = vsel %vm2994_vm7, %v2990_v9, 1326507024  ;;  %v3007_v63 = vshll.u32 %v2967_v29, 8 }
 0x51f   : >> { %v6230_v48 = vsel %vm3647_vm6, 0, %v3646_v18  ;;  %v2831_v47 = vand.u32 2147483647, %v2830_v46  ;;  %v2921_v2 = vsub.s32 0, %v6222_v51  ;;  %v2995_v30 = vsel %vm2991_vm8, %v2975_v33, %v2978_v53 }
 0x520   : >> { %v2997_v21 = vsel %vm2993_vm9, %v2981_v56, %v2996_v14  ;;  %v3005_v16 = vsel %vm2993_vm9, %v2987_v0, %v3004_v24  ;;  %v6236_v61 = vmul.u32.u64.low %v3007_v63, %v3002_v36  ;;  %v6237_v3 = vmul.u32.u64.high %v3007_v63, %v3002_v36, %v6236_v61 }
 0x521   : >> { %v2518_v31 = vor.u32 4788187, %v2517_v45  ;;  %v2833_v57 = vcvt.s32.f32 %v2826_v52  ;;  %v3006_v29 = vsel %vm2992_vm10, %v3003_v5, %v3005_v16  ;;  %v3066_v18 = vand.u32 2139095040, %v6197_v12 }
 0x522   : >> { %v2514_v4 = vor.u32 %v2513_v60, %v2512_v34  ;;  %v2627_v46 = vxor.u32 2147483648, %v2626_v8  ;;  %v6242_v39 = vmul.u32.u64.low %v3007_v63, %v3006_v29  ;;  %v6243_v20 = vmul.u32.u64.high %v3007_v63, %v3006_v29, %v6242_v39 }
 0x523   : >> { %v2723_v7 = vsub.s32 4294967266, %v6230_v48  ;;  %v2834_v40 = vmul.f32 %v2833_v57, %v2831_v47  ;;  %v2998_v53 = vsel %vm2992_vm10, %v2995_v30, %v2997_v21  ;;  %v3067_v56 = vshrl.u32 %v3066_v18, 23 }
 0x524   : >> { %v3653_v0 = vmin.u32 %v2921_v2, %v6222_v51  ;;  %v3017_v43 = vadd.s32 1, %v6237_v3  ;;  %v2519_v52 = vand.u32 2147483647, %v2518_v31  ;;  %v2521_v44 = vcvt.s32.f32 %v2514_v4 }
 0x525   : >> { %v3660_v45 = vadd.s32 4294967169, %v3067_v56  ;;  %v2629_v34 = vsub.s32 4, %v6039_v28  ;;  %v3014_v60 = vmul.u32 %v3007_v63, %v2998_v53  ;;  %vm3016_vm12 = vc.u32 %v6243_v20, %v6236_v61 }
 0x526   : >> { %v2628_v32 = vsel %vm2545_vm11, %v2627_v46, %v2626_v8  ;;  %v2724_v9 = vadd.s32 127, %v2723_v7  ;;  %v2835_v37 = vxor.u32 2147483648, %v2834_v40  ;;  %v3018_v1 = vsel %vm3016_vm12, %v3017_v43, %v6237_v3 }
 0x527   : >> { %v2923_v33 = vclz %v3653_v0  ;;  %v3019_v14 = vadd.s32 %v3018_v1, %v3014_v60  ;;  %v3073_v59 = vadd.s32 1, %v3660_v45  ;;  %v6256_v36 = vmul.f32 %v2521_v44, %v2519_v52 }
 0x528   : >> { %v6833_v5 = vand.u32 2147483647, %v5807_v35  ;;  %vm2753_vm14 = vcmp.lt.s32.totalorder %v6016_v10, 0  ;;  %v6708_v63 = vand.u32 2147483647, %v6197_v12  ;;  %v6269_v8 = vsel %vm2545_vm11, %v2629_v34, %v6039_v28 }
 0x529   : >> { %v3020_v2 = vadd.s32 536870912, %v3019_v14  ;;  %vm3074_vm15 = vcmp.gt.s32.totalorder %v3073_v59, 0  ;;  %v2719_v30 = vsub.s32 32, %v6230_v48  ;;  %v2725_v21 = vshll.u32 %v2724_v9, 23 }
 0x52a   : >> { %vm6260_vm13 = vcmp.le.f32.partialorder %v6833_v5, 0.7853982  ;;  %v2836_v16 = vsel %vm2753_vm14, %v2835_v37, %v2834_v40  ;;  %v3075_v3 = vsel %vm3074_vm15, %v3073_v59, 0  ;;  %v6836_v31 = vand.u32 2147483647, %v6016_v10 }
 0x52b   : >> { %v2631_v47 = vsel %vm6260_vm13, %v5807_v35, %v2628_v32  ;;  %v3654_v28 = vadd.s32 4294967294, %v2923_v33  ;;  %v6283_v29 = vshrl.u32 %v3020_v2, 30  ;;  %v3077_v18 = vand.u32 31, %v3075_v3 }
 0x52c   : >> { %vm6279_vm0 = vcmp.le.f32.partialorder %v6836_v31, 0.7853982  ;;  %v2632_v46 = vsel %vm6260_vm13, 0, %v6269_v8  ;;  %v2703_v39 = vadd.s32 %v6070_v50, %v6077_v54  ;;  %v3070_v7 = vand.u32 8388607, %v6708_v63 }
 0x52d   : >> { %3949 = vcosq.f32 %v2631_v47  ;;  %v2839_v40 = vsel %vm6279_vm0, %v6016_v10, %v2836_v16  ;;  %v3022_v53 = vshll.u32 %v6283_v29, 30  ;;  %v3078_v56 = vsub.s32 32, %v3077_v18 }
 0x52e   : >> { %3951 = vsinq.f32 %v2631_v47  ;;  %v2720_v0 = vshll.u32 %v6154_v62, %v6230_v48  ;;  %v2721_v43 = vshrl.u32 %v2703_v39, %v2719_v30  ;;  %v6299_v52 = vor.u32 4788187, %v2725_v21 }
 0x52f   : >> { %v2837_v50 = vsub.s32 4, %v6147_v22  ;;  %vm3655_vm1 = vcmp.lt.s32.totalorder %v3654_v28, 0  ;;  %v6302_v54 = vsub.s32 %v3019_v14, %v3022_v53  ;;  %v3081_v45 = vshrl.u32 %v6769_v42, %v3078_v56 }
 0x530   : >> { %3953 = vcosq.f32 %v2839_v40  ;;  %v3071_v44 = vor.u32 8388608, %v3070_v7  ;;  %v3084_v34 = vshrl.u32 %v6770_v17, %v3078_v56  ;;  %v3087_v60 = vshrl.u32 %v6771_v41, %v3078_v56 }
 0x531   : >> { %v3025_v32 = vsub.s32 0, %v6302_v54  ;;  %v3080_v62 = vshll.u32 %v6774_v13, %v3077_v18  ;;  %v3083_v48 = vshll.u32 %v6769_v42, %v3077_v18  ;;  %v3090_v9 = vshrl.u32 %v6772_v19, %v3078_v56 }
 0x532   : >> { %v6311_v37 = vsel %vm3655_vm1, 0, %v3654_v28  ;;  %v3076_v1 = vshrl.u32 %v3075_v3, 5  ;;  %v3086_v33 = vshll.u32 %v6770_v17, %v3077_v18  ;;  %v3089_v14 = vshll.u32 %v6771_v41, %v3077_v18 }
 0x533   : >> { %3955 = vsinq.f32 %v2839_v40  ;;  %v3657_v59 = vmin.u32 %v3025_v32, %v6302_v54  ;;  %v3082_v5 = vor.u32 %v3081_v45, %v3080_v62  ;;  %v3085_v47 = vor.u32 %v3084_v34, %v3083_v48 }
 0x534   : >> { %v3088_v2 = vor.u32 %v3087_v60, %v3086_v33  ;;  %v3091_v30 = vor.u32 %v3090_v9, %v3089_v14  ;;  %v3092_v21 = vshll.u32 %v6772_v19, %v3077_v18  ;;  %v3093_v16 = vshrl.u32 %v6773_v23, %v3078_v56 }
 0x535   : >> { %v2927_v31 = vsub.s32 32, %v6311_v37  ;;  %v2931_v28 = vsub.s32 4294967266, %v6311_v37  ;;  %v3015_v3 = vadd.s32 %v6236_v61, %v6243_v20  ;;  %v3027_v39 = vclz %v3657_v59 }
 0x536   : >> { %v3079_v7 = vshrl.u32 %v6774_v13, %v3078_v56  ;;  %v3094_v40 = vor.u32 %v3093_v16, %v3092_v21  ;;  %vm3095_vm2 = vcmp.lt.s32.totalorder %v3076_v1, 1  ;;  %v3111_v53 = vshll.u32 %v3071_v44, 8 }
 0x537   : >> { %v6323_v45 = vpop.eup %3949  ;;  %v3658_v34 = vadd.s32 4294967294, %v3027_v39  ;;  %vm3097_vm3 = vcmp.lt.s32.totalorder %v3076_v1, 3  ;;  %vm3098_vm4 = vcmp.lt.s32.totalorder %v3076_v1, 4  ;;  %v3103_v18 = vsel %vm3095_vm2, %v3082_v5, %v3085_v47 }
 0x538   : >> { %v6326_v60 = vpop.eup %3951  ;;  %vm2441_vm5 = vcmp.lt.s32.totalorder %v5793_v38, 0  ;;  %v3100_v32 = vsel %vm3098_vm4, %v3088_v2, 2102212464  ;;  %v3104_v62 = vsel %vm3098_vm4, %v3091_v30, 920167782  ;;  %v3107_v61 = vsel %vm3095_vm2, %v3085_v47, %v3088_v2 }
 0x539   : >> { %v3108_v20 = vsel %vm3098_vm4, %v3094_v40, 1326507024  ;;  %vm3659_vm6 = vcmp.lt.s32.totalorder %v3658_v34, 0  ;;  %vm3096_vm8 = vcmp.lt.s32.totalorder %v3076_v1, 2  ;;  %v3105_v56 = vsel %vm3097_vm3, %v3088_v2, %v3104_v62 }
 0x53a   : >> { %v3109_v44 = vsel %vm3097_vm3, %v3091_v30, %v3108_v20  ;;  %v6332_v48 = vpop.eup %3953  ;;  %v2932_v9 = vadd.s32 127, %v2931_v28  ;;  %v3030_v33 = vsel %vm3659_vm6, 0, %v3658_v34  ;;  %v3106_v14 = vsel %vm3096_vm8, %v3103_v18, %v3105_v56 }
 0x53b   : >> { %v3110_v59 = vsel %vm3096_vm8, %v3107_v61, %v3109_v44  ;;  %v3031_v21 = vsub.s32 32, %v3030_v33  ;;  %v3035_v16 = vsub.s32 4294967266, %v3030_v33  ;;  %v3099_v39 = vsel %vm3095_vm2, %v3079_v7, %v3082_v5 }
 0x53c   : >> { %v3101_v40 = vsel %vm3097_vm3, %v3085_v47, %v3100_v32  ;;  %v6338_v63 = vmul.u32.u64.low %v3111_v53, %v3110_v59  ;;  %v6339_v4 = vmul.u32.u64.high %v3111_v53, %v3110_v59, %v6338_v63  ;;  %v2722_v28 = vor.u32 %v2721_v43, %v2720_v0 }
 0x53d   : >> { %v6341_v2 = vmul.u32.u64.low %v3111_v53, %v3106_v14  ;;  %v6342_v62 = vmul.u32.u64.high %v3111_v53, %v3106_v14, %v6341_v2  ;;  %v6345_v30 = vpop.eup %3955  ;;  %v3032_v34 = vshll.u32 %v6302_v54, %v3030_v33  ;;  %v3033_v18 = vshrl.u32 %v3015_v3, %v3031_v21 }
 0x53e   : >> { %v3036_v61 = vadd.s32 127, %v3035_v16  ;;  %v2838_v5 = vsel %vm2753_vm14, %v2837_v50, %v6147_v22  ;;  %v2911_v63 = vadd.s32 %v6180_v58, %v6185_v26  ;;  %v2933_v47 = vshll.u32 %v2932_v9, 23 }
 0x53f   : >> { %v3102_v7 = vsel %vm3096_vm8, %v3099_v39, %v3101_v40  ;;  %v2525_v32 = vsub.s32 4, %v6064_v11  ;;  %v2636_v0 = vadd.s32 3, %v2632_v46  ;;  %v3034_v43 = vor.u32 %v3033_v18, %v3032_v34 }
 0x540   : >> { %v3037_v54 = vshll.u32 %v3036_v61, 23  ;;  %v2727_v3 = vand.u32 2147483647, %v6299_v52  ;;  %v2929_v20 = vshrl.u32 %v2911_v63, %v2927_v31  ;;  %vm3120_vm7 = vc.u32 %v6339_v4, %v6341_v2 }
 0x541   : >> { %v3121_v22 = vadd.s32 1, %v6342_v62  ;;  %v6839_v58 = vxor.u32 2147483648, %v6256_v36  ;;  %v2840_v24 = vsel %vm6279_vm0, 0, %v2838_v5  ;;  %v3118_v46 = vmul.u32 %v3111_v53, %v3102_v7 }
 0x542   : >> { %v3038_v8 = vor.u32 4788187, %v3037_v54  ;;  %v2729_v50 = vcvt.s32.f32 %v2722_v28  ;;  %v2928_v52 = vshll.u32 %v6222_v51, %v6311_v37  ;;  %v2934_v1 = vor.u32 4788187, %v2933_v47 }
 0x543   : >> { %v2524_v26 = vsel %vm2441_vm5, %v6839_v58, %v6256_v36  ;;  %v3122_v31 = vsel %vm3120_vm7, %v3121_v22, %v6342_v62  ;;  %v6840_v56 = vand.u32 2147483647, %v5793_v38  ;;  %v3041_v36 = vcvt.s32.f32 %v3034_v43 }
 0x544   : >> { %v3039_v9 = vand.u32 2147483647, %v3038_v8  ;;  %v3123_v33 = vadd.s32 %v3122_v31, %v3118_v46  ;;  %vm2649_vm10 = vcmp.lt.s32.totalorder %v5863_v49, 0  ;;  %v2730_v57 = vmul.f32 %v2729_v50, %v2727_v3 }
 0x545   : >> { %vm6377_vm9 = vcmp.le.f32.partialorder %v6840_v56, 0.7853982  ;;  %v2844_v53 = vadd.s32 3, %v2840_v24  ;;  %v2930_v14 = vor.u32 %v2929_v20, %v2928_v52  ;;  %v3045_v59 = vsub.s32 4, %v6283_v29 }
 0x546   : >> { %v2526_v51 = vsel %vm2441_vm5, %v2525_v32, %v6064_v11  ;;  %v2527_v37 = vsel %vm6377_vm9, %v5793_v38, %v2524_v26  ;;  %v3042_v21 = vmul.f32 %v3041_v36, %v3039_v9  ;;  %v3124_v16 = vadd.s32 536870912, %v3123_v33 }
 0x547   : >> { %v2637_v39 = vand.u32 3, %v2636_v0  ;;  %v2643_v40 = vxor.u32 2147483648, %v6323_v45  ;;  %v2935_v62 = vand.u32 2147483647, %v2934_v1  ;;  %vm2961_vm11 = vcmp.lt.s32.totalorder %v6140_v25, 0 }
 0x548   : >> { %v2640_v28 = vxor.u32 2147483648, %v6326_v60  ;;  %v6843_v34 = vand.u32 2147483647, %v6140_v25  ;;  %v3043_v11 = vxor.u32 2147483648, %v3042_v21  ;;  %v6398_v61 = vshrl.u32 %v3124_v16, 30 }
 0x549   : >> { %v2731_v5 = vxor.u32 2147483648, %v2730_v57  ;;  %v2845_v63 = vand.u32 3, %v2844_v53  ;;  %v2937_v47 = vcvt.s32.f32 %v2930_v14  ;;  %v3046_v7 = vsel %vm2961_vm11, %v3045_v59, %v6283_v29 }
 0x54a   : >> { %vm6394_vm12 = vcmp.le.f32.partialorder %v6843_v34, 0.7853982  ;;  %v2848_v32 = vxor.u32 2147483648, %v6345_v30  ;;  %v2851_v0 = vxor.u32 2147483648, %v6332_v48  ;;  %v3044_v43 = vsel %vm2961_vm11, %v3043_v11, %v3042_v21 }
 0x54b   : >> { %v3126_v54 = vshll.u32 %v6398_v61, 30  ;;  %vm2639_vm13 = vcmp.eq.s32.totalorder %v2637_v39, 0  ;;  %vm2642_vm14 = vcmp.eq.s32.totalorder %v2637_v39, 2  ;;  %v2938_v3 = vmul.f32 %v2937_v47, %v2935_v62 }
 0x54c   : >> { %v3047_v20 = vsel %vm6394_vm12, %v6140_v25, %v3044_v43  ;;  %v2644_v22 = vsel %vm2642_vm14, %v2643_v40, %v6326_v60  ;;  %v3048_v58 = vsel %vm6394_vm12, 0, %v3046_v7  ;;  %v2641_v26 = vsel %vm2639_vm13, %v6323_v45, %v2640_v28  ;;  %v6852_v40 = vld [vmem:[#allocation42_spill] sm:$0xff]  ;;  %v6853_v28 = vld [vmem:[#allocation39_spill] sm:$0xff] }
 0x54d   : >> { %3957 = vcosq.f32 %v3047_v20  ;;  %v6410_v29 = vsub.s32 %v3123_v33, %v3126_v54  ;;  %vm2847_vm15 = vcmp.eq.s32.totalorder %v2845_v63, 0  ;;  %vm2850_vm0 = vcmp.eq.s32.totalorder %v2845_v63, 2 }
 0x54e   : >> { %3959 = vsinq.f32 %v3047_v20  ;;  %v2732_v24 = vsel %vm2649_vm10, %v2731_v5, %v2730_v57  ;;  %v2849_v8 = vsel %vm2847_vm15, %v6332_v48, %v2848_v32  ;;  %v2852_v46 = vsel %vm2850_vm0, %v2851_v0, %v6345_v30  ;;  %v6854_v5 = vld [vmem:[#allocation43_spill] sm:$0xff] }
 0x54f   : >> { %v3129_v60 = vsub.s32 0, %v6410_v29  ;;  %vm2638_vm1 = vcmp.lt.s32.totalorder %v2637_v39, 2  ;;  %v6846_v50 = vand.u32 2147483647, %v5863_v49  ;;  %v2939_v45 = vxor.u32 2147483648, %v2938_v3 }
 0x550   : >> { %v3052_v1 = vadd.s32 3, %v3048_v58  ;;  %v2528_v31 = vsel %vm6377_vm9, 0, %v2526_v51  ;;  %v2645_v56 = vsel %vm2638_vm1, %v2641_v26, %v2644_v22  ;;  %vm2846_vm3 = vcmp.lt.s32.totalorder %v2845_v63, 2 }
 0x551   : >> { %vm6420_vm2 = vcmp.le.f32.partialorder %v6846_v50, 0.7853982  ;;  %v3661_v48 = vmin.u32 %v3129_v60, %v6410_v29  ;;  %3961 = vcosq.f32 %v2527_v37  ;;  %v2733_v30 = vsub.s32 4, %v6133_v27 }
 0x552   : >> { %v2735_v9 = vsel %vm6420_vm2, %v5863_v49, %v2732_v24  ;;  %v2853_v36 = vsel %vm2846_vm3, %v2849_v8, %v2852_v46  ;;  %3963 = vsinq.f32 %v2527_v37  ;;  %vm2635_vm4 = vweird.f32 %v5807_v35 }
 0x553   : >> { %vm2857_vm5 = vcmp.lt.s32.totalorder %v6111_v15, 0  ;;  %v3131_v33 = vclz %v3661_v48  ;;  %v2646_v44 = vsel %vm2635_vm4, nan, %v2645_v56  ;;  %vm2843_vm6 = vweird.f32 %v6016_v10 }
 0x554   : >> { %v2940_v57 = vsel %vm2857_vm5, %v2939_v45, %v2938_v3  ;;  %v3053_v53 = vand.u32 3, %v3052_v1  ;;  %v2532_v14 = vadd.s32 3, %v2528_v31  ;;  %3965 = vcosq.f32 %v2735_v9 }
 0x555   : >> { %v2854_v59 = vsel %vm2843_vm6, nan, %v2853_v36  ;;  %v3662_v51 = vadd.s32 4294967294, %v3131_v33  ;;  %v2734_v37 = vsel %vm2649_vm10, %v2733_v30, %v6133_v27  ;;  %3967 = vsinq.f32 %v2735_v9 }
 0x556   : >> { %v6849_v35 = vand.u32 2147483647, %v6111_v15  ;;  %v2941_v10 = vsub.s32 4, %v6210_v55  ;;  %v3167_v62 = vmul.f32 %v6055_v6, %v6852_v40  ;;  %v3169_v27 = vmul.f32 %v2646_v44, %v6853_v28 }
 0x557   : >> { %v3958_v16 = vpop.eup %3957  ;;  %vm3663_vm7 = vcmp.lt.s32.totalorder %v3662_v51, 0  ;;  %vm3058_vm9 = vcmp.eq.s32.totalorder %v3053_v53, 2  ;;  %v3171_v63 = vmul.f32 %v2854_v59, %v6854_v5  ;;  %v3119_v7 = vadd.s32 %v6341_v2, %v6339_v4 }
 0x558   : >> { %vm6441_vm8 = vcmp.le.f32.partialorder %v6849_v35, 0.7853982  ;;  %v3960_v34 = vpop.eup %3959  ;;  %v3059_v18 = vxor.u32 2147483648, %v3958_v16  ;;  %v3134_v11 = vsel %vm3663_vm7, 0, %v3662_v51  ;;  %vm3054_vm10 = vcmp.lt.s32.totalorder %v3053_v53, 2 }
 0x559   : >> { %v2943_v39 = vsel %vm6441_vm8, %v6111_v15, %v2940_v57  ;;  %v3056_v47 = vxor.u32 2147483648, %v3960_v34  ;;  %v3135_v32 = vsub.s32 32, %v3134_v11  ;;  %v3139_v0 = vsub.s32 4294967266, %v3134_v11 }
 0x55a   : >> { %3969 = vcosq.f32 %v2943_v39  ;;  %vm3055_vm11 = vcmp.eq.s32.totalorder %v3053_v53, 0  ;;  %v3060_v43 = vsel %vm3058_vm9, %v3059_v18, %v3960_v34  ;;  %v3136_v6 = vshll.u32 %v6410_v29, %v3134_v11  ;;  %v6855_v29 = vld [vmem:[#allocation41_spill] sm:$0xff] }
 0x55b   : >> { %v3057_v54 = vsel %vm3055_vm11, %v3958_v16, %v3056_v47  ;;  %v3137_v3 = vshrl.u32 %v3119_v7, %v3135_v32  ;;  %v3140_v20 = vadd.s32 127, %v3139_v0  ;;  %v3962_v22 = vpop.eup %3961  ;;  %3971 = vsinq.f32 %v2943_v39 }
 0x55c   : >> { %vm3051_vm12 = vweird.f32 %v6140_v25  ;;  %v3061_v58 = vsel %vm3054_vm10, %v3057_v54, %v3060_v43  ;;  %v3175_v26 = vadd.f32 %v3169_v27, %v3167_v62  ;;  %v3964_v24 = vpop.eup %3963  ;;  %v2736_v46 = vsel %vm6420_vm2, 0, %v2734_v37 }
 0x55d   : >> { %v3062_v8 = vsel %vm3051_vm12, nan, %v3061_v58  ;;  %v3138_v4 = vor.u32 %v3137_v3, %v3136_v6  ;;  %v3141_v2 = vshll.u32 %v3140_v20, 23  ;;  %v2942_v60 = vsel %vm2857_vm5, %v2941_v10, %v6210_v55 }
 0x55e   : >> { %v3173_v50 = vmul.f32 %v3062_v8, %v6855_v29  ;;  %v3176_v45 = vadd.f32 %v3175_v26, %v3171_v63  ;;  %v3966_v1 = vpop.eup %3965  ;;  %v2533_v25 = vand.u32 3, %v2532_v14  ;;  %v2740_v30 = vadd.s32 3, %v2736_v46 }
 0x55f   : >> { %v3142_v31 = vor.u32 4788187, %v3141_v2  ;;  %v3968_v56 = vpop.eup %3967  ;;  %v2944_v9 = vsel %vm6441_vm8, 0, %v2942_v60  ;;  %v3145_v33 = vcvt.s32.f32 %v3138_v4  ;;  %v3149_v57 = vsub.s32 4, %v6398_v61  ;;  %v6859_v2 = vld [vmem:[#allocation37_spill] sm:$0xff] }
 0x560   : >> { %v3177_v48 = vadd.f32 %v3176_v45, %v3173_v50  ;;  %v2948_v55 = vadd.s32 3, %v2944_v9  ;;  %vm2538_vm13 = vcmp.eq.s32.totalorder %v2533_v25, 2  ;;  %v2741_v51 = vand.u32 3, %v2740_v30 }
 0x561   : >> { %v3143_v36 = vand.u32 2147483647, %v3142_v31  ;;  %v2539_v10 = vxor.u32 2147483648, %v3962_v22  ;;  %v2747_v14 = vxor.u32 2147483648, %v3966_v1  ;;  %vm3065_vm14 = vcmp.lt.s32.totalorder %v6197_v12, 0 }
 0x562   : >> { %v3178_v52 = vrot.slane %v3177_v48, 4  ;;  %v2744_v21 = vxor.u32 2147483648, %v3968_v56  ;;  %v6856_v39 = vand.u32 2147483647, %v6197_v12  ;;  %v3150_v34 = vsel %vm3065_vm14, %v3149_v57, %v6398_v61 }
 0x563   : >> { %v3146_v44 = vmul.f32 %v3145_v33, %v3143_v36  ;;  %v2536_v18 = vxor.u32 2147483648, %v3964_v24  ;;  %v2949_v11 = vand.u32 3, %v2948_v55  ;;  %vm2743_vm0 = vcmp.eq.s32.totalorder %v2741_v51, 0 }
 0x564   : >> { %v3970_v53 = vpop.eup %3969  ;;  %v3179_v59 = vadd.f32 %v3178_v52, %v3177_v48  ;;  %vm6469_vm15 = vcmp.le.f32.partialorder %v6856_v39, 0.7853982  ;;  %vm2746_vm1 = vcmp.eq.s32.totalorder %v2741_v51, 2  ;;  %vm2535_vm2 = vcmp.eq.s32.totalorder %v2533_v25, 0 }
 0x565   : >> { %v3147_v37 = vxor.u32 2147483648, %v3146_v44  ;;  %v3972_v35 = vpop.eup %3971  ;;  %v2955_v32 = vxor.u32 2147483648, %v3970_v53  ;;  %v3152_v0 = vsel %vm6469_vm15, 0, %v3150_v34  ;;  %v2540_v61 = vsel %vm2538_vm13, %v2539_v10, %v3964_v24 }
 0x566   : >> { %v3180_v16 = vrot.slane %v3179_v59, 2  ;;  %v2952_v7 = vxor.u32 2147483648, %v3972_v35  ;;  %v2745_v54 = vsel %vm2743_vm0, %v3966_v1, %v2744_v21  ;;  %v2748_v6 = vsel %vm2746_vm1, %v2747_v14, %v3968_v56 }
 0x567   : >> { %v3148_v27 = vsel %vm3065_vm14, %v3147_v37, %v3146_v44  ;;  %v2537_v3 = vsel %vm2535_vm2, %v3962_v22, %v2536_v18  ;;  %vm2951_vm3 = vcmp.eq.s32.totalorder %v2949_v11, 0  ;;  %vm2954_vm4 = vcmp.eq.s32.totalorder %v2949_v11, 2 }
 0x568   : >> { %v3151_v63 = vsel %vm6469_vm15, %v6197_v12, %v3148_v27  ;;  %v3181_v47 = vadd.f32 %v3180_v16, %v3179_v59  ;;  %vm2742_vm5 = vcmp.lt.s32.totalorder %v2741_v51, 2  ;;  %v2953_v58 = vsel %vm2951_vm3, %v3970_v53, %v2952_v7 }
 0x569   : >> { %3973 = vcosq.f32 %v3151_v63  ;;  %v2956_v26 = vsel %vm2954_vm4, %v2955_v32, %v3972_v35  ;;  %v3156_v8 = vadd.s32 3, %v3152_v0  ;;  %vm2534_vm6 = vcmp.lt.s32.totalorder %v2533_v25, 2 }
 0x56a   : >> { %3975 = vsinq.f32 %v3151_v63  ;;  %v3182_v43 = vrot.slane %v3181_v47, 1  ;;  %v2749_v4 = vsel %vm2742_vm5, %v2745_v54, %v2748_v6  ;;  %v2541_v60 = vsel %vm2534_vm6, %v2537_v3, %v2540_v61 }
 0x56b   : >> { %vm2950_vm8 = vcmp.lt.s32.totalorder %v2949_v11, 2  ;;  %vm2739_vm7 = vweird.f32 %v5863_v49  ;;  %vm2531_vm9 = vweird.f32 %v5793_v38  ;;  %v3157_v45 = vand.u32 3, %v3156_v8 }
 0x56c   : >> { %v3183_v20 = vadd.f32 %v3182_v43, %v3181_v47  ;;  %v2957_v24 = vsel %vm2950_vm8, %v2953_v58, %v2956_v26  ;;  %v2750_v22 = vsel %vm2739_vm7, nan, %v2749_v4  ;;  %v2542_v31 = vsel %vm2531_vm9, nan, %v2541_v60 }
 0x56d   : >> { %vm2947_vm10 = vweird.f32 %v6111_v15  ;;  %v3170_v36 = vmul.f32 %v2750_v22, %v6853_v28  ;;  %vm3162_vm11 = vcmp.eq.s32.totalorder %v3157_v45, 2  ;;  %v3168_v52 = vmul.f32 %v2542_v31, %v6852_v40 }
 0x56e   : >> { %v6481_v46 = vadd.f32 %v3183_v20, %v6859_v2  ;;  %v2958_v48 = vsel %vm2947_vm10, nan, %v2957_v24  ;;  %vm3159_vm12 = vcmp.eq.s32.totalorder %v3157_v45, 0  ;;  %vm3158_vm13 = vcmp.lt.s32.totalorder %v3157_v45, 2 }
 0x56f   : >> { %v3172_v57 = vmul.f32 %v2958_v48, %v6854_v5  ;;  %vm3155_vm14 = vweird.f32 %v6197_v12  ;;  %v3184_v59 = vadd.f32 %v3170_v36, %v3168_v52 }
 0x570   : >> { %v3198_v50 = vand.u32 2139095040, %v6481_v46  ;;  %v3195_v1 = vand.u32 2147483647, %v6481_v46 }
 0x571   : >> { %v3185_v14 = vadd.f32 %v3184_v59, %v3172_v57 }
 0x572   : >> { %v3199_v56 = vshrl.u32 %v3198_v50, 23  ;;  %v3202_v38 = vand.u32 8388607, %v3195_v1 }
 0x573   : >> { %v3974_v25 = vpop.eup %3973 }
 0x574   : >> { %v3976_v30 = vpop.eup %3975  ;;  %v3163_v9 = vxor.u32 2147483648, %v3974_v25  ;;  %v3664_v49 = vadd.s32 4294967169, %v3199_v56  ;;  %v3203_v37 = vor.u32 8388608, %v3202_v38 }
 0x575   : >> { %v3160_v33 = vxor.u32 2147483648, %v3976_v30 }
 0x576   : >> { %v3164_v44 = vsel %vm3162_vm11, %v3163_v9, %v3976_v30  ;;  %v3205_v15 = vadd.s32 1, %v3664_v49  ;;  %v3243_v12 = vshll.u32 %v3203_v37, 8 }
 0x577   : >> { %v3161_v53 = vsel %vm3159_vm12, %v3974_v25, %v3160_v33 }
 0x578   : >> { %v3165_v55 = vsel %vm3158_vm13, %v3161_v53, %v3164_v44  ;;  %vm3206_vm15 = vcmp.gt.s32.totalorder %v3205_v15, 0  ;;  %vm3197_vm13 = vcmp.lt.s32.totalorder %v6481_v46, 0 }
 0x579   : >> { %v3166_v51 = vsel %vm3155_vm14, nan, %v3165_v55  ;;  %v3207_v35 = vsel %vm3206_vm15, %v3205_v15, 0  ;;  %vm6569_vm14 = vcmp.le.f32.partialorder %v3195_v1, 0.7853982 }
 0x57a   : >> { %v3174_v10 = vmul.f32 %v3166_v51, %v6855_v29  ;;  %v3209_v16 = vand.u32 31, %v3207_v35  ;;  %v3208_v39 = vshrl.u32 %v3207_v35, 5 }
 0x57c   : >> { %v3186_v21 = vadd.f32 %v3185_v14, %v3174_v10  ;;  %v3210_v62 = vsub.s32 32, %v3209_v16  ;;  %v3212_v27 = vshll.u32 %v6774_v13, %v3209_v16  ;;  %v3215_v34 = vshll.u32 %v6769_v42, %v3209_v16 }
 0x57d   : >> { %v3218_v18 = vshll.u32 %v6770_v17, %v3209_v16  ;;  %v3221_v7 = vshll.u32 %v6771_v41, %v3209_v16  ;;  %v3224_v43 = vshll.u32 %v6772_v19, %v3209_v16  ;;  %vm3227_vm0 = vcmp.lt.s32.totalorder %v3208_v39, 1 }
 0x57e   : >> { %v3187_v11 = vrot.slane %v3186_v21, 4  ;;  %v3213_v63 = vshrl.u32 %v6769_v42, %v3210_v62  ;;  %v3216_v47 = vshrl.u32 %v6770_v17, %v3210_v62  ;;  %v3219_v32 = vshrl.u32 %v6771_v41, %v3210_v62 }
 0x57f   : >> { %v3222_v0 = vshrl.u32 %v6772_v19, %v3210_v62  ;;  %v3225_v61 = vshrl.u32 %v6773_v23, %v3210_v62  ;;  %v3211_v20 = vshrl.u32 %v6774_v13, %v3210_v62  ;;  %vm3229_vm1 = vcmp.lt.s32.totalorder %v3208_v39, 3 }
 0x580   : >> { %v3188_v54 = vadd.f32 %v3187_v11, %v3186_v21  ;;  %v3214_v6 = vor.u32 %v3213_v63, %v3212_v27  ;;  %v3217_v3 = vor.u32 %v3216_v47, %v3215_v34  ;;  %v3220_v58 = vor.u32 %v3219_v32, %v3218_v18 }
 0x581   : >> { %v3223_v26 = vor.u32 %v3222_v0, %v3221_v7  ;;  %v3226_v8 = vor.u32 %v3225_v61, %v3224_v43  ;;  %vm3230_vm2 = vcmp.lt.s32.totalorder %v3208_v39, 4  ;;  %vm3228_vm3 = vcmp.lt.s32.totalorder %v3208_v39, 2 }
 0x582   : >> { %v3189_v4 = vrot.slane %v3188_v54, 2  ;;  %v3235_v60 = vsel %vm3227_vm0, %v3214_v6, %v3217_v3  ;;  %v3232_v24 = vsel %vm3230_vm2, %v3220_v58, 2102212464  ;;  %v3239_v22 = vsel %vm3227_vm0, %v3217_v3, %v3220_v58 }
 0x583   : >> { %v3236_v50 = vsel %vm3230_vm2, %v3223_v26, 920167782  ;;  %v3240_v45 = vsel %vm3230_vm2, %v3226_v8, 1326507024  ;;  %v3231_v48 = vsel %vm3227_vm0, %v3211_v20, %v3214_v6  ;;  %v3233_v49 = vsel %vm3229_vm1, %v3217_v3, %v3232_v24 }
 0x584   : >> { %v3190_v31 = vadd.f32 %v3189_v4, %v3188_v54  ;;  %v3237_v56 = vsel %vm3229_vm1, %v3220_v58, %v3236_v50  ;;  %v3241_v25 = vsel %vm3229_vm1, %v3223_v26, %v3240_v45  ;;  %v3234_v15 = vsel %vm3228_vm3, %v3231_v48, %v3233_v49 }
 0x585   : >> { %v3238_v30 = vsel %vm3228_vm3, %v3235_v60, %v3237_v56  ;;  %v3242_v9 = vsel %vm3228_vm3, %v3239_v22, %v3241_v25  ;;  %v3250_v59 = vmul.u32 %v3243_v12, %v3234_v15 }
 0x586   : >> { %v3191_v36 = vrot.slane %v3190_v31, 1  ;;  %v6509_v33 = vmul.u32.u64.low %v3243_v12, %v3242_v9  ;;  %v6510_v52 = vmul.u32.u64.high %v3243_v12, %v3242_v9, %v6509_v33 }
 0x587   : >> { %v6512_v38 = vmul.u32.u64.low %v3243_v12, %v3238_v30  ;;  %v6513_v44 = vmul.u32.u64.high %v3243_v12, %v3238_v30, %v6512_v38 }
 0x588   : >> { %v3192_v57 = vadd.f32 %v3191_v36, %v3190_v31 }
 0x589   : >> { %vm3252_vm4 = vc.u32 %v6510_v52, %v6512_v38  ;;  %v3253_v55 = vadd.s32 1, %v6513_v44 }
 0x58a   : >> { %v6517_v53 = vadd.f32 %v3192_v57, %v6859_v2 }
 0x58b   : >> { %v3254_v37 = vsel %vm3252_vm4, %v3253_v55, %v6513_v44 }
 0x58c   : >> { %v3302_v51 = vand.u32 2139095040, %v6517_v53  ;;  %v3255_v35 = vadd.s32 %v3254_v37, %v3250_v59  ;;  %v3299_v27 = vand.u32 2147483647, %v6517_v53  ;;  %vm3301_vm15 = vcmp.lt.s32.totalorder %v6517_v53, 0 }
 0x58e   : >> { %v3303_v10 = vshrl.u32 %v3302_v51, 23  ;;  %v3256_v14 = vadd.s32 536870912, %v3255_v35  ;;  %v3306_v47 = vand.u32 8388607, %v3299_v27  ;;  %vm3300_vm0 = vcmp.le.f32.partialorder %v3299_v27, 0.7853982 }
 0x590   : >> { %v3668_v16 = vadd.s32 4294967169, %v3303_v10  ;;  %v6524_v21 = vshrl.u32 %v3256_v14, 30  ;;  %v3307_v31 = vor.u32 8388608, %v3306_v47 }
 0x592   : >> { %v3309_v39 = vadd.s32 1, %v3668_v16  ;;  %v3258_v62 = vshll.u32 %v6524_v21, 30  ;;  %v3347_v49 = vshll.u32 %v3307_v31, 8 }
 0x594   : >> { %vm3310_vm5 = vcmp.gt.s32.totalorder %v3309_v39, 0  ;;  %v6528_v18 = vsub.s32 %v3255_v35, %v3258_v62  ;;  %v3251_v62 = vadd.s32 %v6512_v38, %v6510_v52 }
 0x595   : >> { %v3311_v34 = vsel %vm3310_vm5, %v3309_v39, 0  ;;  %vm3287_vm5 = vweird.f32 %v6481_v46 }
 0x596   : >> { %v3313_v12 = vand.u32 31, %v3311_v34  ;;  %v3261_v11 = vsub.s32 0, %v6528_v18  ;;  %v3312_v7 = vshrl.u32 %v3311_v34, 5 }
 0x598   : >> { %v3314_v63 = vsub.s32 32, %v3313_v12  ;;  %v3316_v32 = vshll.u32 %v6774_v13, %v3313_v12  ;;  %v3319_v0 = vshll.u32 %v6769_v42, %v3313_v12  ;;  %v3665_v43 = vmin.u32 %v3261_v11, %v6528_v18 }
 0x599   : >> { %v3322_v54 = vshll.u32 %v6770_v17, %v3313_v12  ;;  %v3325_v6 = vshll.u32 %v6771_v41, %v3313_v12  ;;  %v3328_v4 = vshll.u32 %v6772_v19, %v3313_v12  ;;  %vm3331_vm6 = vcmp.lt.s32.totalorder %v3312_v7, 1 }
 0x59a   : >> { %v3317_v61 = vshrl.u32 %v6769_v42, %v3314_v63  ;;  %v3320_v3 = vshrl.u32 %v6770_v17, %v3314_v63  ;;  %v3323_v20 = vshrl.u32 %v6771_v41, %v3314_v63  ;;  %v3326_v58 = vshrl.u32 %v6772_v19, %v3314_v63 }
 0x59b   : >> { %v3329_v26 = vshrl.u32 %v6773_v23, %v3314_v63  ;;  %v3263_v8 = vclz %v3665_v43  ;;  %vm3333_vm8 = vcmp.lt.s32.totalorder %v3312_v7, 3  ;;  %vm3334_vm7 = vcmp.lt.s32.totalorder %v3312_v7, 4 }
 0x59c   : >> { %v3318_v60 = vor.u32 %v3317_v61, %v3316_v32  ;;  %v3321_v24 = vor.u32 %v3320_v3, %v3319_v0  ;;  %v3324_v50 = vor.u32 %v3323_v20, %v3322_v54  ;;  %v3327_v22 = vor.u32 %v3326_v58, %v3325_v6 }
 0x59d   : >> { %v3666_v42 = vadd.s32 4294967294, %v3263_v8  ;;  %v3330_v45 = vor.u32 %v3329_v26, %v3328_v4  ;;  %v3315_v30 = vshrl.u32 %v6774_v13, %v3314_v63  ;;  %vm3332_vm10 = vcmp.lt.s32.totalorder %v3312_v7, 2 }
 0x59e   : >> { %v3336_v17 = vsel %vm3334_vm7, %v3324_v50, 2102212464  ;;  %v3339_v41 = vsel %vm3331_vm6, %v3318_v60, %v3321_v24  ;;  %v3340_v56 = vsel %vm3334_vm7, %v3327_v22, 920167782  ;;  %v3343_v19 = vsel %vm3331_vm6, %v3321_v24, %v3324_v50 }
 0x59f   : >> { %vm3667_vm9 = vcmp.lt.s32.totalorder %v3666_v42, 0  ;;  %v3341_v23 = vsel %vm3333_vm8, %v3324_v50, %v3340_v56  ;;  %v3344_v48 = vsel %vm3334_vm7, %v3330_v45, 1326507024  ;;  %v3335_v44 = vsel %vm3331_vm6, %v3315_v30, %v3318_v60 }
 0x5a0   : >> { %v3266_v25 = vsel %vm3667_vm9, 0, %v3666_v42  ;;  %v3342_v9 = vsel %vm3332_vm10, %v3339_v41, %v3341_v23  ;;  %v3345_v36 = vsel %vm3333_vm8, %v3327_v22, %v3344_v48  ;;  %v3337_v57 = vsel %vm3333_vm8, %v3321_v24, %v3336_v17 }
 0x5a1   : >> { %v3271_v33 = vsub.s32 4294967266, %v3266_v25  ;;  %v3346_v15 = vsel %vm3332_vm10, %v3343_v19, %v3345_v36  ;;  %v6554_v51 = vmul.u32.u64.low %v3347_v49, %v3342_v9  ;;  %v6555_v37 = vmul.u32.u64.high %v3347_v49, %v3342_v9, %v6554_v51 }
 0x5a2   : >> { %v6551_v55 = vmul.u32.u64.low %v3347_v49, %v3346_v15  ;;  %v6552_v59 = vmul.u32.u64.high %v3347_v49, %v3346_v15, %v6551_v55  ;;  %v3338_v35 = vsel %vm3332_vm10, %v3335_v44, %v3337_v57  ;;  %v3267_v14 = vsub.s32 32, %v3266_v25 }
 0x5a3   : >> { %v3272_v10 = vadd.s32 127, %v3271_v33  ;;  %v3357_v13 = vadd.s32 1, %v6555_v37  ;;  %v3354_v16 = vmul.u32 %v3347_v49, %v3338_v35  ;;  %v3268_v47 = vshll.u32 %v6528_v18, %v3266_v25 }
 0x5a4   : >> { %vm3356_vm11 = vc.u32 %v6552_v59, %v6554_v51  ;;  %v3269_v11 = vshrl.u32 %v3251_v62, %v3267_v14  ;;  %v3355_v18 = vadd.s32 %v6554_v51, %v6552_v59  ;;  %v3281_v56 = vsub.s32 4, %v6524_v21 }
 0x5a5   : >> { %v3358_v39 = vsel %vm3356_vm11, %v3357_v13, %v6555_v37  ;;  %v3273_v34 = vshll.u32 %v3272_v10, 23  ;;  %v4136_v10 = vmov 1966171168   ;;  %vm3391_vm7 = vweird.f32 %v6517_v53 }
 0x5a6   : >> { %v3359_v12 = vadd.s32 %v3358_v39, %v3354_v16  ;;  %v3270_v0 = vor.u32 %v3269_v11, %v3268_v47  ;;  %v3282_v1 = vsel %vm3197_vm13, %v3281_v56, %v6524_v21  ;;  %v3407_v13 = vunpack.c.l.s4 %v4136_v10 }
 0x5a7   : >> { %v3274_v7 = vor.u32 4788187, %v3273_v34  ;;  %v3284_v9 = vsel %vm6569_vm14, 0, %v3282_v1 }
 0x5a8   : >> { %v3360_v63 = vadd.s32 536870912, %v3359_v12  ;;  %v3277_v6 = vcvt.s32.f32 %v3270_v0  ;;  %v3288_v44 = vadd.s32 3, %v3284_v9  ;;  %v3408_v11 = vunpack.c.0.s8 %v3407_v13 }
 0x5a9   : >> { %v3275_v61 = vand.u32 2147483647, %v3274_v7 }
 0x5aa   : >> { %v3361_v32 = vshrl.u32 %v3360_v63, 30  ;;  %v3289_v59 = vand.u32 3, %v3288_v44 }
 0x5ab   : >> { %v3278_v20 = vmul.f32 %v3277_v6, %v3275_v61 }
 0x5ac   : >> { %v3362_v43 = vshll.u32 %v3361_v32, 30  ;;  %v3385_v30 = vsub.s32 4, %v3361_v32  ;;  %vm3291_vm1 = vcmp.eq.s32.totalorder %v3289_v59, 0  ;;  %vm3294_vm2 = vcmp.eq.s32.totalorder %v3289_v59, 2 }
 0x5ad   : >> { %v3279_v8 = vxor.u32 2147483648, %v3278_v20  ;;  %vm3290_vm3 = vcmp.lt.s32.totalorder %v3289_v59, 2 }
 0x5ae   : >> { %v3363_v54 = vsub.s32 %v3359_v12, %v3362_v43  ;;  %v3386_v33 = vsel %vm3301_vm15, %v3385_v30, %v3361_v32  ;;  %v6862_v43 = vld [vmem:[#allocation44_spill] sm:$0xff] }
 0x5af   : >> { %v3280_v38 = vsel %vm3197_vm13, %v3279_v8, %v3278_v20  ;;  %v3388_v21 = vsel %vm3300_vm0, 0, %v3386_v33  ;;  %v3411_v61 = vsub.s32 %v3408_v11, %v6862_v43  ;;  %v6863_v20 = vlaneseq }
 0x5b0   : >> { %v3365_v3 = vsub.s32 0, %v3363_v54  ;;  %v3283_v31 = vsel %vm6569_vm14, %v6481_v46, %v3280_v38  ;;  %v3392_v35 = vadd.s32 3, %v3388_v21 }
 0x5b1   : >> { %3977 = vcosq.f32 %v3283_v31  ;;  %vm3424_vm9 = vcmp.lt.s32.totalorder %v6863_v20, 256 }
 0x5b2   : >> { %v3669_v58 = vmin.u32 %v3365_v3, %v3363_v54  ;;  %3979 = vsinq.f32 %v3283_v31  ;;  %v3393_v16 = vand.u32 3, %v3392_v35 }
 0x5b4   : >> { %v3367_v26 = vclz %v3669_v58  ;;  %vm3398_vm4 = vcmp.eq.s32.totalorder %v3393_v16, 2  ;;  %vm3395_vm6 = vcmp.eq.s32.totalorder %v3393_v16, 0  ;;  %vm3394_vm8 = vcmp.lt.s32.totalorder %v3393_v16, 2 }
 0x5b6   : >> { %v3670_v4 = vadd.s32 4294967294, %v3367_v26 }
 0x5b8   : >> { %vm3671_vm12 = vcmp.lt.s32.totalorder %v3670_v4, 0 }
 0x5b9   : >> { %v3370_v52 = vsel %vm3671_vm12, 0, %v3670_v4 }
 0x5ba   : >> { %v3371_v60 = vsub.s32 32, %v3370_v52  ;;  %v3375_v24 = vsub.s32 4294967266, %v3370_v52  ;;  %v3372_v22 = vshll.u32 %v3363_v54, %v3370_v52 }
 0x5bb   : >> { %v3978_v15 = vpop.eup %3977 }
 0x5bc   : >> { %v3373_v42 = vshrl.u32 %v3355_v18, %v3371_v60  ;;  %v3376_v45 = vadd.s32 127, %v3375_v24  ;;  %v3980_v55 = vpop.eup %3979  ;;  %v3295_v37 = vxor.u32 2147483648, %v3978_v15 }
 0x5bd   : >> { %v3292_v51 = vxor.u32 2147483648, %v3980_v55 }
 0x5be   : >> { %v3374_v17 = vor.u32 %v3373_v42, %v3372_v22  ;;  %v3377_v41 = vshll.u32 %v3376_v45, 23  ;;  %v3296_v27 = vsel %vm3294_vm2, %v3295_v37, %v3980_v55 }
 0x5bf   : >> { %v3293_v14 = vsel %vm3291_vm1, %v3978_v15, %v3292_v51 }
 0x5c0   : >> { %v3378_v25 = vor.u32 4788187, %v3377_v41  ;;  %v3381_v19 = vcvt.s32.f32 %v3374_v17  ;;  %v3297_v34 = vsel %vm3290_vm3, %v3293_v14, %v3296_v27 }
 0x5c1   : >> { %v3298_v7 = vsel %vm3287_vm5, nan, %v3297_v34 }
 0x5c2   : >> { %v3379_v23 = vand.u32 2147483647, %v3378_v25 }
 0x5c4   : >> { %v3382_v48 = vmul.f32 %v3381_v19, %v3379_v23 }
 0x5c6   : >> { %v3383_v36 = vxor.u32 2147483648, %v3382_v48 }
 0x5c8   : >> { %v3384_v49 = vsel %vm3301_vm15, %v3383_v36, %v3382_v48 }
 0x5c9   : >> { %v3387_v57 = vsel %vm3300_vm0, %v6517_v53, %v3384_v49 }
 0x5ca   : >> { %3981 = vcosq.f32 %v3387_v57 }
 0x5cb   : >> { %3983 = vsinq.f32 %v3387_v57 }
 0x5d4   : >> { %v3982_v39 = vpop.eup %3981 }
 0x5d5   : >> { %v3984_v62 = vpop.eup %3983  ;;  %v3399_v12 = vxor.u32 2147483648, %v3982_v39 }
 0x5d6   : >> { %v3396_v63 = vxor.u32 2147483648, %v3984_v62 }
 0x5d7   : >> { %v3400_v47 = vsel %vm3398_vm4, %v3399_v12, %v3984_v62 }
 0x5d8   : >> { %v3397_v32 = vsel %vm3395_vm6, %v3982_v39, %v3396_v63 }
 0x5d9   : >> { %v3401_v0 = vsel %vm3394_vm8, %v3397_v32, %v3400_v47 }
 0x5da   : >> { %v3402_v54 = vsel %vm3391_vm7, nan, %v3401_v0 }
 0x5db   : >> { %v3405_v6 = vcombine.low %v3298_v7, %v3402_v54  ;;  %391 = sbr.rel (!%p389_p4) target bundleno = 272 (0x110), region = 100 }
 0x5dd   : >> { %v3412_v3 = vrot.slane %v3405_v6, %v3411_v61 }
 0x5df   : >> { %v3419_v58 = vrot.slane %v3412_v3, %v3411_v61 }
 0x5e1   : >> { %3426 = vst.msk [vmem:[%s3421_s8] sm:$0x3] %vm3424_vm9, %v3419_v58 }
 0x5e2   : > { %4056 = shalt.err (!%p4053_p9)
}
 0x5e3   : > { %s4057_s19 = scalar_lea.hbm %s6599_s9, 256  ;;  %s4061_s6 = scalar_lea.hbm %s6642_s4, 512 }
 0x5e4   : > { %p4058_p2 = scmp.ne.s32.totalorder %s6599_s9, %s4057_s19  ;;  %p4062_p11 = scmp.lt.u32.totalorder %s6599_s9, %s6642_s4 }
 0x5e5   : > { %p4063_p1 = scmp.lt.u32.totalorder %s4061_s6, %s4057_s19  ;;  %p4065_p6 = scmp.lt.u32.totalorder %s4057_s19, %s6599_s9 }
 0x5e6   : > { %p4059_p5 = pnand %p4058_p2, %p4254_p12 }
 0x5e7   : > { %p4064_p4 = por %p4063_p1, %p4062_p11 }
 0x5e8   : > { %p4060_p0 = pneg %p4059_p5 }
 0x5e9   : > { %p4066_p8 = por %p4065_p6, %p4064_p4 }
 0x5eb   : > { %p4067_p10 = pnand %p4066_p8, %p4060_p0 }
 0x5ed   : > { %4070 = shalt.err (!%p4067_p10)
}
 0x5ee   : > { %3805 = dma.vmem_to_hbm [thread:$0]  (%p4254_p12), %s3443_s28, 256, %s6599_s9, %s3428_s29  }
 0x5ef PF: > { %s3454_s26 = sand.u32 1, %s4105_s15   ;;  %p6864_p13 = scmp.ne.s32.totalorder %s6710_s22, 0 }
 0x5f0   : > { %p6865_p3 = scmp.ge.s32.totalorder %s4117_s18, 2  ;;  %s3455_s8 = scalar_lea.sflag [#allocation4], %s3454_s26 }
 0x5f2   : > { %p3816_p7 = pnand %p6865_p3, %p6864_p13 }
 0x5f4   : > { %4100 = dma.done.wait (!%p3816_p7), %s3455_s8, 256  }
 0x5f5   : > { %4102 = vsyncadd (!%p3816_p7), %s3455_s8, 4294967040  ;;  %p18_p9 = scmp.ge.s32.totalorder %s4219_s27, 4   ;;  %s6866_s15 = smov %s4109_s16 }
 0x5f6   : > { %s6867_s16 = smov %s4113_s17  ;;  %s6868_s17 = smov %s4250_s24 }
 0x5f7   : > { %s6869_s18 = smov %s4219_s27  ;;  %20 = sbr.rel (!%p18_p9) target bundleno = 6 (0x6), region = 111 }
 0x5fe   :  { %3460 = vsyncpa [#allocation3], 1 }
 0x5ff   :  { %3462 = vsyncpa [#allocation3 + $0x1], 1 }
 0x600   :  { %3463 = vsyncpa [#allocation6], 1 }
 0x601   :  { %3464 = vsyncpa [#allocation4], 1 }
 0x602   :  { %3466 = vsyncpa [#allocation4 + $0x1], 1 }

</bundles_post_ra>
